<compile_context>
chip_gen: v5e
topology: v5e:2x2
jax: 0.10.0
libtpu: 0.0.40
codegen_flags: <defaults>
</compile_context>

<pallas_src>
import math

import jax
import jax.numpy as jnp
from jax.experimental import pallas as pl
from jax.experimental.pallas import tpu as pltpu

D_MODEL = 32
NHEAD = 4
HEAD_DIM = D_MODEL // NHEAD
DIM_FF = 64
NUM_LAYERS = 2
EPS = 1e-5
SLAB_W = 64  # lane width of the packed parameter slabs (max matrix width used)

# ---- weight-slab row offsets (per layer, relative; all multiples of 8) -------
_W_SA_QK = 0 * D_MODEL     # (D, 2D)  fused Wq | Wk  (self-attention)
_W_SA_V = 1 * D_MODEL      # (D, D)
_W_SA_O = 2 * D_MODEL      # (D, D)
_W_CA_Q = 3 * D_MODEL      # (D, D)
_W_CA_K = 4 * D_MODEL      # (D, D)
_W_CA_V = 5 * D_MODEL      # (D, D)
_W_CA_O = 6 * D_MODEL      # (D, D)
_W_LIN1 = 7 * D_MODEL      # (D, F)
_W_LIN2 = 8 * D_MODEL      # (F, D)
_W_PER_LAYER = 8 * D_MODEL + DIM_FF     # 320 rows / layer

# ---- vector-slab row offsets (per layer, relative) ---------------------------
_V_SA_QK_B, _V_SA_V_B, _V_SA_O_B = 0, 1, 2
_V_CA_Q_B, _V_CA_K_B, _V_CA_V_B, _V_CA_O_B = 3, 4, 5, 6
_V_LIN1_B, _V_LIN2_B = 7, 8
_V_N1_W, _V_N1_B, _V_N2_W, _V_N2_B, _V_N3_W, _V_N3_B = 9, 10, 11, 12, 13, 14
_V_PER_LAYER = 15


# ---------------------------------------------------------------------------
# Fused decoder kernel (all layers + final norm in one pallas_call)
# ---------------------------------------------------------------------------
def _make_decoder_kernel(num_layers, nhead, return_intermediate):
    dh = D_MODEL // nhead
    scale = 1.0 / math.sqrt(dh)

    def kernel(tgt_ref, mem_ref, qpos_ref, pos_ref, w_ref, v_ref, *out_refs):
        out_ref = out_refs[0]
        inter_ref = out_refs[1] if return_intermediate else None

        B, Tq, D = tgt_ref.shape
        Tm = mem_ref.shape[1]
        rows_q = B * Tq
        rows_m = B * Tm

        def vec(row, n=D):                      # (1, n) bias / norm row
            return v_ref[row:row + 1, 0:n]

        def mat(row, nrows, ncols):             # (nrows, ncols) matmul RHS
            return w_ref[row:row + nrows, 0:ncols]

        def dot(a, b):
            return jnp.dot(a, b, preferred_element_type=jnp.float32)

        def layer_norm(x, w_row, b_row):
            mu = jnp.mean(x, axis=-1, keepdims=True)
            var = jnp.mean((x - mu) ** 2, axis=-1, keepdims=True)
            return (x - mu) * jax.lax.rsqrt(var + EPS) * vec(w_row) + vec(b_row)

        def attention(q3, k3, v3, wo_row, bo_row):
            # q3: (B, Tq, D); k3, v3: (B, Tk, D).  Batched over the batch axis;
            # per-head static loop; output projection folded per head and summed
            # (avoids a lane-axis concat of heads).
            nq = q3.shape[0] * q3.shape[1]
            out2 = jnp.zeros((nq, D), jnp.float32)
            for h in range(nhead):
                sl = slice(h * dh, (h + 1) * dh)
                qh = q3[:, :, sl] * scale
                kh = k3[:, :, sl]
                vh = v3[:, :, sl]
                s = jnp.einsum('bqd,bkd->bqk', qh, kh,
                               preferred_element_type=jnp.float32)
                s = s - jnp.max(s, axis=-1, keepdims=True)
                p = jnp.exp(s)
                p = p * pl.reciprocal(jnp.sum(p, axis=-1, keepdims=True),
                                      approx=True)
                oh = jnp.einsum('bqk,bkd->bqd', p, vh,
                                preferred_element_type=jnp.float32)
                out2 = out2 + dot(oh.reshape(nq, dh), mat(wo_row + h * dh, dh, D))
            return out2 + vec(bo_row)

        qpos2 = qpos_ref[...].reshape(rows_q, D)
        mem2 = mem_ref[...].reshape(rows_m, D)
        memk2 = mem2 + pos_ref[...].reshape(rows_m, D)   # memory + pos (K input)
        x2 = tgt_ref[...].reshape(rows_q, D)

        fn_w = num_layers * _V_PER_LAYER     # final-norm weight/bias rows
        fn_b = fn_w + 1

        for l in range(num_layers):
            wl = l * _W_PER_LAYER
            vl = l * _V_PER_LAYER

            # ---- self attention: q = k = x + query_pos, v = x --------------
            q_in = x2 + qpos2
            qk = dot(q_in, mat(wl + _W_SA_QK, D, 2 * D)) + vec(vl + _V_SA_QK_B, 2 * D)
            v = dot(x2, mat(wl + _W_SA_V, D, D)) + vec(vl + _V_SA_V_B)
            qk3 = qk.reshape(B, Tq, 2 * D)
            sa = attention(qk3[:, :, 0:D], qk3[:, :, D:2 * D],
                           v.reshape(B, Tq, D),
                           wl + _W_SA_O, vl + _V_SA_O_B)
            x2 = layer_norm(x2 + sa, vl + _V_N1_W, vl + _V_N1_B)

            # ---- cross attention: q = x + query_pos, k = mem + pos, v = mem -
            q = dot(x2 + qpos2, mat(wl + _W_CA_Q, D, D)) + vec(vl + _V_CA_Q_B)
            k = dot(memk2, mat(wl + _W_CA_K, D, D)) + vec(vl + _V_CA_K_B)
            vv = dot(mem2, mat(wl + _W_CA_V, D, D)) + vec(vl + _V_CA_V_B)
            ca = attention(q.reshape(B, Tq, D), k.reshape(B, Tm, D),
                           vv.reshape(B, Tm, D),
                           wl + _W_CA_O, vl + _V_CA_O_B)
            x2 = layer_norm(x2 + ca, vl + _V_N2_W, vl + _V_N2_B)

            # ---- FFN (relu; dropout = identity in eval mode) ----------------
            h = dot(x2, mat(wl + _W_LIN1, D, DIM_FF)) + vec(vl + _V_LIN1_B, DIM_FF)
            h = jnp.maximum(h, 0.0)
            f = dot(h, mat(wl + _W_LIN2, DIM_FF, D)) + vec(vl + _V_LIN2_B)
            x2 = layer_norm(x2 + f, vl + _V_N3_W, vl + _V_N3_B)

            if return_intermediate:
                inter_ref[l] = layer_norm(x2, fn_w, fn_b)

        out_ref[...] = layer_norm(x2, fn_w, fn_b)

    return kernel


# ---------------------------------------------------------------------------
# Host-side parameter packing (pre-transpose / fuse / pad into 2 slabs)
# ---------------------------------------------------------------------------
def _pad_row(v):
    v = jnp.asarray(v, jnp.float32).reshape(-1)
    return jnp.pad(v, (0, SLAB_W - v.shape[0]))


def _pad_mat(m):
    m = jnp.asarray(m, jnp.float32)
    return jnp.pad(m, ((0, 0), (0, SLAB_W - m.shape[1])))


def pack_params(params):
    D = D_MODEL
    w_blocks, v_rows = [], []
    for lp in params["layers"]:
        sa_w, sa_b = lp["sa_in_w"], lp["sa_in_b"].reshape(-1)
        ca_w, ca_b = lp["ca_in_w"], lp["ca_in_b"].reshape(-1)
        w_blocks += [
            jnp.concatenate([sa_w[0:D].T, sa_w[D:2 * D].T], axis=1),  # fused Wq|Wk
            _pad_mat(sa_w[2 * D:3 * D].T),                            # Wv
            _pad_mat(lp["sa_out_w"].T),                               # Wo
            _pad_mat(ca_w[0:D].T),
            _pad_mat(ca_w[D:2 * D].T),
            _pad_mat(ca_w[2 * D:3 * D].T),
            _pad_mat(lp["ca_out_w"].T),
            _pad_mat(lp["lin1_w"].T),                                 # (D, F)
            _pad_mat(lp["lin2_w"].T),                                 # (F, D)
        ]
        v_rows += [
            _pad_row(sa_b[0:2 * D]),                                  # fused bq|bk
            _pad_row(sa_b[2 * D:3 * D]),
            _pad_row(lp["sa_out_b"]),
            _pad_row(ca_b[0:D]),
            _pad_row(ca_b[D:2 * D]),
            _pad_row(ca_b[2 * D:3 * D]),
            _pad_row(lp["ca_out_b"]),
            _pad_row(lp["lin1_b"]),
            _pad_row(lp["lin2_b"]),
            _pad_row(lp["n1_w"]), _pad_row(lp["n1_b"]),
            _pad_row(lp["n2_w"]), _pad_row(lp["n2_b"]),
            _pad_row(lp["n3_w"]), _pad_row(lp["n3_b"]),
        ]
    v_rows += [_pad_row(params["norm_w"]), _pad_row(params["norm_b"])]
    wslab = jnp.concatenate(w_blocks, axis=0)     # (L*320, 64)
    vslab = jnp.stack(v_rows, axis=0)             # (L*15 + 2, 64)
    return wslab, vslab


# ---------------------------------------------------------------------------
# Wrapper
# ---------------------------------------------------------------------------
def _full_spec(shape):
    zeros = (0,) * len(shape)
    return pl.BlockSpec(shape, lambda i: zeros)


def transformer_decoder(tgt, memory, pos, query_pos, params,
                        return_intermediate=False):
    """tgt/query_pos: (Tq, B, D); memory/pos: (Tm, B, D)  (PyTorch layout)."""
    Tq, B, D = tgt.shape
    Tm = memory.shape[0]
    num_layers = len(params["layers"])

    x = jnp.transpose(tgt, (1, 0, 2))
    mem = jnp.transpose(memory, (1, 0, 2))
    qp = jnp.transpose(query_pos, (1, 0, 2))
    ps = jnp.transpose(pos, (1, 0, 2))
    wslab, vslab = pack_params(params)

    kernel = _make_decoder_kernel(num_layers, NHEAD, return_intermediate)

    if return_intermediate:
        out_shape = (jax.ShapeDtypeStruct((B * Tq, D), jnp.float32),
                     jax.ShapeDtypeStruct((num_layers, B * Tq, D), jnp.float32))
        out_specs = (_full_spec((B * Tq, D)),
                     _full_spec((num_layers, B * Tq, D)))
    else:
        out_shape = jax.ShapeDtypeStruct((B * Tq, D), jnp.float32)
        out_specs = _full_spec((B * Tq, D))

    result = pl.pallas_call(
        kernel,
        out_shape=out_shape,
        grid=(1,),
        in_specs=[_full_spec(x.shape), _full_spec(mem.shape),
                  _full_spec(qp.shape), _full_spec(ps.shape),
                  _full_spec(wslab.shape), _full_spec(vslab.shape)],
        out_specs=out_specs,
        compiler_params=pltpu.CompilerParams(dimension_semantics=("arbitrary",)),
    )(x, mem, qp, ps, wslab, vslab)

    if return_intermediate:
        _, inter = result
        inter = inter.reshape(num_layers, B, Tq, D)
        return jnp.transpose(inter, (0, 2, 1, 3))     # (L, Tq, B, D)
    out = result.reshape(B, Tq, D)
    return jnp.transpose(out, (1, 0, 2))[None]        # (1, Tq, B, D)


# ---------------------------------------------------------------------------
# Deterministic parameter construction (same semantics as the reference)
# ---------------------------------------------------------------------------
def _xavier(key, shape):
    fan_out, fan_in = shape
    limit = math.sqrt(6.0 / (fan_in + fan_out))
    return jax.random.uniform(key, shape, jnp.float32, -limit, limit)


def init_layer_params(key):
    ks = jax.random.split(key, 6)
    D, F = D_MODEL, DIM_FF
    zeros = lambda *s: jnp.zeros(s, jnp.float32)
    ones = lambda *s: jnp.ones(s, jnp.float32)
    return dict(
        sa_in_w=_xavier(ks[0], (3 * D, D)), sa_in_b=zeros(1, 3 * D),
        sa_out_w=_xavier(ks[1], (D, D)),    sa_out_b=zeros(1, D),
        ca_in_w=_xavier(ks[2], (3 * D, D)), ca_in_b=zeros(1, 3 * D),
        ca_out_w=_xavier(ks[3], (D, D)),    ca_out_b=zeros(1, D),
        lin1_w=_xavier(ks[4], (F, D)),      lin1_b=zeros(1, F),
        lin2_w=_xavier(ks[5], (D, F)),      lin2_b=zeros(1, D),
        n1_w=ones(1, D), n1_b=zeros(1, D),
        n2_w=ones(1, D), n2_b=zeros(1, D),
        n3_w=ones(1, D), n3_b=zeros(1, D),
    )


def init_params(key, num_layers):
    ks = jax.random.split(key, num_layers)
    return dict(
        layers=[init_layer_params(k) for k in ks],
        norm_w=jnp.ones((1, D_MODEL), jnp.float32),
        norm_b=jnp.zeros((1, D_MODEL), jnp.float32),
    )


# ---------------------------------------------------------------------------
if __name__ == "__main__":
    key = jax.random.PRNGKey(0)
    k_tgt, k_mem, k_qp, k_pos, k_par = jax.random.split(key, 5)

    B, Tq, Tm = 2, 8, 16   # batch, num queries, memory length (e.g. 4x4 features)
    tgt = jax.random.normal(k_tgt, (Tq, B, D_MODEL), jnp.float32) * 0.1
    memory = jax.random.normal(k_mem, (Tm, B, D_MODEL), jnp.float32) * 0.1
    query_pos = jax.random.normal(k_qp, (Tq, B, D_MODEL), jnp.float32) * 0.1
    pos = jax.random.normal(k_pos, (Tm, B, D_MODEL), jnp.float32) * 0.1

    params = init_params(k_par, NUM_LAYERS)

    out = transformer_decoder(tgt, memory, pos=pos, query_pos=query_pos,
                              params=params, return_intermediate=False)
    out = jax.block_until_ready(out)

    assert out.shape == (1, Tq, B, D_MODEL), out.shape
    assert bool(jnp.all(jnp.isfinite(out)))
    print("KERNEL_OK")
</pallas_src>

<mosaic_0001>
module attributes {stable_mosaic.version = 11 : i64} {
  func.func @kernel(%arg0: i32, %arg1: memref<2x8x32xf32, #tpu.memory_space<vmem>>, %arg2: memref<2x16x32xf32, #tpu.memory_space<vmem>>, %arg3: memref<2x8x32xf32, #tpu.memory_space<vmem>>, %arg4: memref<2x16x32xf32, #tpu.memory_space<vmem>>, %arg5: memref<640x64xf32, #tpu.memory_space<vmem>>, %arg6: memref<32x64xf32, #tpu.memory_space<vmem>>, %arg7: memref<16x32xf32, #tpu.memory_space<vmem>>) attributes {dimension_semantics = [#tpu.dimension_semantics<arbitrary>], iteration_bounds = array<i64: 1>, scalar_prefetch = 0 : i64, scratch_operands = 0 : i64, tpu.core_type = #tpu.core_type<tc>, window_params = [{pipeline_mode = #tpu.pipeline_mode<synchronous>, transform_indices = @transform_0, window_bounds = array<i64: 2, 8, 32>}, {pipeline_mode = #tpu.pipeline_mode<synchronous>, transform_indices = @transform_1, window_bounds = array<i64: 2, 16, 32>}, {pipeline_mode = #tpu.pipeline_mode<synchronous>, transform_indices = @transform_2, window_bounds = array<i64: 2, 8, 32>}, {pipeline_mode = #tpu.pipeline_mode<synchronous>, transform_indices = @transform_3, window_bounds = array<i64: 2, 16, 32>}, {pipeline_mode = #tpu.pipeline_mode<synchronous>, transform_indices = @transform_4, window_bounds = array<i64: 640, 64>}, {pipeline_mode = #tpu.pipeline_mode<synchronous>, transform_indices = @transform_5, window_bounds = array<i64: 32, 64>}, {pipeline_mode = #tpu.pipeline_mode<synchronous>, transform_indices = @transform_6, window_bounds = array<i64: 16, 32>}]} {
    %c0 = arith.constant 0 : index
    %c0_0 = arith.constant 0 : index
    %c0_1 = arith.constant 0 : index
    %0 = vector.load %arg3[%c0, %c0_0, %c0_1] : memref<2x8x32xf32, #tpu.memory_space<vmem>>, vector<2x8x32xf32>
    %1 = vector.shape_cast %0 : vector<2x8x32xf32> to vector<16x32xf32>
    %c0_2 = arith.constant 0 : index
    %c0_3 = arith.constant 0 : index
    %c0_4 = arith.constant 0 : index
    %2 = vector.load %arg2[%c0_2, %c0_3, %c0_4] : memref<2x16x32xf32, #tpu.memory_space<vmem>>, vector<2x16x32xf32>
    %3 = vector.shape_cast %2 : vector<2x16x32xf32> to vector<32x32xf32>
    %c0_5 = arith.constant 0 : index
    %c0_6 = arith.constant 0 : index
    %c0_7 = arith.constant 0 : index
    %4 = vector.load %arg4[%c0_5, %c0_6, %c0_7] : memref<2x16x32xf32, #tpu.memory_space<vmem>>, vector<2x16x32xf32>
    %5 = vector.shape_cast %4 : vector<2x16x32xf32> to vector<32x32xf32>
    %6 = arith.addf %3, %5 : vector<32x32xf32>
    %c0_8 = arith.constant 0 : index
    %c0_9 = arith.constant 0 : index
    %c0_10 = arith.constant 0 : index
    %7 = vector.load %arg1[%c0_8, %c0_9, %c0_10] : memref<2x8x32xf32, #tpu.memory_space<vmem>>, vector<2x8x32xf32>
    %8 = vector.shape_cast %7 : vector<2x8x32xf32> to vector<16x32xf32>
    %9 = arith.addf %8, %1 : vector<16x32xf32>
    %c0_11 = arith.constant 0 : index
    %c0_12 = arith.constant 0 : index
    %10 = vector.load %arg5[%c0_11, %c0_12] : memref<640x64xf32, #tpu.memory_space<vmem>>, vector<32x64xf32>
    %cst = arith.constant dense<0.000000e+00> : vector<16x64xf32>
    %11 = tpu.matmul %9, %10, %cst {dimension_numbers = #tpu.dot_dimension_numbers<[1], [0], [0], [1], [0, 0, 1, 1], [], []>} : vector<16x32xf32>, vector<32x64xf32>, vector<16x64xf32> -> vector<16x64xf32>
    %c0_13 = arith.constant 0 : index
    %c0_14 = arith.constant 0 : index
    %12 = vector.load %arg6[%c0_13, %c0_14] : memref<32x64xf32, #tpu.memory_space<vmem>>, vector<1x64xf32>
    %13 = vector.broadcast %12 : vector<1x64xf32> to vector<16x64xf32>
    %14 = arith.addf %11, %13 : vector<16x64xf32>
    %c32 = arith.constant 32 : index
    %c0_15 = arith.constant 0 : index
    %15 = vector.load %arg5[%c32, %c0_15] : memref<640x64xf32, #tpu.memory_space<vmem>>, vector<32x32xf32>
    %cst_16 = arith.constant dense<0.000000e+00> : vector<16x32xf32>
    %16 = tpu.matmul %8, %15, %cst_16 {dimension_numbers = #tpu.dot_dimension_numbers<[1], [0], [0], [1], [0, 0, 1, 1], [], []>} : vector<16x32xf32>, vector<32x32xf32>, vector<16x32xf32> -> vector<16x32xf32>
    %c1 = arith.constant 1 : index
    %c0_17 = arith.constant 0 : index
    %17 = vector.load %arg6[%c1, %c0_17] : memref<32x64xf32, #tpu.memory_space<vmem>>, vector<1x32xf32>
    %18 = vector.broadcast %17 : vector<1x32xf32> to vector<16x32xf32>
    %19 = arith.addf %16, %18 : vector<16x32xf32>
    %20 = vector.shape_cast %14 : vector<16x64xf32> to vector<2x8x64xf32>
    %21 = vector.extract_strided_slice %20 {offsets = [0, 0, 0], sizes = [2, 8, 32], strides = [1, 1, 1]} : vector<2x8x64xf32> to vector<2x8x32xf32>
    %22 = vector.extract_strided_slice %20 {offsets = [0, 0, 32], sizes = [2, 8, 32], strides = [1, 1, 1]} : vector<2x8x64xf32> to vector<2x8x32xf32>
    %23 = vector.shape_cast %19 : vector<16x32xf32> to vector<2x8x32xf32>
    %cst_18 = arith.constant 0.000000e+00 : f32
    %24 = vector.broadcast %cst_18 : f32 to vector<16x32xf32>
    %25 = vector.extract_strided_slice %21 {offsets = [0, 0, 0], sizes = [2, 8, 8], strides = [1, 1, 1]} : vector<2x8x32xf32> to vector<2x8x8xf32>
    %cst_19 = arith.constant 0.353553385 : f32
    %26 = vector.broadcast %cst_19 : f32 to vector<2x8x8xf32>
    %27 = arith.mulf %25, %26 : vector<2x8x8xf32>
    %28 = vector.extract_strided_slice %22 {offsets = [0, 0, 0], sizes = [2, 8, 8], strides = [1, 1, 1]} : vector<2x8x32xf32> to vector<2x8x8xf32>
    %29 = vector.extract_strided_slice %23 {offsets = [0, 0, 0], sizes = [2, 8, 8], strides = [1, 1, 1]} : vector<2x8x32xf32> to vector<2x8x8xf32>
    "tpu.trace_start"() <{level = 10 : i32, message = "bqd,bkd->bqk"}> : () -> ()
    %cst_20 = arith.constant dense<0.000000e+00> : vector<2x8x8xf32>
    %30 = tpu.matmul %27, %28, %cst_20 {dimension_numbers = #tpu.dot_dimension_numbers<[2], [2], [1], [1], [0, 0, 0, 1, 1, 1], [0], [0]>} : vector<2x8x8xf32>, vector<2x8x8xf32>, vector<2x8x8xf32> -> vector<2x8x8xf32>
    "tpu.trace_stop"() : () -> ()
    %cst_21 = arith.constant dense<0xFF800000> : vector<2x8xf32>
    %31 = vector.multi_reduction <maximumf>, %30, %cst_21 [2] : vector<2x8x8xf32> to vector<2x8xf32>
    %32 = vector.shape_cast %31 : vector<2x8xf32> to vector<2x8x1xf32>
    %33 = vector.broadcast %32 : vector<2x8x1xf32> to vector<2x8x8xf32>
    %34 = arith.subf %30, %33 : vector<2x8x8xf32>
    %35 = math.exp %34 : vector<2x8x8xf32>
    %cst_22 = arith.constant dense<0.000000e+00> : vector<2x8xf32>
    %36 = vector.multi_reduction <add>, %35, %cst_22 [2] : vector<2x8x8xf32> to vector<2x8xf32>
    %37 = vector.shape_cast %36 : vector<2x8xf32> to vector<2x8x1xf32>
    %38 = tpu.reciprocal %37 {approx = true} : vector<2x8x1xf32> -> vector<2x8x1xf32>
    %39 = vector.broadcast %38 : vector<2x8x1xf32> to vector<2x8x8xf32>
    %40 = arith.mulf %35, %39 : vector<2x8x8xf32>
    "tpu.trace_start"() <{level = 10 : i32, message = "bqk,bkd->bqd"}> : () -> ()
    %cst_23 = arith.constant dense<0.000000e+00> : vector<2x8x8xf32>
    %41 = tpu.matmul %40, %29, %cst_23 {dimension_numbers = #tpu.dot_dimension_numbers<[2], [1], [1], [2], [0, 0, 0, 1, 1, 2], [0], [0]>} : vector<2x8x8xf32>, vector<2x8x8xf32>, vector<2x8x8xf32> -> vector<2x8x8xf32>
    "tpu.trace_stop"() : () -> ()
    %42 = vector.shape_cast %41 : vector<2x8x8xf32> to vector<16x8xf32>
    %c64 = arith.constant 64 : index
    %c0_24 = arith.constant 0 : index
    %43 = vector.load %arg5[%c64, %c0_24] : memref<640x64xf32, #tpu.memory_space<vmem>>, vector<8x32xf32>
    %cst_25 = arith.constant dense<0.000000e+00> : vector<16x32xf32>
    %44 = tpu.matmul %42, %43, %cst_25 {dimension_numbers = #tpu.dot_dimension_numbers<[1], [0], [0], [1], [0, 0, 1, 1], [], []>} : vector<16x8xf32>, vector<8x32xf32>, vector<16x32xf32> -> vector<16x32xf32>
    %45 = arith.addf %24, %44 : vector<16x32xf32>
    %46 = vector.extract_strided_slice %21 {offsets = [0, 0, 8], sizes = [2, 8, 8], strides = [1, 1, 1]} : vector<2x8x32xf32> to vector<2x8x8xf32>
    %cst_26 = arith.constant 0.353553385 : f32
    %47 = vector.broadcast %cst_26 : f32 to vector<2x8x8xf32>
    %48 = arith.mulf %46, %47 : vector<2x8x8xf32>
    %49 = vector.extract_strided_slice %22 {offsets = [0, 0, 8], sizes = [2, 8, 8], strides = [1, 1, 1]} : vector<2x8x32xf32> to vector<2x8x8xf32>
    %50 = vector.extract_strided_slice %23 {offsets = [0, 0, 8], sizes = [2, 8, 8], strides = [1, 1, 1]} : vector<2x8x32xf32> to vector<2x8x8xf32>
    "tpu.trace_start"() <{level = 10 : i32, message = "bqd,bkd->bqk"}> : () -> ()
    %cst_27 = arith.constant dense<0.000000e+00> : vector<2x8x8xf32>
    %51 = tpu.matmul %48, %49, %cst_27 {dimension_numbers = #tpu.dot_dimension_numbers<[2], [2], [1], [1], [0, 0, 0, 1, 1, 1], [0], [0]>} : vector<2x8x8xf32>, vector<2x8x8xf32>, vector<2x8x8xf32> -> vector<2x8x8xf32>
    "tpu.trace_stop"() : () -> ()
    %cst_28 = arith.constant dense<0xFF800000> : vector<2x8xf32>
    %52 = vector.multi_reduction <maximumf>, %51, %cst_28 [2] : vector<2x8x8xf32> to vector<2x8xf32>
    %53 = vector.shape_cast %52 : vector<2x8xf32> to vector<2x8x1xf32>
    %54 = vector.broadcast %53 : vector<2x8x1xf32> to vector<2x8x8xf32>
    %55 = arith.subf %51, %54 : vector<2x8x8xf32>
    %56 = math.exp %55 : vector<2x8x8xf32>
    %cst_29 = arith.constant dense<0.000000e+00> : vector<2x8xf32>
    %57 = vector.multi_reduction <add>, %56, %cst_29 [2] : vector<2x8x8xf32> to vector<2x8xf32>
    %58 = vector.shape_cast %57 : vector<2x8xf32> to vector<2x8x1xf32>
    %59 = tpu.reciprocal %58 {approx = true} : vector<2x8x1xf32> -> vector<2x8x1xf32>
    %60 = vector.broadcast %59 : vector<2x8x1xf32> to vector<2x8x8xf32>
    %61 = arith.mulf %56, %60 : vector<2x8x8xf32>
    "tpu.trace_start"() <{level = 10 : i32, message = "bqk,bkd->bqd"}> : () -> ()
    %cst_30 = arith.constant dense<0.000000e+00> : vector<2x8x8xf32>
    %62 = tpu.matmul %61, %50, %cst_30 {dimension_numbers = #tpu.dot_dimension_numbers<[2], [1], [1], [2], [0, 0, 0, 1, 1, 2], [0], [0]>} : vector<2x8x8xf32>, vector<2x8x8xf32>, vector<2x8x8xf32> -> vector<2x8x8xf32>
    "tpu.trace_stop"() : () -> ()
    %63 = vector.shape_cast %62 : vector<2x8x8xf32> to vector<16x8xf32>
    %c72 = arith.constant 72 : index
    %c0_31 = arith.constant 0 : index
    %64 = vector.load %arg5[%c72, %c0_31] : memref<640x64xf32, #tpu.memory_space<vmem>>, vector<8x32xf32>
    %cst_32 = arith.constant dense<0.000000e+00> : vector<16x32xf32>
    %65 = tpu.matmul %63, %64, %cst_32 {dimension_numbers = #tpu.dot_dimension_numbers<[1], [0], [0], [1], [0, 0, 1, 1], [], []>} : vector<16x8xf32>, vector<8x32xf32>, vector<16x32xf32> -> vector<16x32xf32>
    %66 = arith.addf %45, %65 : vector<16x32xf32>
    %67 = vector.extract_strided_slice %21 {offsets = [0, 0, 16], sizes = [2, 8, 8], strides = [1, 1, 1]} : vector<2x8x32xf32> to vector<2x8x8xf32>
    %cst_33 = arith.constant 0.353553385 : f32
    %68 = vector.broadcast %cst_33 : f32 to vector<2x8x8xf32>
    %69 = arith.mulf %67, %68 : vector<2x8x8xf32>
    %70 = vector.extract_strided_slice %22 {offsets = [0, 0, 16], sizes = [2, 8, 8], strides = [1, 1, 1]} : vector<2x8x32xf32> to vector<2x8x8xf32>
    %71 = vector.extract_strided_slice %23 {offsets = [0, 0, 16], sizes = [2, 8, 8], strides = [1, 1, 1]} : vector<2x8x32xf32> to vector<2x8x8xf32>
    "tpu.trace_start"() <{level = 10 : i32, message = "bqd,bkd->bqk"}> : () -> ()
    %cst_34 = arith.constant dense<0.000000e+00> : vector<2x8x8xf32>
    %72 = tpu.matmul %69, %70, %cst_34 {dimension_numbers = #tpu.dot_dimension_numbers<[2], [2], [1], [1], [0, 0, 0, 1, 1, 1], [0], [0]>} : vector<2x8x8xf32>, vector<2x8x8xf32>, vector<2x8x8xf32> -> vector<2x8x8xf32>
    "tpu.trace_stop"() : () -> ()
    %cst_35 = arith.constant dense<0xFF800000> : vector<2x8xf32>
    %73 = vector.multi_reduction <maximumf>, %72, %cst_35 [2] : vector<2x8x8xf32> to vector<2x8xf32>
    %74 = vector.shape_cast %73 : vector<2x8xf32> to vector<2x8x1xf32>
    %75 = vector.broadcast %74 : vector<2x8x1xf32> to vector<2x8x8xf32>
    %76 = arith.subf %72, %75 : vector<2x8x8xf32>
    %77 = math.exp %76 : vector<2x8x8xf32>
    %cst_36 = arith.constant dense<0.000000e+00> : vector<2x8xf32>
    %78 = vector.multi_reduction <add>, %77, %cst_36 [2] : vector<2x8x8xf32> to vector<2x8xf32>
    %79 = vector.shape_cast %78 : vector<2x8xf32> to vector<2x8x1xf32>
    %80 = tpu.reciprocal %79 {approx = true} : vector<2x8x1xf32> -> vector<2x8x1xf32>
    %81 = vector.broadcast %80 : vector<2x8x1xf32> to vector<2x8x8xf32>
    %82 = arith.mulf %77, %81 : vector<2x8x8xf32>
    "tpu.trace_start"() <{level = 10 : i32, message = "bqk,bkd->bqd"}> : () -> ()
    %cst_37 = arith.constant dense<0.000000e+00> : vector<2x8x8xf32>
    %83 = tpu.matmul %82, %71, %cst_37 {dimension_numbers = #tpu.dot_dimension_numbers<[2], [1], [1], [2], [0, 0, 0, 1, 1, 2], [0], [0]>} : vector<2x8x8xf32>, vector<2x8x8xf32>, vector<2x8x8xf32> -> vector<2x8x8xf32>
    "tpu.trace_stop"() : () -> ()
    %84 = vector.shape_cast %83 : vector<2x8x8xf32> to vector<16x8xf32>
    %c80 = arith.constant 80 : index
    %c0_38 = arith.constant 0 : index
    %85 = vector.load %arg5[%c80, %c0_38] : memref<640x64xf32, #tpu.memory_space<vmem>>, vector<8x32xf32>
    %cst_39 = arith.constant dense<0.000000e+00> : vector<16x32xf32>
    %86 = tpu.matmul %84, %85, %cst_39 {dimension_numbers = #tpu.dot_dimension_numbers<[1], [0], [0], [1], [0, 0, 1, 1], [], []>} : vector<16x8xf32>, vector<8x32xf32>, vector<16x32xf32> -> vector<16x32xf32>
    %87 = arith.addf %66, %86 : vector<16x32xf32>
    %88 = vector.extract_strided_slice %21 {offsets = [0, 0, 24], sizes = [2, 8, 8], strides = [1, 1, 1]} : vector<2x8x32xf32> to vector<2x8x8xf32>
    %cst_40 = arith.constant 0.353553385 : f32
    %89 = vector.broadcast %cst_40 : f32 to vector<2x8x8xf32>
    %90 = arith.mulf %88, %89 : vector<2x8x8xf32>
    %91 = vector.extract_strided_slice %22 {offsets = [0, 0, 24], sizes = [2, 8, 8], strides = [1, 1, 1]} : vector<2x8x32xf32> to vector<2x8x8xf32>
    %92 = vector.extract_strided_slice %23 {offsets = [0, 0, 24], sizes = [2, 8, 8], strides = [1, 1, 1]} : vector<2x8x32xf32> to vector<2x8x8xf32>
    "tpu.trace_start"() <{level = 10 : i32, message = "bqd,bkd->bqk"}> : () -> ()
    %cst_41 = arith.constant dense<0.000000e+00> : vector<2x8x8xf32>
    %93 = tpu.matmul %90, %91, %cst_41 {dimension_numbers = #tpu.dot_dimension_numbers<[2], [2], [1], [1], [0, 0, 0, 1, 1, 1], [0], [0]>} : vector<2x8x8xf32>, vector<2x8x8xf32>, vector<2x8x8xf32> -> vector<2x8x8xf32>
    "tpu.trace_stop"() : () -> ()
    %cst_42 = arith.constant dense<0xFF800000> : vector<2x8xf32>
    %94 = vector.multi_reduction <maximumf>, %93, %cst_42 [2] : vector<2x8x8xf32> to vector<2x8xf32>
    %95 = vector.shape_cast %94 : vector<2x8xf32> to vector<2x8x1xf32>
    %96 = vector.broadcast %95 : vector<2x8x1xf32> to vector<2x8x8xf32>
    %97 = arith.subf %93, %96 : vector<2x8x8xf32>
    %98 = math.exp %97 : vector<2x8x8xf32>
    %cst_43 = arith.constant dense<0.000000e+00> : vector<2x8xf32>
    %99 = vector.multi_reduction <add>, %98, %cst_43 [2] : vector<2x8x8xf32> to vector<2x8xf32>
    %100 = vector.shape_cast %99 : vector<2x8xf32> to vector<2x8x1xf32>
    %101 = tpu.reciprocal %100 {approx = true} : vector<2x8x1xf32> -> vector<2x8x1xf32>
    %102 = vector.broadcast %101 : vector<2x8x1xf32> to vector<2x8x8xf32>
    %103 = arith.mulf %98, %102 : vector<2x8x8xf32>
    "tpu.trace_start"() <{level = 10 : i32, message = "bqk,bkd->bqd"}> : () -> ()
    %cst_44 = arith.constant dense<0.000000e+00> : vector<2x8x8xf32>
    %104 = tpu.matmul %103, %92, %cst_44 {dimension_numbers = #tpu.dot_dimension_numbers<[2], [1], [1], [2], [0, 0, 0, 1, 1, 2], [0], [0]>} : vector<2x8x8xf32>, vector<2x8x8xf32>, vector<2x8x8xf32> -> vector<2x8x8xf32>
    "tpu.trace_stop"() : () -> ()
    %105 = vector.shape_cast %104 : vector<2x8x8xf32> to vector<16x8xf32>
    %c88 = arith.constant 88 : index
    %c0_45 = arith.constant 0 : index
    %106 = vector.load %arg5[%c88, %c0_45] : memref<640x64xf32, #tpu.memory_space<vmem>>, vector<8x32xf32>
    %cst_46 = arith.constant dense<0.000000e+00> : vector<16x32xf32>
    %107 = tpu.matmul %105, %106, %cst_46 {dimension_numbers = #tpu.dot_dimension_numbers<[1], [0], [0], [1], [0, 0, 1, 1], [], []>} : vector<16x8xf32>, vector<8x32xf32>, vector<16x32xf32> -> vector<16x32xf32>
    %108 = arith.addf %87, %107 : vector<16x32xf32>
    %c2 = arith.constant 2 : index
    %c0_47 = arith.constant 0 : index
    %109 = vector.load %arg6[%c2, %c0_47] : memref<32x64xf32, #tpu.memory_space<vmem>>, vector<1x32xf32>
    %110 = vector.broadcast %109 : vector<1x32xf32> to vector<16x32xf32>
    %111 = arith.addf %108, %110 : vector<16x32xf32>
    %112 = arith.addf %8, %111 : vector<16x32xf32>
    %cst_48 = arith.constant dense<0.000000e+00> : vector<16xf32>
    %113 = vector.multi_reduction <add>, %112, %cst_48 [1] : vector<16x32xf32> to vector<16xf32>
    %114 = vector.shape_cast %113 : vector<16xf32> to vector<16x1xf32>
    %cst_49 = arith.constant 3.200000e+01 : f32
    %115 = vector.broadcast %cst_49 : f32 to vector<16x1xf32>
    %116 = arith.divf %114, %115 : vector<16x1xf32>
    %117 = vector.broadcast %116 : vector<16x1xf32> to vector<16x32xf32>
    %118 = arith.subf %112, %117 : vector<16x32xf32>
    %119 = arith.mulf %118, %118 : vector<16x32xf32>
    %cst_50 = arith.constant dense<0.000000e+00> : vector<16xf32>
    %120 = vector.multi_reduction <add>, %119, %cst_50 [1] : vector<16x32xf32> to vector<16xf32>
    %121 = vector.shape_cast %120 : vector<16xf32> to vector<16x1xf32>
    %cst_51 = arith.constant 3.200000e+01 : f32
    %122 = vector.broadcast %cst_51 : f32 to vector<16x1xf32>
    %123 = arith.divf %121, %122 : vector<16x1xf32>
    %124 = vector.broadcast %116 : vector<16x1xf32> to vector<16x32xf32>
    %125 = arith.subf %112, %124 : vector<16x32xf32>
    %cst_52 = arith.constant 9.99999974E-6 : f32
    %126 = vector.broadcast %cst_52 : f32 to vector<16x1xf32>
    %127 = arith.addf %123, %126 : vector<16x1xf32>
    %128 = math.rsqrt %127 : vector<16x1xf32>
    %129 = vector.broadcast %128 : vector<16x1xf32> to vector<16x32xf32>
    %130 = arith.mulf %125, %129 : vector<16x32xf32>
    %c9 = arith.constant 9 : index
    %c0_53 = arith.constant 0 : index
    %131 = vector.load %arg6[%c9, %c0_53] : memref<32x64xf32, #tpu.memory_space<vmem>>, vector<1x32xf32>
    %132 = vector.broadcast %131 : vector<1x32xf32> to vector<16x32xf32>
    %133 = arith.mulf %130, %132 : vector<16x32xf32>
    %c10 = arith.constant 10 : index
    %c0_54 = arith.constant 0 : index
    %134 = vector.load %arg6[%c10, %c0_54] : memref<32x64xf32, #tpu.memory_space<vmem>>, vector<1x32xf32>
    %135 = vector.broadcast %134 : vector<1x32xf32> to vector<16x32xf32>
    %136 = arith.addf %133, %135 : vector<16x32xf32>
    %137 = arith.addf %136, %1 : vector<16x32xf32>
    %c96 = arith.constant 96 : index
    %c0_55 = arith.constant 0 : index
    %138 = vector.load %arg5[%c96, %c0_55] : memref<640x64xf32, #tpu.memory_space<vmem>>, vector<32x32xf32>
    %cst_56 = arith.constant dense<0.000000e+00> : vector<16x32xf32>
    %139 = tpu.matmul %137, %138, %cst_56 {dimension_numbers = #tpu.dot_dimension_numbers<[1], [0], [0], [1], [0, 0, 1, 1], [], []>} : vector<16x32xf32>, vector<32x32xf32>, vector<16x32xf32> -> vector<16x32xf32>
    %c3 = arith.constant 3 : index
    %c0_57 = arith.constant 0 : index
    %140 = vector.load %arg6[%c3, %c0_57] : memref<32x64xf32, #tpu.memory_space<vmem>>, vector<1x32xf32>
    %141 = vector.broadcast %140 : vector<1x32xf32> to vector<16x32xf32>
    %142 = arith.addf %139, %141 : vector<16x32xf32>
    %c128 = arith.constant 128 : index
    %c0_58 = arith.constant 0 : index
    %143 = vector.load %arg5[%c128, %c0_58] : memref<640x64xf32, #tpu.memory_space<vmem>>, vector<32x32xf32>
    %cst_59 = arith.constant dense<0.000000e+00> : vector<32x32xf32>
    %144 = tpu.matmul %6, %143, %cst_59 {dimension_numbers = #tpu.dot_dimension_numbers<[1], [0], [0], [1], [0, 0, 1, 1], [], []>} : vector<32x32xf32>, vector<32x32xf32>, vector<32x32xf32> -> vector<32x32xf32>
    %c4 = arith.constant 4 : index
    %c0_60 = arith.constant 0 : index
    %145 = vector.load %arg6[%c4, %c0_60] : memref<32x64xf32, #tpu.memory_space<vmem>>, vector<1x32xf32>
    %146 = vector.broadcast %145 : vector<1x32xf32> to vector<32x32xf32>
    %147 = arith.addf %144, %146 : vector<32x32xf32>
    %c160 = arith.constant 160 : index
    %c0_61 = arith.constant 0 : index
    %148 = vector.load %arg5[%c160, %c0_61] : memref<640x64xf32, #tpu.memory_space<vmem>>, vector<32x32xf32>
    %cst_62 = arith.constant dense<0.000000e+00> : vector<32x32xf32>
    %149 = tpu.matmul %3, %148, %cst_62 {dimension_numbers = #tpu.dot_dimension_numbers<[1], [0], [0], [1], [0, 0, 1, 1], [], []>} : vector<32x32xf32>, vector<32x32xf32>, vector<32x32xf32> -> vector<32x32xf32>
    %c5 = arith.constant 5 : index
    %c0_63 = arith.constant 0 : index
    %150 = vector.load %arg6[%c5, %c0_63] : memref<32x64xf32, #tpu.memory_space<vmem>>, vector<1x32xf32>
    %151 = vector.broadcast %150 : vector<1x32xf32> to vector<32x32xf32>
    %152 = arith.addf %149, %151 : vector<32x32xf32>
    %153 = vector.shape_cast %142 : vector<16x32xf32> to vector<2x8x32xf32>
    %154 = vector.shape_cast %147 : vector<32x32xf32> to vector<2x16x32xf32>
    %155 = vector.shape_cast %152 : vector<32x32xf32> to vector<2x16x32xf32>
    %cst_64 = arith.constant 0.000000e+00 : f32
    %156 = vector.broadcast %cst_64 : f32 to vector<16x32xf32>
    %157 = vector.extract_strided_slice %153 {offsets = [0, 0, 0], sizes = [2, 8, 8], strides = [1, 1, 1]} : vector<2x8x32xf32> to vector<2x8x8xf32>
    %cst_65 = arith.constant 0.353553385 : f32
    %158 = vector.broadcast %cst_65 : f32 to vector<2x8x8xf32>
    %159 = arith.mulf %157, %158 : vector<2x8x8xf32>
    %160 = vector.extract_strided_slice %154 {offsets = [0, 0, 0], sizes = [2, 16, 8], strides = [1, 1, 1]} : vector<2x16x32xf32> to vector<2x16x8xf32>
    %161 = vector.extract_strided_slice %155 {offsets = [0, 0, 0], sizes = [2, 16, 8], strides = [1, 1, 1]} : vector<2x16x32xf32> to vector<2x16x8xf32>
    "tpu.trace_start"() <{level = 10 : i32, message = "bqd,bkd->bqk"}> : () -> ()
    %cst_66 = arith.constant dense<0.000000e+00> : vector<2x8x16xf32>
    %162 = tpu.matmul %159, %160, %cst_66 {dimension_numbers = #tpu.dot_dimension_numbers<[2], [2], [1], [1], [0, 0, 0, 1, 1, 1], [0], [0]>} : vector<2x8x8xf32>, vector<2x16x8xf32>, vector<2x8x16xf32> -> vector<2x8x16xf32>
    "tpu.trace_stop"() : () -> ()
    %cst_67 = arith.constant dense<0xFF800000> : vector<2x8xf32>
    %163 = vector.multi_reduction <maximumf>, %162, %cst_67 [2] : vector<2x8x16xf32> to vector<2x8xf32>
    %164 = vector.shape_cast %163 : vector<2x8xf32> to vector<2x8x1xf32>
    %165 = vector.broadcast %164 : vector<2x8x1xf32> to vector<2x8x16xf32>
    %166 = arith.subf %162, %165 : vector<2x8x16xf32>
    %167 = math.exp %166 : vector<2x8x16xf32>
    %cst_68 = arith.constant dense<0.000000e+00> : vector<2x8xf32>
    %168 = vector.multi_reduction <add>, %167, %cst_68 [2] : vector<2x8x16xf32> to vector<2x8xf32>
    %169 = vector.shape_cast %168 : vector<2x8xf32> to vector<2x8x1xf32>
    %170 = tpu.reciprocal %169 {approx = true} : vector<2x8x1xf32> -> vector<2x8x1xf32>
    %171 = vector.broadcast %170 : vector<2x8x1xf32> to vector<2x8x16xf32>
    %172 = arith.mulf %167, %171 : vector<2x8x16xf32>
    "tpu.trace_start"() <{level = 10 : i32, message = "bqk,bkd->bqd"}> : () -> ()
    %cst_69 = arith.constant dense<0.000000e+00> : vector<2x8x8xf32>
    %173 = tpu.matmul %172, %161, %cst_69 {dimension_numbers = #tpu.dot_dimension_numbers<[2], [1], [1], [2], [0, 0, 0, 1, 1, 2], [0], [0]>} : vector<2x8x16xf32>, vector<2x16x8xf32>, vector<2x8x8xf32> -> vector<2x8x8xf32>
    "tpu.trace_stop"() : () -> ()
    %174 = vector.shape_cast %173 : vector<2x8x8xf32> to vector<16x8xf32>
    %c192 = arith.constant 192 : index
    %c0_70 = arith.constant 0 : index
    %175 = vector.load %arg5[%c192, %c0_70] : memref<640x64xf32, #tpu.memory_space<vmem>>, vector<8x32xf32>
    %cst_71 = arith.constant dense<0.000000e+00> : vector<16x32xf32>
    %176 = tpu.matmul %174, %175, %cst_71 {dimension_numbers = #tpu.dot_dimension_numbers<[1], [0], [0], [1], [0, 0, 1, 1], [], []>} : vector<16x8xf32>, vector<8x32xf32>, vector<16x32xf32> -> vector<16x32xf32>
    %177 = arith.addf %156, %176 : vector<16x32xf32>
    %178 = vector.extract_strided_slice %153 {offsets = [0, 0, 8], sizes = [2, 8, 8], strides = [1, 1, 1]} : vector<2x8x32xf32> to vector<2x8x8xf32>
    %cst_72 = arith.constant 0.353553385 : f32
    %179 = vector.broadcast %cst_72 : f32 to vector<2x8x8xf32>
    %180 = arith.mulf %178, %179 : vector<2x8x8xf32>
    %181 = vector.extract_strided_slice %154 {offsets = [0, 0, 8], sizes = [2, 16, 8], strides = [1, 1, 1]} : vector<2x16x32xf32> to vector<2x16x8xf32>
    %182 = vector.extract_strided_slice %155 {offsets = [0, 0, 8], sizes = [2, 16, 8], strides = [1, 1, 1]} : vector<2x16x32xf32> to vector<2x16x8xf32>
    "tpu.trace_start"() <{level = 10 : i32, message = "bqd,bkd->bqk"}> : () -> ()
    %cst_73 = arith.constant dense<0.000000e+00> : vector<2x8x16xf32>
    %183 = tpu.matmul %180, %181, %cst_73 {dimension_numbers = #tpu.dot_dimension_numbers<[2], [2], [1], [1], [0, 0, 0, 1, 1, 1], [0], [0]>} : vector<2x8x8xf32>, vector<2x16x8xf32>, vector<2x8x16xf32> -> vector<2x8x16xf32>
    "tpu.trace_stop"() : () -> ()
    %cst_74 = arith.constant dense<0xFF800000> : vector<2x8xf32>
    %184 = vector.multi_reduction <maximumf>, %183, %cst_74 [2] : vector<2x8x16xf32> to vector<2x8xf32>
    %185 = vector.shape_cast %184 : vector<2x8xf32> to vector<2x8x1xf32>
    %186 = vector.broadcast %185 : vector<2x8x1xf32> to vector<2x8x16xf32>
    %187 = arith.subf %183, %186 : vector<2x8x16xf32>
    %188 = math.exp %187 : vector<2x8x16xf32>
    %cst_75 = arith.constant dense<0.000000e+00> : vector<2x8xf32>
    %189 = vector.multi_reduction <add>, %188, %cst_75 [2] : vector<2x8x16xf32> to vector<2x8xf32>
    %190 = vector.shape_cast %189 : vector<2x8xf32> to vector<2x8x1xf32>
    %191 = tpu.reciprocal %190 {approx = true} : vector<2x8x1xf32> -> vector<2x8x1xf32>
    %192 = vector.broadcast %191 : vector<2x8x1xf32> to vector<2x8x16xf32>
    %193 = arith.mulf %188, %192 : vector<2x8x16xf32>
    "tpu.trace_start"() <{level = 10 : i32, message = "bqk,bkd->bqd"}> : () -> ()
    %cst_76 = arith.constant dense<0.000000e+00> : vector<2x8x8xf32>
    %194 = tpu.matmul %193, %182, %cst_76 {dimension_numbers = #tpu.dot_dimension_numbers<[2], [1], [1], [2], [0, 0, 0, 1, 1, 2], [0], [0]>} : vector<2x8x16xf32>, vector<2x16x8xf32>, vector<2x8x8xf32> -> vector<2x8x8xf32>
    "tpu.trace_stop"() : () -> ()
    %195 = vector.shape_cast %194 : vector<2x8x8xf32> to vector<16x8xf32>
    %c200 = arith.constant 200 : index
    %c0_77 = arith.constant 0 : index
    %196 = vector.load %arg5[%c200, %c0_77] : memref<640x64xf32, #tpu.memory_space<vmem>>, vector<8x32xf32>
    %cst_78 = arith.constant dense<0.000000e+00> : vector<16x32xf32>
    %197 = tpu.matmul %195, %196, %cst_78 {dimension_numbers = #tpu.dot_dimension_numbers<[1], [0], [0], [1], [0, 0, 1, 1], [], []>} : vector<16x8xf32>, vector<8x32xf32>, vector<16x32xf32> -> vector<16x32xf32>
    %198 = arith.addf %177, %197 : vector<16x32xf32>
    %199 = vector.extract_strided_slice %153 {offsets = [0, 0, 16], sizes = [2, 8, 8], strides = [1, 1, 1]} : vector<2x8x32xf32> to vector<2x8x8xf32>
    %cst_79 = arith.constant 0.353553385 : f32
    %200 = vector.broadcast %cst_79 : f32 to vector<2x8x8xf32>
    %201 = arith.mulf %199, %200 : vector<2x8x8xf32>
    %202 = vector.extract_strided_slice %154 {offsets = [0, 0, 16], sizes = [2, 16, 8], strides = [1, 1, 1]} : vector<2x16x32xf32> to vector<2x16x8xf32>
    %203 = vector.extract_strided_slice %155 {offsets = [0, 0, 16], sizes = [2, 16, 8], strides = [1, 1, 1]} : vector<2x16x32xf32> to vector<2x16x8xf32>
    "tpu.trace_start"() <{level = 10 : i32, message = "bqd,bkd->bqk"}> : () -> ()
    %cst_80 = arith.constant dense<0.000000e+00> : vector<2x8x16xf32>
    %204 = tpu.matmul %201, %202, %cst_80 {dimension_numbers = #tpu.dot_dimension_numbers<[2], [2], [1], [1], [0, 0, 0, 1, 1, 1], [0], [0]>} : vector<2x8x8xf32>, vector<2x16x8xf32>, vector<2x8x16xf32> -> vector<2x8x16xf32>
    "tpu.trace_stop"() : () -> ()
    %cst_81 = arith.constant dense<0xFF800000> : vector<2x8xf32>
    %205 = vector.multi_reduction <maximumf>, %204, %cst_81 [2] : vector<2x8x16xf32> to vector<2x8xf32>
    %206 = vector.shape_cast %205 : vector<2x8xf32> to vector<2x8x1xf32>
    %207 = vector.broadcast %206 : vector<2x8x1xf32> to vector<2x8x16xf32>
    %208 = arith.subf %204, %207 : vector<2x8x16xf32>
    %209 = math.exp %208 : vector<2x8x16xf32>
    %cst_82 = arith.constant dense<0.000000e+00> : vector<2x8xf32>
    %210 = vector.multi_reduction <add>, %209, %cst_82 [2] : vector<2x8x16xf32> to vector<2x8xf32>
    %211 = vector.shape_cast %210 : vector<2x8xf32> to vector<2x8x1xf32>
    %212 = tpu.reciprocal %211 {approx = true} : vector<2x8x1xf32> -> vector<2x8x1xf32>
    %213 = vector.broadcast %212 : vector<2x8x1xf32> to vector<2x8x16xf32>
    %214 = arith.mulf %209, %213 : vector<2x8x16xf32>
    "tpu.trace_start"() <{level = 10 : i32, message = "bqk,bkd->bqd"}> : () -> ()
    %cst_83 = arith.constant dense<0.000000e+00> : vector<2x8x8xf32>
    %215 = tpu.matmul %214, %203, %cst_83 {dimension_numbers = #tpu.dot_dimension_numbers<[2], [1], [1], [2], [0, 0, 0, 1, 1, 2], [0], [0]>} : vector<2x8x16xf32>, vector<2x16x8xf32>, vector<2x8x8xf32> -> vector<2x8x8xf32>
    "tpu.trace_stop"() : () -> ()
    %216 = vector.shape_cast %215 : vector<2x8x8xf32> to vector<16x8xf32>
    %c208 = arith.constant 208 : index
    %c0_84 = arith.constant 0 : index
    %217 = vector.load %arg5[%c208, %c0_84] : memref<640x64xf32, #tpu.memory_space<vmem>>, vector<8x32xf32>
    %cst_85 = arith.constant dense<0.000000e+00> : vector<16x32xf32>
    %218 = tpu.matmul %216, %217, %cst_85 {dimension_numbers = #tpu.dot_dimension_numbers<[1], [0], [0], [1], [0, 0, 1, 1], [], []>} : vector<16x8xf32>, vector<8x32xf32>, vector<16x32xf32> -> vector<16x32xf32>
    %219 = arith.addf %198, %218 : vector<16x32xf32>
    %220 = vector.extract_strided_slice %153 {offsets = [0, 0, 24], sizes = [2, 8, 8], strides = [1, 1, 1]} : vector<2x8x32xf32> to vector<2x8x8xf32>
    %cst_86 = arith.constant 0.353553385 : f32
    %221 = vector.broadcast %cst_86 : f32 to vector<2x8x8xf32>
    %222 = arith.mulf %220, %221 : vector<2x8x8xf32>
    %223 = vector.extract_strided_slice %154 {offsets = [0, 0, 24], sizes = [2, 16, 8], strides = [1, 1, 1]} : vector<2x16x32xf32> to vector<2x16x8xf32>
    %224 = vector.extract_strided_slice %155 {offsets = [0, 0, 24], sizes = [2, 16, 8], strides = [1, 1, 1]} : vector<2x16x32xf32> to vector<2x16x8xf32>
    "tpu.trace_start"() <{level = 10 : i32, message = "bqd,bkd->bqk"}> : () -> ()
    %cst_87 = arith.constant dense<0.000000e+00> : vector<2x8x16xf32>
    %225 = tpu.matmul %222, %223, %cst_87 {dimension_numbers = #tpu.dot_dimension_numbers<[2], [2], [1], [1], [0, 0, 0, 1, 1, 1], [0], [0]>} : vector<2x8x8xf32>, vector<2x16x8xf32>, vector<2x8x16xf32> -> vector<2x8x16xf32>
    "tpu.trace_stop"() : () -> ()
    %cst_88 = arith.constant dense<0xFF800000> : vector<2x8xf32>
    %226 = vector.multi_reduction <maximumf>, %225, %cst_88 [2] : vector<2x8x16xf32> to vector<2x8xf32>
    %227 = vector.shape_cast %226 : vector<2x8xf32> to vector<2x8x1xf32>
    %228 = vector.broadcast %227 : vector<2x8x1xf32> to vector<2x8x16xf32>
    %229 = arith.subf %225, %228 : vector<2x8x16xf32>
    %230 = math.exp %229 : vector<2x8x16xf32>
    %cst_89 = arith.constant dense<0.000000e+00> : vector<2x8xf32>
    %231 = vector.multi_reduction <add>, %230, %cst_89 [2] : vector<2x8x16xf32> to vector<2x8xf32>
    %232 = vector.shape_cast %231 : vector<2x8xf32> to vector<2x8x1xf32>
    %233 = tpu.reciprocal %232 {approx = true} : vector<2x8x1xf32> -> vector<2x8x1xf32>
    %234 = vector.broadcast %233 : vector<2x8x1xf32> to vector<2x8x16xf32>
    %235 = arith.mulf %230, %234 : vector<2x8x16xf32>
    "tpu.trace_start"() <{level = 10 : i32, message = "bqk,bkd->bqd"}> : () -> ()
    %cst_90 = arith.constant dense<0.000000e+00> : vector<2x8x8xf32>
    %236 = tpu.matmul %235, %224, %cst_90 {dimension_numbers = #tpu.dot_dimension_numbers<[2], [1], [1], [2], [0, 0, 0, 1, 1, 2], [0], [0]>} : vector<2x8x16xf32>, vector<2x16x8xf32>, vector<2x8x8xf32> -> vector<2x8x8xf32>
    "tpu.trace_stop"() : () -> ()
    %237 = vector.shape_cast %236 : vector<2x8x8xf32> to vector<16x8xf32>
    %c216 = arith.constant 216 : index
    %c0_91 = arith.constant 0 : index
    %238 = vector.load %arg5[%c216, %c0_91] : memref<640x64xf32, #tpu.memory_space<vmem>>, vector<8x32xf32>
    %cst_92 = arith.constant dense<0.000000e+00> : vector<16x32xf32>
    %239 = tpu.matmul %237, %238, %cst_92 {dimension_numbers = #tpu.dot_dimension_numbers<[1], [0], [0], [1], [0, 0, 1, 1], [], []>} : vector<16x8xf32>, vector<8x32xf32>, vector<16x32xf32> -> vector<16x32xf32>
    %240 = arith.addf %219, %239 : vector<16x32xf32>
    %c6 = arith.constant 6 : index
    %c0_93 = arith.constant 0 : index
    %241 = vector.load %arg6[%c6, %c0_93] : memref<32x64xf32, #tpu.memory_space<vmem>>, vector<1x32xf32>
    %242 = vector.broadcast %241 : vector<1x32xf32> to vector<16x32xf32>
    %243 = arith.addf %240, %242 : vector<16x32xf32>
    %244 = arith.addf %136, %243 : vector<16x32xf32>
    %cst_94 = arith.constant dense<0.000000e+00> : vector<16xf32>
    %245 = vector.multi_reduction <add>, %244, %cst_94 [1] : vector<16x32xf32> to vector<16xf32>
    %246 = vector.shape_cast %245 : vector<16xf32> to vector<16x1xf32>
    %cst_95 = arith.constant 3.200000e+01 : f32
    %247 = vector.broadcast %cst_95 : f32 to vector<16x1xf32>
    %248 = arith.divf %246, %247 : vector<16x1xf32>
    %249 = vector.broadcast %248 : vector<16x1xf32> to vector<16x32xf32>
    %250 = arith.subf %244, %249 : vector<16x32xf32>
    %251 = arith.mulf %250, %250 : vector<16x32xf32>
    %cst_96 = arith.constant dense<0.000000e+00> : vector<16xf32>
    %252 = vector.multi_reduction <add>, %251, %cst_96 [1] : vector<16x32xf32> to vector<16xf32>
    %253 = vector.shape_cast %252 : vector<16xf32> to vector<16x1xf32>
    %cst_97 = arith.constant 3.200000e+01 : f32
    %254 = vector.broadcast %cst_97 : f32 to vector<16x1xf32>
    %255 = arith.divf %253, %254 : vector<16x1xf32>
    %256 = vector.broadcast %248 : vector<16x1xf32> to vector<16x32xf32>
    %257 = arith.subf %244, %256 : vector<16x32xf32>
    %cst_98 = arith.constant 9.99999974E-6 : f32
    %258 = vector.broadcast %cst_98 : f32 to vector<16x1xf32>
    %259 = arith.addf %255, %258 : vector<16x1xf32>
    %260 = math.rsqrt %259 : vector<16x1xf32>
    %261 = vector.broadcast %260 : vector<16x1xf32> to vector<16x32xf32>
    %262 = arith.mulf %257, %261 : vector<16x32xf32>
    %c11 = arith.constant 11 : index
    %c0_99 = arith.constant 0 : index
    %263 = vector.load %arg6[%c11, %c0_99] : memref<32x64xf32, #tpu.memory_space<vmem>>, vector<1x32xf32>
    %264 = vector.broadcast %263 : vector<1x32xf32> to vector<16x32xf32>
    %265 = arith.mulf %262, %264 : vector<16x32xf32>
    %c12 = arith.constant 12 : index
    %c0_100 = arith.constant 0 : index
    %266 = vector.load %arg6[%c12, %c0_100] : memref<32x64xf32, #tpu.memory_space<vmem>>, vector<1x32xf32>
    %267 = vector.broadcast %266 : vector<1x32xf32> to vector<16x32xf32>
    %268 = arith.addf %265, %267 : vector<16x32xf32>
    %c224 = arith.constant 224 : index
    %c0_101 = arith.constant 0 : index
    %269 = vector.load %arg5[%c224, %c0_101] : memref<640x64xf32, #tpu.memory_space<vmem>>, vector<32x64xf32>
    %cst_102 = arith.constant dense<0.000000e+00> : vector<16x64xf32>
    %270 = tpu.matmul %268, %269, %cst_102 {dimension_numbers = #tpu.dot_dimension_numbers<[1], [0], [0], [1], [0, 0, 1, 1], [], []>} : vector<16x32xf32>, vector<32x64xf32>, vector<16x64xf32> -> vector<16x64xf32>
    %c7 = arith.constant 7 : index
    %c0_103 = arith.constant 0 : index
    %271 = vector.load %arg6[%c7, %c0_103] : memref<32x64xf32, #tpu.memory_space<vmem>>, vector<1x64xf32>
    %272 = vector.broadcast %271 : vector<1x64xf32> to vector<16x64xf32>
    %273 = arith.addf %270, %272 : vector<16x64xf32>
    %cst_104 = arith.constant 0.000000e+00 : f32
    %274 = vector.broadcast %cst_104 : f32 to vector<16x64xf32>
    %275 = arith.maximumf %273, %274 : vector<16x64xf32>
    %c256 = arith.constant 256 : index
    %c0_105 = arith.constant 0 : index
    %276 = vector.load %arg5[%c256, %c0_105] : memref<640x64xf32, #tpu.memory_space<vmem>>, vector<64x32xf32>
    %cst_106 = arith.constant dense<0.000000e+00> : vector<16x32xf32>
    %277 = tpu.matmul %275, %276, %cst_106 {dimension_numbers = #tpu.dot_dimension_numbers<[1], [0], [0], [1], [0, 0, 1, 1], [], []>} : vector<16x64xf32>, vector<64x32xf32>, vector<16x32xf32> -> vector<16x32xf32>
    %c8 = arith.constant 8 : index
    %c0_107 = arith.constant 0 : index
    %278 = vector.load %arg6[%c8, %c0_107] : memref<32x64xf32, #tpu.memory_space<vmem>>, vector<1x32xf32>
    %279 = vector.broadcast %278 : vector<1x32xf32> to vector<16x32xf32>
    %280 = arith.addf %277, %279 : vector<16x32xf32>
    %281 = arith.addf %268, %280 : vector<16x32xf32>
    %cst_108 = arith.constant dense<0.000000e+00> : vector<16xf32>
    %282 = vector.multi_reduction <add>, %281, %cst_108 [1] : vector<16x32xf32> to vector<16xf32>
    %283 = vector.shape_cast %282 : vector<16xf32> to vector<16x1xf32>
    %cst_109 = arith.constant 3.200000e+01 : f32
    %284 = vector.broadcast %cst_109 : f32 to vector<16x1xf32>
    %285 = arith.divf %283, %284 : vector<16x1xf32>
    %286 = vector.broadcast %285 : vector<16x1xf32> to vector<16x32xf32>
    %287 = arith.subf %281, %286 : vector<16x32xf32>
    %288 = arith.mulf %287, %287 : vector<16x32xf32>
    %cst_110 = arith.constant dense<0.000000e+00> : vector<16xf32>
    %289 = vector.multi_reduction <add>, %288, %cst_110 [1] : vector<16x32xf32> to vector<16xf32>
    %290 = vector.shape_cast %289 : vector<16xf32> to vector<16x1xf32>
    %cst_111 = arith.constant 3.200000e+01 : f32
    %291 = vector.broadcast %cst_111 : f32 to vector<16x1xf32>
    %292 = arith.divf %290, %291 : vector<16x1xf32>
    %293 = vector.broadcast %285 : vector<16x1xf32> to vector<16x32xf32>
    %294 = arith.subf %281, %293 : vector<16x32xf32>
    %cst_112 = arith.constant 9.99999974E-6 : f32
    %295 = vector.broadcast %cst_112 : f32 to vector<16x1xf32>
    %296 = arith.addf %292, %295 : vector<16x1xf32>
    %297 = math.rsqrt %296 : vector<16x1xf32>
    %298 = vector.broadcast %297 : vector<16x1xf32> to vector<16x32xf32>
    %299 = arith.mulf %294, %298 : vector<16x32xf32>
    %c13 = arith.constant 13 : index
    %c0_113 = arith.constant 0 : index
    %300 = vector.load %arg6[%c13, %c0_113] : memref<32x64xf32, #tpu.memory_space<vmem>>, vector<1x32xf32>
    %301 = vector.broadcast %300 : vector<1x32xf32> to vector<16x32xf32>
    %302 = arith.mulf %299, %301 : vector<16x32xf32>
    %c14 = arith.constant 14 : index
    %c0_114 = arith.constant 0 : index
    %303 = vector.load %arg6[%c14, %c0_114] : memref<32x64xf32, #tpu.memory_space<vmem>>, vector<1x32xf32>
    %304 = vector.broadcast %303 : vector<1x32xf32> to vector<16x32xf32>
    %305 = arith.addf %302, %304 : vector<16x32xf32>
    %306 = arith.addf %305, %1 : vector<16x32xf32>
    %c320 = arith.constant 320 : index
    %c0_115 = arith.constant 0 : index
    %307 = vector.load %arg5[%c320, %c0_115] : memref<640x64xf32, #tpu.memory_space<vmem>>, vector<32x64xf32>
    %cst_116 = arith.constant dense<0.000000e+00> : vector<16x64xf32>
    %308 = tpu.matmul %306, %307, %cst_116 {dimension_numbers = #tpu.dot_dimension_numbers<[1], [0], [0], [1], [0, 0, 1, 1], [], []>} : vector<16x32xf32>, vector<32x64xf32>, vector<16x64xf32> -> vector<16x64xf32>
    %c15 = arith.constant 15 : index
    %c0_117 = arith.constant 0 : index
    %309 = vector.load %arg6[%c15, %c0_117] : memref<32x64xf32, #tpu.memory_space<vmem>>, vector<1x64xf32>
    %310 = vector.broadcast %309 : vector<1x64xf32> to vector<16x64xf32>
    %311 = arith.addf %308, %310 : vector<16x64xf32>
    %c352 = arith.constant 352 : index
    %c0_118 = arith.constant 0 : index
    %312 = vector.load %arg5[%c352, %c0_118] : memref<640x64xf32, #tpu.memory_space<vmem>>, vector<32x32xf32>
    %cst_119 = arith.constant dense<0.000000e+00> : vector<16x32xf32>
    %313 = tpu.matmul %305, %312, %cst_119 {dimension_numbers = #tpu.dot_dimension_numbers<[1], [0], [0], [1], [0, 0, 1, 1], [], []>} : vector<16x32xf32>, vector<32x32xf32>, vector<16x32xf32> -> vector<16x32xf32>
    %c16 = arith.constant 16 : index
    %c0_120 = arith.constant 0 : index
    %314 = vector.load %arg6[%c16, %c0_120] : memref<32x64xf32, #tpu.memory_space<vmem>>, vector<1x32xf32>
    %315 = vector.broadcast %314 : vector<1x32xf32> to vector<16x32xf32>
    %316 = arith.addf %313, %315 : vector<16x32xf32>
    %317 = vector.shape_cast %311 : vector<16x64xf32> to vector<2x8x64xf32>
    %318 = vector.extract_strided_slice %317 {offsets = [0, 0, 0], sizes = [2, 8, 32], strides = [1, 1, 1]} : vector<2x8x64xf32> to vector<2x8x32xf32>
    %319 = vector.extract_strided_slice %317 {offsets = [0, 0, 32], sizes = [2, 8, 32], strides = [1, 1, 1]} : vector<2x8x64xf32> to vector<2x8x32xf32>
    %320 = vector.shape_cast %316 : vector<16x32xf32> to vector<2x8x32xf32>
    %cst_121 = arith.constant 0.000000e+00 : f32
    %321 = vector.broadcast %cst_121 : f32 to vector<16x32xf32>
    %322 = vector.extract_strided_slice %318 {offsets = [0, 0, 0], sizes = [2, 8, 8], strides = [1, 1, 1]} : vector<2x8x32xf32> to vector<2x8x8xf32>
    %cst_122 = arith.constant 0.353553385 : f32
    %323 = vector.broadcast %cst_122 : f32 to vector<2x8x8xf32>
    %324 = arith.mulf %322, %323 : vector<2x8x8xf32>
    %325 = vector.extract_strided_slice %319 {offsets = [0, 0, 0], sizes = [2, 8, 8], strides = [1, 1, 1]} : vector<2x8x32xf32> to vector<2x8x8xf32>
    %326 = vector.extract_strided_slice %320 {offsets = [0, 0, 0], sizes = [2, 8, 8], strides = [1, 1, 1]} : vector<2x8x32xf32> to vector<2x8x8xf32>
    "tpu.trace_start"() <{level = 10 : i32, message = "bqd,bkd->bqk"}> : () -> ()
    %cst_123 = arith.constant dense<0.000000e+00> : vector<2x8x8xf32>
    %327 = tpu.matmul %324, %325, %cst_123 {dimension_numbers = #tpu.dot_dimension_numbers<[2], [2], [1], [1], [0, 0, 0, 1, 1, 1], [0], [0]>} : vector<2x8x8xf32>, vector<2x8x8xf32>, vector<2x8x8xf32> -> vector<2x8x8xf32>
    "tpu.trace_stop"() : () -> ()
    %cst_124 = arith.constant dense<0xFF800000> : vector<2x8xf32>
    %328 = vector.multi_reduction <maximumf>, %327, %cst_124 [2] : vector<2x8x8xf32> to vector<2x8xf32>
    %329 = vector.shape_cast %328 : vector<2x8xf32> to vector<2x8x1xf32>
    %330 = vector.broadcast %329 : vector<2x8x1xf32> to vector<2x8x8xf32>
    %331 = arith.subf %327, %330 : vector<2x8x8xf32>
    %332 = math.exp %331 : vector<2x8x8xf32>
    %cst_125 = arith.constant dense<0.000000e+00> : vector<2x8xf32>
    %333 = vector.multi_reduction <add>, %332, %cst_125 [2] : vector<2x8x8xf32> to vector<2x8xf32>
    %334 = vector.shape_cast %333 : vector<2x8xf32> to vector<2x8x1xf32>
    %335 = tpu.reciprocal %334 {approx = true} : vector<2x8x1xf32> -> vector<2x8x1xf32>
    %336 = vector.broadcast %335 : vector<2x8x1xf32> to vector<2x8x8xf32>
    %337 = arith.mulf %332, %336 : vector<2x8x8xf32>
    "tpu.trace_start"() <{level = 10 : i32, message = "bqk,bkd->bqd"}> : () -> ()
    %cst_126 = arith.constant dense<0.000000e+00> : vector<2x8x8xf32>
    %338 = tpu.matmul %337, %326, %cst_126 {dimension_numbers = #tpu.dot_dimension_numbers<[2], [1], [1], [2], [0, 0, 0, 1, 1, 2], [0], [0]>} : vector<2x8x8xf32>, vector<2x8x8xf32>, vector<2x8x8xf32> -> vector<2x8x8xf32>
    "tpu.trace_stop"() : () -> ()
    %339 = vector.shape_cast %338 : vector<2x8x8xf32> to vector<16x8xf32>
    %c384 = arith.constant 384 : index
    %c0_127 = arith.constant 0 : index
    %340 = vector.load %arg5[%c384, %c0_127] : memref<640x64xf32, #tpu.memory_space<vmem>>, vector<8x32xf32>
    %cst_128 = arith.constant dense<0.000000e+00> : vector<16x32xf32>
    %341 = tpu.matmul %339, %340, %cst_128 {dimension_numbers = #tpu.dot_dimension_numbers<[1], [0], [0], [1], [0, 0, 1, 1], [], []>} : vector<16x8xf32>, vector<8x32xf32>, vector<16x32xf32> -> vector<16x32xf32>
    %342 = arith.addf %321, %341 : vector<16x32xf32>
    %343 = vector.extract_strided_slice %318 {offsets = [0, 0, 8], sizes = [2, 8, 8], strides = [1, 1, 1]} : vector<2x8x32xf32> to vector<2x8x8xf32>
    %cst_129 = arith.constant 0.353553385 : f32
    %344 = vector.broadcast %cst_129 : f32 to vector<2x8x8xf32>
    %345 = arith.mulf %343, %344 : vector<2x8x8xf32>
    %346 = vector.extract_strided_slice %319 {offsets = [0, 0, 8], sizes = [2, 8, 8], strides = [1, 1, 1]} : vector<2x8x32xf32> to vector<2x8x8xf32>
    %347 = vector.extract_strided_slice %320 {offsets = [0, 0, 8], sizes = [2, 8, 8], strides = [1, 1, 1]} : vector<2x8x32xf32> to vector<2x8x8xf32>
    "tpu.trace_start"() <{level = 10 : i32, message = "bqd,bkd->bqk"}> : () -> ()
    %cst_130 = arith.constant dense<0.000000e+00> : vector<2x8x8xf32>
    %348 = tpu.matmul %345, %346, %cst_130 {dimension_numbers = #tpu.dot_dimension_numbers<[2], [2], [1], [1], [0, 0, 0, 1, 1, 1], [0], [0]>} : vector<2x8x8xf32>, vector<2x8x8xf32>, vector<2x8x8xf32> -> vector<2x8x8xf32>
    "tpu.trace_stop"() : () -> ()
    %cst_131 = arith.constant dense<0xFF800000> : vector<2x8xf32>
    %349 = vector.multi_reduction <maximumf>, %348, %cst_131 [2] : vector<2x8x8xf32> to vector<2x8xf32>
    %350 = vector.shape_cast %349 : vector<2x8xf32> to vector<2x8x1xf32>
    %351 = vector.broadcast %350 : vector<2x8x1xf32> to vector<2x8x8xf32>
    %352 = arith.subf %348, %351 : vector<2x8x8xf32>
    %353 = math.exp %352 : vector<2x8x8xf32>
    %cst_132 = arith.constant dense<0.000000e+00> : vector<2x8xf32>
    %354 = vector.multi_reduction <add>, %353, %cst_132 [2] : vector<2x8x8xf32> to vector<2x8xf32>
    %355 = vector.shape_cast %354 : vector<2x8xf32> to vector<2x8x1xf32>
    %356 = tpu.reciprocal %355 {approx = true} : vector<2x8x1xf32> -> vector<2x8x1xf32>
    %357 = vector.broadcast %356 : vector<2x8x1xf32> to vector<2x8x8xf32>
    %358 = arith.mulf %353, %357 : vector<2x8x8xf32>
    "tpu.trace_start"() <{level = 10 : i32, message = "bqk,bkd->bqd"}> : () -> ()
    %cst_133 = arith.constant dense<0.000000e+00> : vector<2x8x8xf32>
    %359 = tpu.matmul %358, %347, %cst_133 {dimension_numbers = #tpu.dot_dimension_numbers<[2], [1], [1], [2], [0, 0, 0, 1, 1, 2], [0], [0]>} : vector<2x8x8xf32>, vector<2x8x8xf32>, vector<2x8x8xf32> -> vector<2x8x8xf32>
    "tpu.trace_stop"() : () -> ()
    %360 = vector.shape_cast %359 : vector<2x8x8xf32> to vector<16x8xf32>
    %c392 = arith.constant 392 : index
    %c0_134 = arith.constant 0 : index
    %361 = vector.load %arg5[%c392, %c0_134] : memref<640x64xf32, #tpu.memory_space<vmem>>, vector<8x32xf32>
    %cst_135 = arith.constant dense<0.000000e+00> : vector<16x32xf32>
    %362 = tpu.matmul %360, %361, %cst_135 {dimension_numbers = #tpu.dot_dimension_numbers<[1], [0], [0], [1], [0, 0, 1, 1], [], []>} : vector<16x8xf32>, vector<8x32xf32>, vector<16x32xf32> -> vector<16x32xf32>
    %363 = arith.addf %342, %362 : vector<16x32xf32>
    %364 = vector.extract_strided_slice %318 {offsets = [0, 0, 16], sizes = [2, 8, 8], strides = [1, 1, 1]} : vector<2x8x32xf32> to vector<2x8x8xf32>
    %cst_136 = arith.constant 0.353553385 : f32
    %365 = vector.broadcast %cst_136 : f32 to vector<2x8x8xf32>
    %366 = arith.mulf %364, %365 : vector<2x8x8xf32>
    %367 = vector.extract_strided_slice %319 {offsets = [0, 0, 16], sizes = [2, 8, 8], strides = [1, 1, 1]} : vector<2x8x32xf32> to vector<2x8x8xf32>
    %368 = vector.extract_strided_slice %320 {offsets = [0, 0, 16], sizes = [2, 8, 8], strides = [1, 1, 1]} : vector<2x8x32xf32> to vector<2x8x8xf32>
    "tpu.trace_start"() <{level = 10 : i32, message = "bqd,bkd->bqk"}> : () -> ()
    %cst_137 = arith.constant dense<0.000000e+00> : vector<2x8x8xf32>
    %369 = tpu.matmul %366, %367, %cst_137 {dimension_numbers = #tpu.dot_dimension_numbers<[2], [2], [1], [1], [0, 0, 0, 1, 1, 1], [0], [0]>} : vector<2x8x8xf32>, vector<2x8x8xf32>, vector<2x8x8xf32> -> vector<2x8x8xf32>
    "tpu.trace_stop"() : () -> ()
    %cst_138 = arith.constant dense<0xFF800000> : vector<2x8xf32>
    %370 = vector.multi_reduction <maximumf>, %369, %cst_138 [2] : vector<2x8x8xf32> to vector<2x8xf32>
    %371 = vector.shape_cast %370 : vector<2x8xf32> to vector<2x8x1xf32>
    %372 = vector.broadcast %371 : vector<2x8x1xf32> to vector<2x8x8xf32>
    %373 = arith.subf %369, %372 : vector<2x8x8xf32>
    %374 = math.exp %373 : vector<2x8x8xf32>
    %cst_139 = arith.constant dense<0.000000e+00> : vector<2x8xf32>
    %375 = vector.multi_reduction <add>, %374, %cst_139 [2] : vector<2x8x8xf32> to vector<2x8xf32>
    %376 = vector.shape_cast %375 : vector<2x8xf32> to vector<2x8x1xf32>
    %377 = tpu.reciprocal %376 {approx = true} : vector<2x8x1xf32> -> vector<2x8x1xf32>
    %378 = vector.broadcast %377 : vector<2x8x1xf32> to vector<2x8x8xf32>
    %379 = arith.mulf %374, %378 : vector<2x8x8xf32>
    "tpu.trace_start"() <{level = 10 : i32, message = "bqk,bkd->bqd"}> : () -> ()
    %cst_140 = arith.constant dense<0.000000e+00> : vector<2x8x8xf32>
    %380 = tpu.matmul %379, %368, %cst_140 {dimension_numbers = #tpu.dot_dimension_numbers<[2], [1], [1], [2], [0, 0, 0, 1, 1, 2], [0], [0]>} : vector<2x8x8xf32>, vector<2x8x8xf32>, vector<2x8x8xf32> -> vector<2x8x8xf32>
    "tpu.trace_stop"() : () -> ()
    %381 = vector.shape_cast %380 : vector<2x8x8xf32> to vector<16x8xf32>
    %c400 = arith.constant 400 : index
    %c0_141 = arith.constant 0 : index
    %382 = vector.load %arg5[%c400, %c0_141] : memref<640x64xf32, #tpu.memory_space<vmem>>, vector<8x32xf32>
    %cst_142 = arith.constant dense<0.000000e+00> : vector<16x32xf32>
    %383 = tpu.matmul %381, %382, %cst_142 {dimension_numbers = #tpu.dot_dimension_numbers<[1], [0], [0], [1], [0, 0, 1, 1], [], []>} : vector<16x8xf32>, vector<8x32xf32>, vector<16x32xf32> -> vector<16x32xf32>
    %384 = arith.addf %363, %383 : vector<16x32xf32>
    %385 = vector.extract_strided_slice %318 {offsets = [0, 0, 24], sizes = [2, 8, 8], strides = [1, 1, 1]} : vector<2x8x32xf32> to vector<2x8x8xf32>
    %cst_143 = arith.constant 0.353553385 : f32
    %386 = vector.broadcast %cst_143 : f32 to vector<2x8x8xf32>
    %387 = arith.mulf %385, %386 : vector<2x8x8xf32>
    %388 = vector.extract_strided_slice %319 {offsets = [0, 0, 24], sizes = [2, 8, 8], strides = [1, 1, 1]} : vector<2x8x32xf32> to vector<2x8x8xf32>
    %389 = vector.extract_strided_slice %320 {offsets = [0, 0, 24], sizes = [2, 8, 8], strides = [1, 1, 1]} : vector<2x8x32xf32> to vector<2x8x8xf32>
    "tpu.trace_start"() <{level = 10 : i32, message = "bqd,bkd->bqk"}> : () -> ()
    %cst_144 = arith.constant dense<0.000000e+00> : vector<2x8x8xf32>
    %390 = tpu.matmul %387, %388, %cst_144 {dimension_numbers = #tpu.dot_dimension_numbers<[2], [2], [1], [1], [0, 0, 0, 1, 1, 1], [0], [0]>} : vector<2x8x8xf32>, vector<2x8x8xf32>, vector<2x8x8xf32> -> vector<2x8x8xf32>
    "tpu.trace_stop"() : () -> ()
    %cst_145 = arith.constant dense<0xFF800000> : vector<2x8xf32>
    %391 = vector.multi_reduction <maximumf>, %390, %cst_145 [2] : vector<2x8x8xf32> to vector<2x8xf32>
    %392 = vector.shape_cast %391 : vector<2x8xf32> to vector<2x8x1xf32>
    %393 = vector.broadcast %392 : vector<2x8x1xf32> to vector<2x8x8xf32>
    %394 = arith.subf %390, %393 : vector<2x8x8xf32>
    %395 = math.exp %394 : vector<2x8x8xf32>
    %cst_146 = arith.constant dense<0.000000e+00> : vector<2x8xf32>
    %396 = vector.multi_reduction <add>, %395, %cst_146 [2] : vector<2x8x8xf32> to vector<2x8xf32>
    %397 = vector.shape_cast %396 : vector<2x8xf32> to vector<2x8x1xf32>
    %398 = tpu.reciprocal %397 {approx = true} : vector<2x8x1xf32> -> vector<2x8x1xf32>
    %399 = vector.broadcast %398 : vector<2x8x1xf32> to vector<2x8x8xf32>
    %400 = arith.mulf %395, %399 : vector<2x8x8xf32>
    "tpu.trace_start"() <{level = 10 : i32, message = "bqk,bkd->bqd"}> : () -> ()
    %cst_147 = arith.constant dense<0.000000e+00> : vector<2x8x8xf32>
    %401 = tpu.matmul %400, %389, %cst_147 {dimension_numbers = #tpu.dot_dimension_numbers<[2], [1], [1], [2], [0, 0, 0, 1, 1, 2], [0], [0]>} : vector<2x8x8xf32>, vector<2x8x8xf32>, vector<2x8x8xf32> -> vector<2x8x8xf32>
    "tpu.trace_stop"() : () -> ()
    %402 = vector.shape_cast %401 : vector<2x8x8xf32> to vector<16x8xf32>
    %c408 = arith.constant 408 : index
    %c0_148 = arith.constant 0 : index
    %403 = vector.load %arg5[%c408, %c0_148] : memref<640x64xf32, #tpu.memory_space<vmem>>, vector<8x32xf32>
    %cst_149 = arith.constant dense<0.000000e+00> : vector<16x32xf32>
    %404 = tpu.matmul %402, %403, %cst_149 {dimension_numbers = #tpu.dot_dimension_numbers<[1], [0], [0], [1], [0, 0, 1, 1], [], []>} : vector<16x8xf32>, vector<8x32xf32>, vector<16x32xf32> -> vector<16x32xf32>
    %405 = arith.addf %384, %404 : vector<16x32xf32>
    %c17 = arith.constant 17 : index
    %c0_150 = arith.constant 0 : index
    %406 = vector.load %arg6[%c17, %c0_150] : memref<32x64xf32, #tpu.memory_space<vmem>>, vector<1x32xf32>
    %407 = vector.broadcast %406 : vector<1x32xf32> to vector<16x32xf32>
    %408 = arith.addf %405, %407 : vector<16x32xf32>
    %409 = arith.addf %305, %408 : vector<16x32xf32>
    %cst_151 = arith.constant dense<0.000000e+00> : vector<16xf32>
    %410 = vector.multi_reduction <add>, %409, %cst_151 [1] : vector<16x32xf32> to vector<16xf32>
    %411 = vector.shape_cast %410 : vector<16xf32> to vector<16x1xf32>
    %cst_152 = arith.constant 3.200000e+01 : f32
    %412 = vector.broadcast %cst_152 : f32 to vector<16x1xf32>
    %413 = arith.divf %411, %412 : vector<16x1xf32>
    %414 = vector.broadcast %413 : vector<16x1xf32> to vector<16x32xf32>
    %415 = arith.subf %409, %414 : vector<16x32xf32>
    %416 = arith.mulf %415, %415 : vector<16x32xf32>
    %cst_153 = arith.constant dense<0.000000e+00> : vector<16xf32>
    %417 = vector.multi_reduction <add>, %416, %cst_153 [1] : vector<16x32xf32> to vector<16xf32>
    %418 = vector.shape_cast %417 : vector<16xf32> to vector<16x1xf32>
    %cst_154 = arith.constant 3.200000e+01 : f32
    %419 = vector.broadcast %cst_154 : f32 to vector<16x1xf32>
    %420 = arith.divf %418, %419 : vector<16x1xf32>
    %421 = vector.broadcast %413 : vector<16x1xf32> to vector<16x32xf32>
    %422 = arith.subf %409, %421 : vector<16x32xf32>
    %cst_155 = arith.constant 9.99999974E-6 : f32
    %423 = vector.broadcast %cst_155 : f32 to vector<16x1xf32>
    %424 = arith.addf %420, %423 : vector<16x1xf32>
    %425 = math.rsqrt %424 : vector<16x1xf32>
    %426 = vector.broadcast %425 : vector<16x1xf32> to vector<16x32xf32>
    %427 = arith.mulf %422, %426 : vector<16x32xf32>
    %c24 = arith.constant 24 : index
    %c0_156 = arith.constant 0 : index
    %428 = vector.load %arg6[%c24, %c0_156] : memref<32x64xf32, #tpu.memory_space<vmem>>, vector<1x32xf32>
    %429 = vector.broadcast %428 : vector<1x32xf32> to vector<16x32xf32>
    %430 = arith.mulf %427, %429 : vector<16x32xf32>
    %c25 = arith.constant 25 : index
    %c0_157 = arith.constant 0 : index
    %431 = vector.load %arg6[%c25, %c0_157] : memref<32x64xf32, #tpu.memory_space<vmem>>, vector<1x32xf32>
    %432 = vector.broadcast %431 : vector<1x32xf32> to vector<16x32xf32>
    %433 = arith.addf %430, %432 : vector<16x32xf32>
    %434 = arith.addf %433, %1 : vector<16x32xf32>
    %c416 = arith.constant 416 : index
    %c0_158 = arith.constant 0 : index
    %435 = vector.load %arg5[%c416, %c0_158] : memref<640x64xf32, #tpu.memory_space<vmem>>, vector<32x32xf32>
    %cst_159 = arith.constant dense<0.000000e+00> : vector<16x32xf32>
    %436 = tpu.matmul %434, %435, %cst_159 {dimension_numbers = #tpu.dot_dimension_numbers<[1], [0], [0], [1], [0, 0, 1, 1], [], []>} : vector<16x32xf32>, vector<32x32xf32>, vector<16x32xf32> -> vector<16x32xf32>
    %c18 = arith.constant 18 : index
    %c0_160 = arith.constant 0 : index
    %437 = vector.load %arg6[%c18, %c0_160] : memref<32x64xf32, #tpu.memory_space<vmem>>, vector<1x32xf32>
    %438 = vector.broadcast %437 : vector<1x32xf32> to vector<16x32xf32>
    %439 = arith.addf %436, %438 : vector<16x32xf32>
    %c448 = arith.constant 448 : index
    %c0_161 = arith.constant 0 : index
    %440 = vector.load %arg5[%c448, %c0_161] : memref<640x64xf32, #tpu.memory_space<vmem>>, vector<32x32xf32>
    %cst_162 = arith.constant dense<0.000000e+00> : vector<32x32xf32>
    %441 = tpu.matmul %6, %440, %cst_162 {dimension_numbers = #tpu.dot_dimension_numbers<[1], [0], [0], [1], [0, 0, 1, 1], [], []>} : vector<32x32xf32>, vector<32x32xf32>, vector<32x32xf32> -> vector<32x32xf32>
    %c19 = arith.constant 19 : index
    %c0_163 = arith.constant 0 : index
    %442 = vector.load %arg6[%c19, %c0_163] : memref<32x64xf32, #tpu.memory_space<vmem>>, vector<1x32xf32>
    %443 = vector.broadcast %442 : vector<1x32xf32> to vector<32x32xf32>
    %444 = arith.addf %441, %443 : vector<32x32xf32>
    %c480 = arith.constant 480 : index
    %c0_164 = arith.constant 0 : index
    %445 = vector.load %arg5[%c480, %c0_164] : memref<640x64xf32, #tpu.memory_space<vmem>>, vector<32x32xf32>
    %cst_165 = arith.constant dense<0.000000e+00> : vector<32x32xf32>
    %446 = tpu.matmul %3, %445, %cst_165 {dimension_numbers = #tpu.dot_dimension_numbers<[1], [0], [0], [1], [0, 0, 1, 1], [], []>} : vector<32x32xf32>, vector<32x32xf32>, vector<32x32xf32> -> vector<32x32xf32>
    %c20 = arith.constant 20 : index
    %c0_166 = arith.constant 0 : index
    %447 = vector.load %arg6[%c20, %c0_166] : memref<32x64xf32, #tpu.memory_space<vmem>>, vector<1x32xf32>
    %448 = vector.broadcast %447 : vector<1x32xf32> to vector<32x32xf32>
    %449 = arith.addf %446, %448 : vector<32x32xf32>
    %450 = vector.shape_cast %439 : vector<16x32xf32> to vector<2x8x32xf32>
    %451 = vector.shape_cast %444 : vector<32x32xf32> to vector<2x16x32xf32>
    %452 = vector.shape_cast %449 : vector<32x32xf32> to vector<2x16x32xf32>
    %cst_167 = arith.constant 0.000000e+00 : f32
    %453 = vector.broadcast %cst_167 : f32 to vector<16x32xf32>
    %454 = vector.extract_strided_slice %450 {offsets = [0, 0, 0], sizes = [2, 8, 8], strides = [1, 1, 1]} : vector<2x8x32xf32> to vector<2x8x8xf32>
    %cst_168 = arith.constant 0.353553385 : f32
    %455 = vector.broadcast %cst_168 : f32 to vector<2x8x8xf32>
    %456 = arith.mulf %454, %455 : vector<2x8x8xf32>
    %457 = vector.extract_strided_slice %451 {offsets = [0, 0, 0], sizes = [2, 16, 8], strides = [1, 1, 1]} : vector<2x16x32xf32> to vector<2x16x8xf32>
    %458 = vector.extract_strided_slice %452 {offsets = [0, 0, 0], sizes = [2, 16, 8], strides = [1, 1, 1]} : vector<2x16x32xf32> to vector<2x16x8xf32>
    "tpu.trace_start"() <{level = 10 : i32, message = "bqd,bkd->bqk"}> : () -> ()
    %cst_169 = arith.constant dense<0.000000e+00> : vector<2x8x16xf32>
    %459 = tpu.matmul %456, %457, %cst_169 {dimension_numbers = #tpu.dot_dimension_numbers<[2], [2], [1], [1], [0, 0, 0, 1, 1, 1], [0], [0]>} : vector<2x8x8xf32>, vector<2x16x8xf32>, vector<2x8x16xf32> -> vector<2x8x16xf32>
    "tpu.trace_stop"() : () -> ()
    %cst_170 = arith.constant dense<0xFF800000> : vector<2x8xf32>
    %460 = vector.multi_reduction <maximumf>, %459, %cst_170 [2] : vector<2x8x16xf32> to vector<2x8xf32>
    %461 = vector.shape_cast %460 : vector<2x8xf32> to vector<2x8x1xf32>
    %462 = vector.broadcast %461 : vector<2x8x1xf32> to vector<2x8x16xf32>
    %463 = arith.subf %459, %462 : vector<2x8x16xf32>
    %464 = math.exp %463 : vector<2x8x16xf32>
    %cst_171 = arith.constant dense<0.000000e+00> : vector<2x8xf32>
    %465 = vector.multi_reduction <add>, %464, %cst_171 [2] : vector<2x8x16xf32> to vector<2x8xf32>
    %466 = vector.shape_cast %465 : vector<2x8xf32> to vector<2x8x1xf32>
    %467 = tpu.reciprocal %466 {approx = true} : vector<2x8x1xf32> -> vector<2x8x1xf32>
    %468 = vector.broadcast %467 : vector<2x8x1xf32> to vector<2x8x16xf32>
    %469 = arith.mulf %464, %468 : vector<2x8x16xf32>
    "tpu.trace_start"() <{level = 10 : i32, message = "bqk,bkd->bqd"}> : () -> ()
    %cst_172 = arith.constant dense<0.000000e+00> : vector<2x8x8xf32>
    %470 = tpu.matmul %469, %458, %cst_172 {dimension_numbers = #tpu.dot_dimension_numbers<[2], [1], [1], [2], [0, 0, 0, 1, 1, 2], [0], [0]>} : vector<2x8x16xf32>, vector<2x16x8xf32>, vector<2x8x8xf32> -> vector<2x8x8xf32>
    "tpu.trace_stop"() : () -> ()
    %471 = vector.shape_cast %470 : vector<2x8x8xf32> to vector<16x8xf32>
    %c512 = arith.constant 512 : index
    %c0_173 = arith.constant 0 : index
    %472 = vector.load %arg5[%c512, %c0_173] : memref<640x64xf32, #tpu.memory_space<vmem>>, vector<8x32xf32>
    %cst_174 = arith.constant dense<0.000000e+00> : vector<16x32xf32>
    %473 = tpu.matmul %471, %472, %cst_174 {dimension_numbers = #tpu.dot_dimension_numbers<[1], [0], [0], [1], [0, 0, 1, 1], [], []>} : vector<16x8xf32>, vector<8x32xf32>, vector<16x32xf32> -> vector<16x32xf32>
    %474 = arith.addf %453, %473 : vector<16x32xf32>
    %475 = vector.extract_strided_slice %450 {offsets = [0, 0, 8], sizes = [2, 8, 8], strides = [1, 1, 1]} : vector<2x8x32xf32> to vector<2x8x8xf32>
    %cst_175 = arith.constant 0.353553385 : f32
    %476 = vector.broadcast %cst_175 : f32 to vector<2x8x8xf32>
    %477 = arith.mulf %475, %476 : vector<2x8x8xf32>
    %478 = vector.extract_strided_slice %451 {offsets = [0, 0, 8], sizes = [2, 16, 8], strides = [1, 1, 1]} : vector<2x16x32xf32> to vector<2x16x8xf32>
    %479 = vector.extract_strided_slice %452 {offsets = [0, 0, 8], sizes = [2, 16, 8], strides = [1, 1, 1]} : vector<2x16x32xf32> to vector<2x16x8xf32>
    "tpu.trace_start"() <{level = 10 : i32, message = "bqd,bkd->bqk"}> : () -> ()
    %cst_176 = arith.constant dense<0.000000e+00> : vector<2x8x16xf32>
    %480 = tpu.matmul %477, %478, %cst_176 {dimension_numbers = #tpu.dot_dimension_numbers<[2], [2], [1], [1], [0, 0, 0, 1, 1, 1], [0], [0]>} : vector<2x8x8xf32>, vector<2x16x8xf32>, vector<2x8x16xf32> -> vector<2x8x16xf32>
    "tpu.trace_stop"() : () -> ()
    %cst_177 = arith.constant dense<0xFF800000> : vector<2x8xf32>
    %481 = vector.multi_reduction <maximumf>, %480, %cst_177 [2] : vector<2x8x16xf32> to vector<2x8xf32>
    %482 = vector.shape_cast %481 : vector<2x8xf32> to vector<2x8x1xf32>
    %483 = vector.broadcast %482 : vector<2x8x1xf32> to vector<2x8x16xf32>
    %484 = arith.subf %480, %483 : vector<2x8x16xf32>
    %485 = math.exp %484 : vector<2x8x16xf32>
    %cst_178 = arith.constant dense<0.000000e+00> : vector<2x8xf32>
    %486 = vector.multi_reduction <add>, %485, %cst_178 [2] : vector<2x8x16xf32> to vector<2x8xf32>
    %487 = vector.shape_cast %486 : vector<2x8xf32> to vector<2x8x1xf32>
    %488 = tpu.reciprocal %487 {approx = true} : vector<2x8x1xf32> -> vector<2x8x1xf32>
    %489 = vector.broadcast %488 : vector<2x8x1xf32> to vector<2x8x16xf32>
    %490 = arith.mulf %485, %489 : vector<2x8x16xf32>
    "tpu.trace_start"() <{level = 10 : i32, message = "bqk,bkd->bqd"}> : () -> ()
    %cst_179 = arith.constant dense<0.000000e+00> : vector<2x8x8xf32>
    %491 = tpu.matmul %490, %479, %cst_179 {dimension_numbers = #tpu.dot_dimension_numbers<[2], [1], [1], [2], [0, 0, 0, 1, 1, 2], [0], [0]>} : vector<2x8x16xf32>, vector<2x16x8xf32>, vector<2x8x8xf32> -> vector<2x8x8xf32>
    "tpu.trace_stop"() : () -> ()
    %492 = vector.shape_cast %491 : vector<2x8x8xf32> to vector<16x8xf32>
    %c520 = arith.constant 520 : index
    %c0_180 = arith.constant 0 : index
    %493 = vector.load %arg5[%c520, %c0_180] : memref<640x64xf32, #tpu.memory_space<vmem>>, vector<8x32xf32>
    %cst_181 = arith.constant dense<0.000000e+00> : vector<16x32xf32>
    %494 = tpu.matmul %492, %493, %cst_181 {dimension_numbers = #tpu.dot_dimension_numbers<[1], [0], [0], [1], [0, 0, 1, 1], [], []>} : vector<16x8xf32>, vector<8x32xf32>, vector<16x32xf32> -> vector<16x32xf32>
    %495 = arith.addf %474, %494 : vector<16x32xf32>
    %496 = vector.extract_strided_slice %450 {offsets = [0, 0, 16], sizes = [2, 8, 8], strides = [1, 1, 1]} : vector<2x8x32xf32> to vector<2x8x8xf32>
    %cst_182 = arith.constant 0.353553385 : f32
    %497 = vector.broadcast %cst_182 : f32 to vector<2x8x8xf32>
    %498 = arith.mulf %496, %497 : vector<2x8x8xf32>
    %499 = vector.extract_strided_slice %451 {offsets = [0, 0, 16], sizes = [2, 16, 8], strides = [1, 1, 1]} : vector<2x16x32xf32> to vector<2x16x8xf32>
    %500 = vector.extract_strided_slice %452 {offsets = [0, 0, 16], sizes = [2, 16, 8], strides = [1, 1, 1]} : vector<2x16x32xf32> to vector<2x16x8xf32>
    "tpu.trace_start"() <{level = 10 : i32, message = "bqd,bkd->bqk"}> : () -> ()
    %cst_183 = arith.constant dense<0.000000e+00> : vector<2x8x16xf32>
    %501 = tpu.matmul %498, %499, %cst_183 {dimension_numbers = #tpu.dot_dimension_numbers<[2], [2], [1], [1], [0, 0, 0, 1, 1, 1], [0], [0]>} : vector<2x8x8xf32>, vector<2x16x8xf32>, vector<2x8x16xf32> -> vector<2x8x16xf32>
    "tpu.trace_stop"() : () -> ()
    %cst_184 = arith.constant dense<0xFF800000> : vector<2x8xf32>
    %502 = vector.multi_reduction <maximumf>, %501, %cst_184 [2] : vector<2x8x16xf32> to vector<2x8xf32>
    %503 = vector.shape_cast %502 : vector<2x8xf32> to vector<2x8x1xf32>
    %504 = vector.broadcast %503 : vector<2x8x1xf32> to vector<2x8x16xf32>
    %505 = arith.subf %501, %504 : vector<2x8x16xf32>
    %506 = math.exp %505 : vector<2x8x16xf32>
    %cst_185 = arith.constant dense<0.000000e+00> : vector<2x8xf32>
    %507 = vector.multi_reduction <add>, %506, %cst_185 [2] : vector<2x8x16xf32> to vector<2x8xf32>
    %508 = vector.shape_cast %507 : vector<2x8xf32> to vector<2x8x1xf32>
    %509 = tpu.reciprocal %508 {approx = true} : vector<2x8x1xf32> -> vector<2x8x1xf32>
    %510 = vector.broadcast %509 : vector<2x8x1xf32> to vector<2x8x16xf32>
    %511 = arith.mulf %506, %510 : vector<2x8x16xf32>
    "tpu.trace_start"() <{level = 10 : i32, message = "bqk,bkd->bqd"}> : () -> ()
    %cst_186 = arith.constant dense<0.000000e+00> : vector<2x8x8xf32>
    %512 = tpu.matmul %511, %500, %cst_186 {dimension_numbers = #tpu.dot_dimension_numbers<[2], [1], [1], [2], [0, 0, 0, 1, 1, 2], [0], [0]>} : vector<2x8x16xf32>, vector<2x16x8xf32>, vector<2x8x8xf32> -> vector<2x8x8xf32>
    "tpu.trace_stop"() : () -> ()
    %513 = vector.shape_cast %512 : vector<2x8x8xf32> to vector<16x8xf32>
    %c528 = arith.constant 528 : index
    %c0_187 = arith.constant 0 : index
    %514 = vector.load %arg5[%c528, %c0_187] : memref<640x64xf32, #tpu.memory_space<vmem>>, vector<8x32xf32>
    %cst_188 = arith.constant dense<0.000000e+00> : vector<16x32xf32>
    %515 = tpu.matmul %513, %514, %cst_188 {dimension_numbers = #tpu.dot_dimension_numbers<[1], [0], [0], [1], [0, 0, 1, 1], [], []>} : vector<16x8xf32>, vector<8x32xf32>, vector<16x32xf32> -> vector<16x32xf32>
    %516 = arith.addf %495, %515 : vector<16x32xf32>
    %517 = vector.extract_strided_slice %450 {offsets = [0, 0, 24], sizes = [2, 8, 8], strides = [1, 1, 1]} : vector<2x8x32xf32> to vector<2x8x8xf32>
    %cst_189 = arith.constant 0.353553385 : f32
    %518 = vector.broadcast %cst_189 : f32 to vector<2x8x8xf32>
    %519 = arith.mulf %517, %518 : vector<2x8x8xf32>
    %520 = vector.extract_strided_slice %451 {offsets = [0, 0, 24], sizes = [2, 16, 8], strides = [1, 1, 1]} : vector<2x16x32xf32> to vector<2x16x8xf32>
    %521 = vector.extract_strided_slice %452 {offsets = [0, 0, 24], sizes = [2, 16, 8], strides = [1, 1, 1]} : vector<2x16x32xf32> to vector<2x16x8xf32>
    "tpu.trace_start"() <{level = 10 : i32, message = "bqd,bkd->bqk"}> : () -> ()
    %cst_190 = arith.constant dense<0.000000e+00> : vector<2x8x16xf32>
    %522 = tpu.matmul %519, %520, %cst_190 {dimension_numbers = #tpu.dot_dimension_numbers<[2], [2], [1], [1], [0, 0, 0, 1, 1, 1], [0], [0]>} : vector<2x8x8xf32>, vector<2x16x8xf32>, vector<2x8x16xf32> -> vector<2x8x16xf32>
    "tpu.trace_stop"() : () -> ()
    %cst_191 = arith.constant dense<0xFF800000> : vector<2x8xf32>
    %523 = vector.multi_reduction <maximumf>, %522, %cst_191 [2] : vector<2x8x16xf32> to vector<2x8xf32>
    %524 = vector.shape_cast %523 : vector<2x8xf32> to vector<2x8x1xf32>
    %525 = vector.broadcast %524 : vector<2x8x1xf32> to vector<2x8x16xf32>
    %526 = arith.subf %522, %525 : vector<2x8x16xf32>
    %527 = math.exp %526 : vector<2x8x16xf32>
    %cst_192 = arith.constant dense<0.000000e+00> : vector<2x8xf32>
    %528 = vector.multi_reduction <add>, %527, %cst_192 [2] : vector<2x8x16xf32> to vector<2x8xf32>
    %529 = vector.shape_cast %528 : vector<2x8xf32> to vector<2x8x1xf32>
    %530 = tpu.reciprocal %529 {approx = true} : vector<2x8x1xf32> -> vector<2x8x1xf32>
    %531 = vector.broadcast %530 : vector<2x8x1xf32> to vector<2x8x16xf32>
    %532 = arith.mulf %527, %531 : vector<2x8x16xf32>
    "tpu.trace_start"() <{level = 10 : i32, message = "bqk,bkd->bqd"}> : () -> ()
    %cst_193 = arith.constant dense<0.000000e+00> : vector<2x8x8xf32>
    %533 = tpu.matmul %532, %521, %cst_193 {dimension_numbers = #tpu.dot_dimension_numbers<[2], [1], [1], [2], [0, 0, 0, 1, 1, 2], [0], [0]>} : vector<2x8x16xf32>, vector<2x16x8xf32>, vector<2x8x8xf32> -> vector<2x8x8xf32>
    "tpu.trace_stop"() : () -> ()
    %534 = vector.shape_cast %533 : vector<2x8x8xf32> to vector<16x8xf32>
    %c536 = arith.constant 536 : index
    %c0_194 = arith.constant 0 : index
    %535 = vector.load %arg5[%c536, %c0_194] : memref<640x64xf32, #tpu.memory_space<vmem>>, vector<8x32xf32>
    %cst_195 = arith.constant dense<0.000000e+00> : vector<16x32xf32>
    %536 = tpu.matmul %534, %535, %cst_195 {dimension_numbers = #tpu.dot_dimension_numbers<[1], [0], [0], [1], [0, 0, 1, 1], [], []>} : vector<16x8xf32>, vector<8x32xf32>, vector<16x32xf32> -> vector<16x32xf32>
    %537 = arith.addf %516, %536 : vector<16x32xf32>
    %c21 = arith.constant 21 : index
    %c0_196 = arith.constant 0 : index
    %538 = vector.load %arg6[%c21, %c0_196] : memref<32x64xf32, #tpu.memory_space<vmem>>, vector<1x32xf32>
    %539 = vector.broadcast %538 : vector<1x32xf32> to vector<16x32xf32>
    %540 = arith.addf %537, %539 : vector<16x32xf32>
    %541 = arith.addf %433, %540 : vector<16x32xf32>
    %cst_197 = arith.constant dense<0.000000e+00> : vector<16xf32>
    %542 = vector.multi_reduction <add>, %541, %cst_197 [1] : vector<16x32xf32> to vector<16xf32>
    %543 = vector.shape_cast %542 : vector<16xf32> to vector<16x1xf32>
    %cst_198 = arith.constant 3.200000e+01 : f32
    %544 = vector.broadcast %cst_198 : f32 to vector<16x1xf32>
    %545 = arith.divf %543, %544 : vector<16x1xf32>
    %546 = vector.broadcast %545 : vector<16x1xf32> to vector<16x32xf32>
    %547 = arith.subf %541, %546 : vector<16x32xf32>
    %548 = arith.mulf %547, %547 : vector<16x32xf32>
    %cst_199 = arith.constant dense<0.000000e+00> : vector<16xf32>
    %549 = vector.multi_reduction <add>, %548, %cst_199 [1] : vector<16x32xf32> to vector<16xf32>
    %550 = vector.shape_cast %549 : vector<16xf32> to vector<16x1xf32>
    %cst_200 = arith.constant 3.200000e+01 : f32
    %551 = vector.broadcast %cst_200 : f32 to vector<16x1xf32>
    %552 = arith.divf %550, %551 : vector<16x1xf32>
    %553 = vector.broadcast %545 : vector<16x1xf32> to vector<16x32xf32>
    %554 = arith.subf %541, %553 : vector<16x32xf32>
    %cst_201 = arith.constant 9.99999974E-6 : f32
    %555 = vector.broadcast %cst_201 : f32 to vector<16x1xf32>
    %556 = arith.addf %552, %555 : vector<16x1xf32>
    %557 = math.rsqrt %556 : vector<16x1xf32>
    %558 = vector.broadcast %557 : vector<16x1xf32> to vector<16x32xf32>
    %559 = arith.mulf %554, %558 : vector<16x32xf32>
    %c26 = arith.constant 26 : index
    %c0_202 = arith.constant 0 : index
    %560 = vector.load %arg6[%c26, %c0_202] : memref<32x64xf32, #tpu.memory_space<vmem>>, vector<1x32xf32>
    %561 = vector.broadcast %560 : vector<1x32xf32> to vector<16x32xf32>
    %562 = arith.mulf %559, %561 : vector<16x32xf32>
    %c27 = arith.constant 27 : index
    %c0_203 = arith.constant 0 : index
    %563 = vector.load %arg6[%c27, %c0_203] : memref<32x64xf32, #tpu.memory_space<vmem>>, vector<1x32xf32>
    %564 = vector.broadcast %563 : vector<1x32xf32> to vector<16x32xf32>
    %565 = arith.addf %562, %564 : vector<16x32xf32>
    %c544 = arith.constant 544 : index
    %c0_204 = arith.constant 0 : index
    %566 = vector.load %arg5[%c544, %c0_204] : memref<640x64xf32, #tpu.memory_space<vmem>>, vector<32x64xf32>
    %cst_205 = arith.constant dense<0.000000e+00> : vector<16x64xf32>
    %567 = tpu.matmul %565, %566, %cst_205 {dimension_numbers = #tpu.dot_dimension_numbers<[1], [0], [0], [1], [0, 0, 1, 1], [], []>} : vector<16x32xf32>, vector<32x64xf32>, vector<16x64xf32> -> vector<16x64xf32>
    %c22 = arith.constant 22 : index
    %c0_206 = arith.constant 0 : index
    %568 = vector.load %arg6[%c22, %c0_206] : memref<32x64xf32, #tpu.memory_space<vmem>>, vector<1x64xf32>
    %569 = vector.broadcast %568 : vector<1x64xf32> to vector<16x64xf32>
    %570 = arith.addf %567, %569 : vector<16x64xf32>
    %cst_207 = arith.constant 0.000000e+00 : f32
    %571 = vector.broadcast %cst_207 : f32 to vector<16x64xf32>
    %572 = arith.maximumf %570, %571 : vector<16x64xf32>
    %c576 = arith.constant 576 : index
    %c0_208 = arith.constant 0 : index
    %573 = vector.load %arg5[%c576, %c0_208] : memref<640x64xf32, #tpu.memory_space<vmem>>, vector<64x32xf32>
    %cst_209 = arith.constant dense<0.000000e+00> : vector<16x32xf32>
    %574 = tpu.matmul %572, %573, %cst_209 {dimension_numbers = #tpu.dot_dimension_numbers<[1], [0], [0], [1], [0, 0, 1, 1], [], []>} : vector<16x64xf32>, vector<64x32xf32>, vector<16x32xf32> -> vector<16x32xf32>
    %c23 = arith.constant 23 : index
    %c0_210 = arith.constant 0 : index
    %575 = vector.load %arg6[%c23, %c0_210] : memref<32x64xf32, #tpu.memory_space<vmem>>, vector<1x32xf32>
    %576 = vector.broadcast %575 : vector<1x32xf32> to vector<16x32xf32>
    %577 = arith.addf %574, %576 : vector<16x32xf32>
    %578 = arith.addf %565, %577 : vector<16x32xf32>
    %cst_211 = arith.constant dense<0.000000e+00> : vector<16xf32>
    %579 = vector.multi_reduction <add>, %578, %cst_211 [1] : vector<16x32xf32> to vector<16xf32>
    %580 = vector.shape_cast %579 : vector<16xf32> to vector<16x1xf32>
    %cst_212 = arith.constant 3.200000e+01 : f32
    %581 = vector.broadcast %cst_212 : f32 to vector<16x1xf32>
    %582 = arith.divf %580, %581 : vector<16x1xf32>
    %583 = vector.broadcast %582 : vector<16x1xf32> to vector<16x32xf32>
    %584 = arith.subf %578, %583 : vector<16x32xf32>
    %585 = arith.mulf %584, %584 : vector<16x32xf32>
    %cst_213 = arith.constant dense<0.000000e+00> : vector<16xf32>
    %586 = vector.multi_reduction <add>, %585, %cst_213 [1] : vector<16x32xf32> to vector<16xf32>
    %587 = vector.shape_cast %586 : vector<16xf32> to vector<16x1xf32>
    %cst_214 = arith.constant 3.200000e+01 : f32
    %588 = vector.broadcast %cst_214 : f32 to vector<16x1xf32>
    %589 = arith.divf %587, %588 : vector<16x1xf32>
    %590 = vector.broadcast %582 : vector<16x1xf32> to vector<16x32xf32>
    %591 = arith.subf %578, %590 : vector<16x32xf32>
    %cst_215 = arith.constant 9.99999974E-6 : f32
    %592 = vector.broadcast %cst_215 : f32 to vector<16x1xf32>
    %593 = arith.addf %589, %592 : vector<16x1xf32>
    %594 = math.rsqrt %593 : vector<16x1xf32>
    %595 = vector.broadcast %594 : vector<16x1xf32> to vector<16x32xf32>
    %596 = arith.mulf %591, %595 : vector<16x32xf32>
    %c28 = arith.constant 28 : index
    %c0_216 = arith.constant 0 : index
    %597 = vector.load %arg6[%c28, %c0_216] : memref<32x64xf32, #tpu.memory_space<vmem>>, vector<1x32xf32>
    %598 = vector.broadcast %597 : vector<1x32xf32> to vector<16x32xf32>
    %599 = arith.mulf %596, %598 : vector<16x32xf32>
    %c29 = arith.constant 29 : index
    %c0_217 = arith.constant 0 : index
    %600 = vector.load %arg6[%c29, %c0_217] : memref<32x64xf32, #tpu.memory_space<vmem>>, vector<1x32xf32>
    %601 = vector.broadcast %600 : vector<1x32xf32> to vector<16x32xf32>
    %602 = arith.addf %599, %601 : vector<16x32xf32>
    %cst_218 = arith.constant dense<0.000000e+00> : vector<16xf32>
    %603 = vector.multi_reduction <add>, %602, %cst_218 [1] : vector<16x32xf32> to vector<16xf32>
    %604 = vector.shape_cast %603 : vector<16xf32> to vector<16x1xf32>
    %cst_219 = arith.constant 3.200000e+01 : f32
    %605 = vector.broadcast %cst_219 : f32 to vector<16x1xf32>
    %606 = arith.divf %604, %605 : vector<16x1xf32>
    %607 = vector.broadcast %606 : vector<16x1xf32> to vector<16x32xf32>
    %608 = arith.subf %602, %607 : vector<16x32xf32>
    %609 = arith.mulf %608, %608 : vector<16x32xf32>
    %cst_220 = arith.constant dense<0.000000e+00> : vector<16xf32>
    %610 = vector.multi_reduction <add>, %609, %cst_220 [1] : vector<16x32xf32> to vector<16xf32>
    %611 = vector.shape_cast %610 : vector<16xf32> to vector<16x1xf32>
    %cst_221 = arith.constant 3.200000e+01 : f32
    %612 = vector.broadcast %cst_221 : f32 to vector<16x1xf32>
    %613 = arith.divf %611, %612 : vector<16x1xf32>
    %614 = vector.broadcast %606 : vector<16x1xf32> to vector<16x32xf32>
    %615 = arith.subf %602, %614 : vector<16x32xf32>
    %cst_222 = arith.constant 9.99999974E-6 : f32
    %616 = vector.broadcast %cst_222 : f32 to vector<16x1xf32>
    %617 = arith.addf %613, %616 : vector<16x1xf32>
    %618 = math.rsqrt %617 : vector<16x1xf32>
    %619 = vector.broadcast %618 : vector<16x1xf32> to vector<16x32xf32>
    %620 = arith.mulf %615, %619 : vector<16x32xf32>
    %c30 = arith.constant 30 : index
    %c0_223 = arith.constant 0 : index
    %621 = vector.load %arg6[%c30, %c0_223] : memref<32x64xf32, #tpu.memory_space<vmem>>, vector<1x32xf32>
    %622 = vector.broadcast %621 : vector<1x32xf32> to vector<16x32xf32>
    %623 = arith.mulf %620, %622 : vector<16x32xf32>
    %c31 = arith.constant 31 : index
    %c0_224 = arith.constant 0 : index
    %624 = vector.load %arg6[%c31, %c0_224] : memref<32x64xf32, #tpu.memory_space<vmem>>, vector<1x32xf32>
    %625 = vector.broadcast %624 : vector<1x32xf32> to vector<16x32xf32>
    %626 = arith.addf %623, %625 : vector<16x32xf32>
    %c0_225 = arith.constant 0 : index
    %c0_226 = arith.constant 0 : index
    %627 = vector.load %arg7[%c0_225, %c0_226] : memref<16x32xf32, #tpu.memory_space<vmem>>, vector<16x32xf32>
    tpu.vector_store %arg7[%c0_225, %c0_226], %626 {strides = array<i32>} : memref<16x32xf32, #tpu.memory_space<vmem>>, vector<16x32xf32>,
    return
  }
  func.func @transform_0(%arg0: i32) -> (i32, i32, i32) {
    %c0_i32 = arith.constant 0 : i32
    %c0_i32_0 = arith.constant 0 : i32
    %c0_i32_1 = arith.constant 0 : i32
    %c0_i32_2 = arith.constant 0 : i32
    return %c0_i32, %c0_i32_0, %c0_i32_1 : i32, i32, i32
  }
  func.func @transform_1(%arg0: i32) -> (i32, i32, i32) {
    %c0_i32 = arith.constant 0 : i32
    %c0_i32_0 = arith.constant 0 : i32
    %c0_i32_1 = arith.constant 0 : i32
    %c0_i32_2 = arith.constant 0 : i32
    return %c0_i32, %c0_i32_0, %c0_i32_1 : i32, i32, i32
  }
  func.func @transform_2(%arg0: i32) -> (i32, i32, i32) {
    %c0_i32 = arith.constant 0 : i32
    %c0_i32_0 = arith.constant 0 : i32
    %c0_i32_1 = arith.constant 0 : i32
    %c0_i32_2 = arith.constant 0 : i32
    return %c0_i32, %c0_i32_0, %c0_i32_1 : i32, i32, i32
  }
  func.func @transform_3(%arg0: i32) -> (i32, i32, i32) {
    %c0_i32 = arith.constant 0 : i32
    %c0_i32_0 = arith.constant 0 : i32
    %c0_i32_1 = arith.constant 0 : i32
    %c0_i32_2 = arith.constant 0 : i32
    return %c0_i32, %c0_i32_0, %c0_i32_1 : i32, i32, i32
  }
  func.func @transform_4(%arg0: i32) -> (i32, i32) {
    %c0_i32 = arith.constant 0 : i32
    %c0_i32_0 = arith.constant 0 : i32
    %c0_i32_1 = arith.constant 0 : i32
    return %c0_i32, %c0_i32_0 : i32, i32
  }
  func.func @transform_5(%arg0: i32) -> (i32, i32) {
    %c0_i32 = arith.constant 0 : i32
    %c0_i32_0 = arith.constant 0 : i32
    %c0_i32_1 = arith.constant 0 : i32
    return %c0_i32, %c0_i32_0 : i32, i32
  }
  func.func @transform_6(%arg0: i32) -> (i32, i32) {
    %c0_i32 = arith.constant 0 : i32
    %c0_i32_0 = arith.constant 0 : i32
    %c0_i32_1 = arith.constant 0 : i32
    return %c0_i32, %c0_i32_0 : i32, i32
  }
}

</mosaic_0001>

<bundles_post_ra>
// kernel: tpu_custom_call.1
= control target key start
LH: loop header
LB: loop body
LE: loop exit
PB: predicated region body
PF: predicated region fallthrough
CT: control target
= control target key end

     0   :  { %vm48_vm0 = vcmask 261120   ;;  %s5293_s0 = inlined_call_operand.vmem [shape: f32[2,8,32], index: 0, kind: input, shape index: {}]   ;;  %s5294_s1 = inlined_call_operand.vmem [shape: f32[2,16,32], index: 1, kind: input, shape index: {}]   ;;  %s5295_s2 = inlined_call_operand.vmem [shape: f32[2,8,32], index: 2, kind: input, shape index: {}]   ;;  %s5296_s3 = inlined_call_operand.vmem [shape: f32[2,16,32], index: 3, kind: input, shape index: {}]   ;;  %s5297_s4 = inlined_call_operand.vmem [shape: f32[640,64], index: 4, kind: input, shape index: {}]   ;;  %s5298_s5 = inlined_call_operand.vmem [shape: f32[32,64], index: 5, kind: input, shape index: {}]   ;;  %s5299_s6 = inlined_call_operand.hbm [shape: f32[16,32], index: 6, kind: output, shape index: {}]  }
   0x1   :  { %v45_v0 = vld [vmem:[%s5297_s4 + $0x18] sm:$0xff]  ;;  %v44_v1 = vld [vmem:[%s5297_s4 + $0x10] sm:$0xff]  ;;  %v4195_v2 = vld [vmem:[%s5295_s2] sm:$0xff] }
   0x2   :  { %67 = vmatpush.msra.mxu0 %v45_v0  ;;  %v4200_v3 = vld [vmem:[%s5293_s0] sm:$0xff]  ;;  %v43_v4 = vld [vmem:[%s5297_s4 + $0x8] sm:$0xff]  ;;  %v81_v5 = vld [vmem:[%s5297_s4 + $0x38] sm:$0xff] }
   0x3   :  { %v42_v6 = vld [vmem:[%s5297_s4] sm:$0xff]  ;;  %102 = vmatpush.msra.mxu1 %v81_v5  ;;  %v80_v7 = vld [vmem:[%s5297_s4 + $0x30] sm:$0xff]  ;;  %v40_v8 = vadd.f32 %v4200_v3, %v4195_v2  ;;  %v79_v9 = vld [vmem:[%s5297_s4 + $0x28] sm:$0xff] }
   0x4   :  { %68 = vmatpush.msra.mxu0 %v44_v1  ;;  %v78_v10 = vld [vmem:[%s5297_s4 + $0x20] sm:$0xff]  ;;  %v4225_v11 = vld [vmem:[%s5295_s2 + $0x8] sm:$0xff] }
   0x5   :  { %103 = vmatpush.msra.mxu1 %v80_v7  ;;  %v4230_v12 = vld [vmem:[%s5293_s0 + $0x8] sm:$0xff] }
   0x6   :  { %69 = vmatpush.msra.mxu0 %v43_v4  ;;  %v41_v13 = vadd.f32 %v4230_v12, %v4225_v11 }
   0x7   :  { %104 = vmatpush.msra.mxu1 %v79_v9 }
   0x8   :  { %70 = vmatpush.msra.mxu0 %v42_v6 }
   0x9   :  { %3657 = vmatmul.msk.f32.vlgmr.msra.gmra.mxu0 %vm48_vm0, %v40_v8  ;;  %105 = vmatpush.msra.mxu1 %v78_v10 }
   0xa   :  { %3659 = vmatmul.msk.f32.vlgmr.msra.gmra.mxu1 %vm48_vm0, %v4200_v3 }
   0xb   :  { %11 = vsyncpa [#allocation3], 0  ;;  %v3918_v14 = vld [vmem:[%s5298_s5] ss:$0 sm:$0xff]  ;;  %v3919_v15 = vld [vmem:[%s5298_s5 + $0x1] ss:$0 sm:$0xff] }
   0xc   :  { %s4140_s24 = smov 88   ;;  %s4141_s25 = smov 96   ;;  %vm118_vm1 = vcmask 64512   ;;  %v240_v53 = vld [vmem:[%s5297_s4 + $0x40] sm:$0xff]  ;;  %vm1012_vm6 = vcmask 130048  }
   0xd   :  { %s4142_s26 = smov 120   ;;  %s4143_s27 = smov 112  }
   0xe   :  { %s4144_s30 = smov 80   ;;  %s4145_s7 = smov 104  }
   0xf   :  { %s4146_s8 = smov 72   ;;  %s4148_s22 = smov [#allocation2]  }
  0x10   :  { %s3643_s0 = sshll.u32 %s4148_s22, 4  ;;  %s3644_s0 = int_to_ptr.vmem [resolvable:$true] %s3643_s0 }
  0x11   :  { %3658 = vmatmul.msk.f32.gmra.mxu0 %vm48_vm0, %v41_v13 }
  0x12   :  { %3660 = vmatmul.msk.f32.gmra.mxu1 %vm48_vm0, %v4230_v12 }
  0x86   :  { %v72_v16 = vpop.f32.mrf.mxu0 }
  0x87   :  { %v4246_v17 = vadd.f32 %v3918_v14, %v72_v16  ;;  %v107_v18 = vpop.f32.mrf.mxu1 }
  0x88   :  { %v4252_v19 = vadd.f32 %v3919_v15, %v107_v18 }
  0x89   :  { %243 = vrot.lane.b32.xlu2 %v4246_v17, %s4140_s24  ;;  %116 = vrot.lane.b32.xlu0 %v4246_v17, %s4141_s25  ;;  %v4258_v22 = vmul.f32 0.35355338, %v4246_v17 }
  0x8a   :  { %212 = vmatpush.msra.mxu2 %v4252_v19 }
  0x8e   :  { %v75_v20 = vpop.f32.mrf.mxu0 }
  0x8f   :  { %v4255_v21 = vadd.f32 %v3918_v14, %v75_v20  ;;  %v110_v26 = vpop.f32.mrf.mxu1 }
  0x90   :  { %v4270_v27 = vadd.f32 %v3919_v15, %v110_v26  ;;  %v373_v26 = vld [vmem:[%s5297_s4 + $0x48] sm:$0xff] }
  0x91   :  { %145 = vrot.lane.b32.xlu0 %v4255_v21, %s4141_s25  ;;  %241 = vrot.lane.b32.xlu2 %v4258_v22, %s4142_s26  ;;  %v4273_v29 = vmul.f32 0.35355338, %v4255_v21 }
  0x99   :  { %271 = vrot.lane.b32.xlu2 %v4255_v21, %s4140_s24 }
  0xe3   :  { %v244_v23 = vpop.permute.xlu2 %243 }
  0xe4   :  { %3667 = vmatpush.xpose.msk.msrb.mxu2 %vm118_vm1, %v244_v23 }
  0xeb   :  { %v242_v25 = vpop.permute.xlu2 %241 }
  0xf3   :  { %v272_v30 = vpop.permute.xlu2 %271 }
  0xfb   :  { %v117_v24 = vpop.permute.xlu0 %116 }
  0xfc   :  { %3661 = vmatpush.xpose.msk.msra.mxu3 %vm118_vm1, %v117_v24 }
  0xff   :  { %3662 = vmatmul.msk.f32.vlgmr.msra.gmra.mxu3 %vm118_vm1, %v4258_v22 }
 0x103   :  { %v146_v28 = vpop.permute.xlu0 %145 }
 0x104   :  { %3663 = vmatpush.xpose.msk.msrb.mxu3 %vm118_vm1, %v146_v28 }
 0x107   :  { %3664 = vmatmul.msk.f32.vlgmr.msrb.gmra.mxu3 %vm118_vm1, %v4273_v29 }
 0x108   :  { %235 = vmatpush.msra.mxu3 %v4270_v27 }
 0x10a   :  { %3669 = vmatpush.xpose.msk.msrb.mxu3 %vm118_vm1, %v272_v30 }
 0x182   :  { %v141_v31 = vpop.f32.mrf.mxu3 }
 0x183   :  { %v172_v32 = vsel %vm118_vm1, %v141_v31, -inf }
 0x184   :  { %173 = vmax.xlane.f32.xlu1 %v172_v32 }
 0x18a   :  { %v169_v33 = vpop.f32.mrf.mxu3 }
 0x18b   :  { %v175_v34 = vsel %vm118_vm1, %v169_v33, -inf }
 0x18c   :  { %176 = vmax.xlane.f32.xlu0 %v175_v34 }
 0x1a0   :  { %320 = vrot.lane.b32.xlu0 %v4252_v19, %s4142_s26 }
 0x1a8   :  { %432 = vrot.lane.b32.xlu0 %v4258_v22, %s4143_s27 }
 0x1f7   :  { %v174_v35 = vpop.xlane.xlu1 %173 }
 0x1f8   :  { %v178_v36 = vsub.f32 %v141_v31, %v174_v35 }
 0x1fa   :  { %v180_v37 = vmul.f32 1.442695, %v178_v36 }
 0x1fc   :  { %3950 = vpow2.f32 %v180_v37 }
 0x1ff   :  { %v177_v38 = vpop.xlane.xlu0 %176 }
 0x200   :  { %v179_v39 = vsub.f32 %v169_v33, %v177_v38 }
 0x202   :  { %v3951_v40 = vpop.eup %3950  ;;  %v182_v41 = vmul.f32 1.442695, %v179_v39 }
 0x203   :  { %v184_v42 = vsel %vm118_vm1, %v3951_v40, 0.0 }
 0x204   :  { %3952 = vpow2.f32 %v182_v41  ;;  %185 = vadd.xlane.f32.xlu1 %v184_v42 }
 0x20a   :  { %v3953_v43 = vpop.eup %3952 }
 0x20b   :  { %v187_v44 = vsel %vm118_vm1, %v3953_v43, 0.0 }
 0x20c   :  { %188 = vadd.xlane.f32.xlu1 %v187_v44 }
 0x212   :  { %v321_v45 = vpop.permute.xlu0 %320 }
 0x213   :  { %341 = vmatpush.msrb.mxu0 %v321_v45 }
 0x21a   :  { %v433_v63 = vpop.permute.xlu0 %432 }
 0x225   :  { %269 = vrot.lane.b32.xlu1 %v4273_v29, %s4142_s26 }
 0x277   :  { %v186_v46 = vpop.xlane.xlu1 %185 }
 0x278   :  { %3954 = vrcp.f32 %v186_v46 }
 0x27e   :  { %v3955_v47 = vpop.eup %3954 }
 0x27f   :  { %v189_v48 = vpop.xlane.xlu1 %188  ;;  %v192_v49 = vmul.f32 %v3955_v47, %v3951_v40 }
 0x280   :  { %3956 = vrcp.f32 %v189_v48 }
 0x281   :  { %3665 = vmatmul.msk.f32.vlgmr.msra.gmra.mxu2 %vm118_vm1, %v192_v49 }
 0x282   :  { %395 = vmatpush.msra.mxu2 %v373_v26 }
 0x286   :  { %v3957_v50 = vpop.eup %3956 }
 0x287   :  { %v193_v51 = vmul.f32 %v3957_v50, %v3953_v43 }
 0x289   :  { %3666 = vmatmul.msk.f32.vlgmr.msra.gmra.mxu3 %vm118_vm1, %v193_v51  ;;  %3668 = vmatmul.msk.f32.vlgmr.msrb.gmra.mxu2 %vm118_vm1, %v242_v25 }
 0x28a   :  { %424 = vmatpush.msra.mxu3 %v240_v53 }
 0x297   :  { %v270_v52 = vpop.permute.xlu1 %269 }
 0x298   :  { %3670 = vmatmul.msk.f32.vlgmr.msrb.gmra.mxu3 %vm118_vm1, %v270_v52 }
 0x304   :  { %v214_v54 = vpop.f32.mrf.mxu2 }
 0x305   :  { %3675 = vmatmul.msk.f32.vlgmr.msra.gmra.mxu3 %vm118_vm1, %v214_v54 }
 0x30c   :  { %v237_v55 = vpop.f32.mrf.mxu3  ;;  %v266_v56 = vpop.f32.mrf.mxu2 }
 0x30d   :  { %3676 = vmatmul.msk.f32.gmra.mxu3 %vm118_vm1, %v237_v55  ;;  %v297_v57 = vsel %vm118_vm1, %v266_v56, -inf }
 0x30e   :  { %298 = vmax.xlane.f32.xlu2 %v297_v57 }
 0x31b   :  { %v294_v58 = vpop.f32.mrf.mxu3 }
 0x31c   :  { %v300_v59 = vsel %vm118_vm1, %v294_v58, -inf }
 0x31d   :  { %301 = vmax.xlane.f32.xlu0 %v300_v59 }
 0x326   :  { %434 = vrot.lane.b32.xlu2 %v4246_v17, %s4144_s30 }
 0x331   :  { %460 = vrot.lane.b32.xlu0 %v4273_v29, %s4143_s27 }
 0x381   :  { %v299_v60 = vpop.xlane.xlu2 %298 }
 0x382   :  { %v303_v61 = vsub.f32 %v266_v56, %v299_v60 }
 0x384   :  { %v305_v62 = vmul.f32 1.442695, %v303_v61 }
 0x386   :  { %3958 = vpow2.f32 %v305_v62 }
 0x388   :  { %v4336_v32 = vpop.f32.mrf.mxu3 }
 0x389   :  { %v435_v0 = vpop.permute.xlu2 %434 }
 0x38a   :  { %3677 = vmatpush.xpose.msk.msra.mxu0 %vm118_vm1, %v435_v0  ;;  %v562_v0 = vld [vmem:[%s5297_s4 + $0x50] sm:$0xff] }
 0x38b   :  { %584 = vmatpush.msrb.mxu2 %v562_v0 }
 0x38c   :  { %v3959_v1 = vpop.eup %3958 }
 0x38d   :  { %v309_v4 = vsel %vm118_vm1, %v3959_v1, 0.0 }
 0x38e   :  { %310 = vadd.xlane.f32.xlu1 %v309_v4 }
 0x390   :  { %v302_v5 = vpop.xlane.xlu0 %301  ;;  %v4339_v35 = vpop.f32.mrf.mxu3 }
 0x391   :  { %v304_v6 = vsub.f32 %v294_v58, %v302_v5 }
 0x393   :  { %v307_v7 = vmul.f32 1.442695, %v304_v6  ;;  %v724_v6 = vld [vmem:[%s5297_s4 + $0x58] sm:$0xff] }
 0x395   :  { %3960 = vpow2.f32 %v307_v7 }
 0x39b   :  { %v3961_v8 = vpop.eup %3960 }
 0x39c   :  { %v312_v9 = vsel %vm118_vm1, %v3961_v8, 0.0 }
 0x39d   :  { %313 = vadd.xlane.f32.xlu2 %v312_v9 }
 0x3a3   :  { %v461_v23 = vpop.permute.xlu0 %460 }
 0x3a7   :  { %347 = vrot.lane.b32.xlu1 %v4270_v27, %s4142_s26 }
 0x3af   :  { %462 = vrot.lane.b32.xlu1 %v4255_v21, %s4144_s30 }
 0x3b5   :  { %594 = vrot.lane.b32.xlu2 %v4258_v22, %s4145_s7 }
 0x3b7   :  { %596 = vrot.lane.b32.xlu1 %v4246_v17, %s4146_s8 }
 0x3bd   :  { %510 = vrot.lane.b32.xlu2 %v4252_v19, %s4143_s27 }
 0x3c5   :  { %624 = vrot.lane.b32.xlu2 %v4255_v21, %s4146_s8 }
 0x3cd   :  { %622 = vrot.lane.b32.xlu2 %v4273_v29, %s4145_s7 }
 0x401   :  { %v311_v10 = vpop.xlane.xlu1 %310 }
 0x402   :  { %3962 = vrcp.f32 %v311_v10 }
 0x408   :  { %v3963_v13 = vpop.eup %3962 }
 0x409   :  { %v317_v14 = vmul.f32 %v3963_v13, %v3959_v1 }
 0x40b   :  { %3671 = vmatmul.msk.f32.vlgmr.msrb.gmra.mxu0 %vm118_vm1, %v317_v14 }
 0x410   :  { %v314_v15 = vpop.xlane.xlu2 %313 }
 0x411   :  { %3964 = vrcp.f32 %v314_v15 }
 0x413   :  { %3678 = vmatmul.msk.f32.vlgmr.msra.gmra.mxu0 %vm118_vm1, %v433_v63 }
 0x417   :  { %v3965_v16 = vpop.eup %3964 }
 0x418   :  { %v595_v17 = vpop.permute.xlu2 %594  ;;  %v318_v18 = vmul.f32 %v3965_v16, %v3961_v8 }
 0x419   :  { %v348_v20 = vpop.permute.xlu1 %347 }
 0x41a   :  { %368 = vmatpush.msrb.mxu1 %v348_v20 }
 0x41b   :  { %3672 = vmatmul.msk.f32.vlgmr.msrb.gmra.mxu1 %vm118_vm1, %v318_v18 }
 0x420   :  { %v511_v21 = vpop.permute.xlu2 %510 }
 0x421   :  { %v463_v22 = vpop.permute.xlu1 %462  ;;  %531 = vmatpush.msrb.mxu0 %v511_v21 }
 0x422   :  { %3679 = vmatpush.xpose.msk.msra.mxu1 %vm118_vm1, %v463_v22  ;;  %v4372_v22 = vld [vmem:[%s5298_s5 + $0x2] ss:$0 sm:$0xff] }
 0x425   :  { %3680 = vmatmul.msk.f32.vlgmr.msra.gmra.mxu1 %vm118_vm1, %v461_v23 }
 0x428   :  { %v625_v24 = vpop.permute.xlu2 %624 }
 0x429   :  { %v597_v25 = vpop.permute.xlu1 %596  ;;  %3687 = vmatpush.xpose.msk.msra.mxu0 %vm118_vm1, %v625_v24 }
 0x42a   :  { %3685 = vmatpush.xpose.msk.msrb.mxu3 %vm118_vm1, %v597_v25 }
 0x42d   :  { %3686 = vmatmul.msk.f32.vlgmr.msrb.gmra.mxu3 %vm118_vm1, %v595_v17 }
 0x430   :  { %v623_v46 = vpop.permute.xlu2 %622 }
 0x488   :  { %v343_v28 = vpop.f32.mrf.mxu0 }
 0x489   :  { %3673 = vmatmul.msk.f32.vlgmr.msra.gmra.mxu2 %vm118_vm1, %v343_v28 }
 0x490   :  { %v457_v29 = vpop.f32.mrf.mxu0 }
 0x491   :  { %v488_v30 = vsel %vm118_vm1, %v457_v29, -inf }
 0x492   :  { %489 = vmax.xlane.f32.xlu1 %v488_v30 }
 0x498   :  { %v370_v31 = vpop.f32.mrf.mxu1 }
 0x499   :  { %3674 = vmatmul.msk.f32.gmra.mxu2 %vm118_vm1, %v370_v31 }
 0x4a2   :  { %v485_v33 = vpop.f32.mrf.mxu1 }
 0x4a3   :  { %v491_v34 = vsel %vm118_vm1, %v485_v33, -inf }
 0x4a4   :  { %492 = vmax.xlane.f32.xlu1 %v491_v34 }
 0x4b0   :  { %v619_v36 = vpop.f32.mrf.mxu3 }
 0x4b1   :  { %v650_v37 = vsel %vm118_vm1, %v619_v36, -inf }
 0x4b2   :  { %651 = vmax.xlane.f32.xlu2 %v650_v37 }
 0x4ca   :  { %698 = vrot.lane.b32.xlu2 %v4270_v27, %s4145_s7 }
 0x505   :  { %v490_v38 = vpop.xlane.xlu1 %489 }
 0x506   :  { %v494_v39 = vsub.f32 %v457_v29, %v490_v38 }
 0x508   :  { %v496_v40 = vmul.f32 1.442695, %v494_v39 }
 0x50a   :  { %3966 = vpow2.f32 %v496_v40 }
 0x50c   :  { %v397_v16 = vpop.f32.mrf.mxu2 }
 0x50d   :  { %v427_v20 = vadd.f32 %v4336_v32, %v397_v16  ;;  %v4147_v32 = vmov 32.0  }
 0x510   :  { %v3967_v41 = vpop.eup %3966 }
 0x511   :  { %v500_v42 = vsel %vm118_vm1, %v3967_v41, 0.0 }
 0x512   :  { %501 = vadd.xlane.f32.xlu0 %v500_v42 }
 0x517   :  { %v493_v43 = vpop.xlane.xlu1 %492 }
 0x518   :  { %v495_v44 = vsub.f32 %v485_v33, %v493_v43 }
 0x51a   :  { %v498_v45 = vmul.f32 1.442695, %v495_v44  ;;  %v861_v44 = vld [vmem:[%s5297_s4 + $0x98] sm:$0xff] }
 0x51b   :  { %888 = vmatpush.msra.mxu2 %v861_v44  ;;  %v29_v44 = vld [vmem:[%s5294_s1 + $0x18] sm:$0xff] }
 0x51c   :  { %3968 = vpow2.f32 %v498_v45  ;;  %v4366_v17 = vpop.f32.mrf.mxu2  ;;  %v860_v45 = vld [vmem:[%s5297_s4 + $0x90] sm:$0xff] }
 0x51d   :  { %889 = vmatpush.msra.mxu2 %v860_v45  ;;  %v33_v45 = vld [vmem:[%s5296_s3 + $0x18] sm:$0xff] }
 0x522   :  { %v3969_v47 = vpop.eup %3968 }
 0x523   :  { %v503_v48 = vsel %vm118_vm1, %v3969_v47, 0.0 }
 0x524   :  { %504 = vadd.xlane.f32.xlu1 %v503_v48  ;;  %v30_v48 = vld [vmem:[%s5296_s3] sm:$0xff] }
 0x525   :  { %v652_v49 = vpop.xlane.xlu2 %651 }
 0x526   :  { %v656_v50 = vsub.f32 %v619_v36, %v652_v49  ;;  %v858_v49 = vld [vmem:[%s5297_s4 + $0x80] sm:$0xff] }
 0x528   :  { %v658_v51 = vmul.f32 1.442695, %v656_v50 }
 0x52a   :  { %3970 = vpow2.f32 %v658_v51 }
 0x52d   :  { %v699_v52 = vpop.permute.xlu2 %698 }
 0x52e   :  { %719 = vmatpush.msra.mxu3 %v699_v52  ;;  %v4411_v52 = vld [vmem:[%s5294_s1 + $0x8] sm:$0xff] }
 0x530   :  { %v3971_v53 = vpop.eup %3970 }
 0x531   :  { %v662_v54 = vsel %vm118_vm1, %v3971_v53, 0.0 }
 0x532   :  { %663 = vadd.xlane.f32.xlu0 %v662_v54 }
 0x53d   :  { %536 = vrot.lane.b32.xlu1 %v4270_v27, %s4143_s27 }
 0x546   :  { %672 = vrot.lane.b32.xlu0 %v4252_v19, %s4145_s7 }
 0x585   :  { %v502_v55 = vpop.xlane.xlu0 %501 }
 0x586   :  { %3972 = vrcp.f32 %v502_v55  ;;  %v826_v55 = vld [vmem:[%s5297_s4 + $0x78] sm:$0xff] }
 0x58c   :  { %v3973_v56 = vpop.eup %3972 }
 0x58d   :  { %v508_v57 = vmul.f32 %v3973_v56, %v3967_v41  ;;  %v825_v56 = vld [vmem:[%s5297_s4 + $0x70] sm:$0xff] }
 0x58f   :  { %3681 = vmatmul.msk.f32.vlgmr.msrb.gmra.mxu0 %vm118_vm1, %v508_v57  ;;  %v824_v57 = vld [vmem:[%s5297_s4 + $0x68] sm:$0xff] }
 0x590   :  { %746 = vmatpush.msrb.mxu0 %v724_v6 }
 0x597   :  { %3688 = vmatmul.msk.f32.vlgmr.msra.gmra.mxu0 %vm118_vm1, %v623_v46  ;;  %v505_v58 = vpop.xlane.xlu1 %504  ;;  %v859_v46 = vld [vmem:[%s5297_s4 + $0x88] sm:$0xff] }
 0x598   :  { %3974 = vrcp.f32 %v505_v58  ;;  %890 = vmatpush.msra.mxu2 %v859_v46  ;;  %v823_v58 = vld [vmem:[%s5297_s4 + $0x60] sm:$0xff]  ;;  %v4521_v46 = vadd.f32 %v33_v45, %v29_v44 }
 0x59a   :  { %891 = vmatpush.msra.mxu2 %v858_v49 }
 0x59e   :  { %v3975_v59 = vpop.eup %3974 }
 0x59f   :  { %v509_v61 = vmul.f32 %v3975_v59, %v3969_v47  ;;  %v4394_v47 = vld [vmem:[%s5294_s1] sm:$0xff] }
 0x5a0   :  { %v4403_v50 = vadd.f32 %v30_v48, %v4394_v47 }
 0x5a5   :  { %v664_v60 = vpop.xlane.xlu0 %663 }
 0x5a6   :  { %3976 = vrcp.f32 %v664_v60 }
 0x5ac   :  { %v3977_v27 = vpop.eup %3976 }
 0x5ad   :  { %v670_v19 = vmul.f32 %v3977_v27, %v3971_v53  ;;  %v31_v53 = vld [vmem:[%s5296_s3 + $0x8] sm:$0xff] }
 0x5ae   :  { %v4417_v54 = vadd.f32 %v31_v53, %v4411_v52 }
 0x5af   :  { %v537_v62 = vpop.permute.xlu1 %536 }
 0x5b0   :  { %557 = vmatpush.msrb.mxu1 %v537_v62 }
 0x5b1   :  { %3682 = vmatmul.msk.f32.vlgmr.msrb.gmra.mxu1 %vm118_vm1, %v509_v61 }
 0x5b8   :  { %v673_v63 = vpop.permute.xlu0 %672 }
 0x5b9   :  { %693 = vmatpush.msra.mxu1 %v673_v63 }
 0x5ba   :  { %3689 = vmatmul.msk.f32.vlgmr.msra.gmra.mxu1 %vm118_vm1, %v670_v19 }
 0x5bb   :  { %847 = vmatpush.msrb.mxu1 %v826_v55 }
 0x5bd   :  { %848 = vmatpush.msrb.mxu1 %v825_v56 }
 0x5bf   :  { %849 = vmatpush.msrb.mxu1 %v824_v57 }
 0x5c1   :  { %850 = vmatpush.msrb.mxu1 %v823_v58 }
 0x60c   :  { %v533_v1 = vpop.f32.mrf.mxu0 }
 0x60d   :  { %3683 = vmatmul.msk.f32.vlgmr.msrb.gmra.mxu2 %vm118_vm1, %v533_v1 }
 0x614   :  { %v647_v4 = vpop.f32.mrf.mxu0 }
 0x615   :  { %v653_v5 = vsel %vm118_vm1, %v647_v4, -inf }
 0x616   :  { %654 = vmax.xlane.f32.xlu1 %v653_v5 }
 0x62e   :  { %v559_v7 = vpop.f32.mrf.mxu1 }
 0x62f   :  { %3684 = vmatmul.msk.f32.gmra.mxu2 %vm118_vm1, %v559_v7  ;;  %v4442_v7 = vld [vmem:[%s5298_s5 + $0xa] ss:$0 sm:$0xff] }
 0x637   :  { %v695_v8 = vpop.f32.mrf.mxu1  ;;  %3695 = vmatmul.msk.f32.vlgmr.msra.gmra.mxu2 %vm48_vm0, %v4403_v50 }
 0x638   :  { %3691 = vmatmul.msk.f32.vlgmr.msrb.gmra.mxu0 %vm118_vm1, %v695_v8 }
 0x63f   :  { %3696 = vmatmul.msk.f32.gmra.mxu2 %vm48_vm0, %v4417_v54 }
 0x689   :  { %v655_v9 = vpop.xlane.xlu1 %654 }
 0x68a   :  { %v657_v10 = vsub.f32 %v647_v4, %v655_v9  ;;  %v4437_v4 = vld [vmem:[%s5298_s5 + $0x9] ss:$0 sm:$0xff] }
 0x68c   :  { %v660_v13 = vmul.f32 1.442695, %v657_v10 }
 0x68e   :  { %3978 = vpow2.f32 %v660_v13 }
 0x690   :  { %v586_v18 = vpop.f32.mrf.mxu2 }
 0x691   :  { %v592_v21 = vadd.f32 %v586_v18, %v427_v20 }
 0x694   :  { %v3979_v14 = vpop.eup %3978 }
 0x695   :  { %v665_v15 = vsel %vm118_vm1, %v3979_v14, 0.0 }
 0x696   :  { %666 = vadd.xlane.f32.xlu0 %v665_v15 }
 0x6b2   :  { %v589_v13 = vpop.f32.mrf.mxu2 }
 0x6b5   :  { %v748_v23 = vpop.f32.mrf.mxu0 }
 0x6b6   :  { %v754_v24 = vadd.f32 %v748_v23, %v592_v21 }
 0x6b8   :  { %v758_v25 = vadd.f32 %v4372_v22, %v754_v24 }
 0x6ba   :  { %v760_v26 = vadd.f32 %v758_v25, %v4200_v3  ;;  %v893_v23 = vpop.f32.mrf.mxu2 }
 0x6bc   :  { %v762_v28 = vsel %vm48_vm0, %v760_v26, 0.0 }
 0x6bd   :  { %763 = vadd.xlane.f32.xlu2 %v762_v28 }
 0x6c2   :  { %v896_v25 = vpop.f32.mrf.mxu2 }
 0x709   :  { %v667_v29 = vpop.xlane.xlu0 %666 }
 0x70a   :  { %3980 = vrcp.f32 %v667_v29  ;;  %v908_v29 = vld [vmem:[%s5297_s4 + $0xb8] sm:$0xff] }
 0x70b   :  { %3982 = vrcp.f32 %v4147_v32  ;;  %935 = vmatpush.msrb.mxu3 %v908_v29  ;;  %v905_v32 = vld [vmem:[%s5297_s4 + $0xa0] sm:$0xff] }
 0x710   :  { %v3981_v30 = vpop.eup %3980 }
 0x711   :  { %v671_v31 = vmul.f32 %v3981_v30, %v3979_v14  ;;  %v3983_v33 = vpop.eup %3982  ;;  %v430_v14 = vadd.f32 %v4339_v35, %v4366_v17  ;;  %v907_v30 = vld [vmem:[%s5297_s4 + $0xb0] sm:$0xff] }
 0x712   :  { %v769_v34 = vmul.f32 32.0, %v3983_v33  ;;  %vm773_vm2 = vweird.f32 %v3983_v33  ;;  %936 = vmatpush.msrb.mxu3 %v907_v30 }
 0x713   :  { %3690 = vmatmul.msk.f32.vlgmr.msra.gmra.mxu3 %vm118_vm1, %v671_v31  ;;  %v593_v15 = vadd.f32 %v589_v13, %v430_v14  ;;  %v906_v31 = vld [vmem:[%s5297_s4 + $0xa8] sm:$0xff] }
 0x714   :  { %v770_v36 = vsub.f32 1.0, %v769_v34  ;;  %937 = vmatpush.msrb.mxu3 %v906_v31 }
 0x716   :  { %v771_v37 = vmul.f32 %v3983_v33, %v770_v36  ;;  %938 = vmatpush.msrb.mxu3 %v905_v32 }
 0x718   :  { %v772_v38 = vadd.f32 %v3983_v33, %v771_v37 }
 0x71a   :  { %v4378_v39 = vsel %vm773_vm2, %v3983_v33, %v772_v38  ;;  %vm1746_vm2 = vcmask 523264  }
 0x71b   :  { %3699 = vmatmul.msk.f32.vlgmr.msrb.gmra.mxu3 %vm48_vm0, %v4394_v47 }
 0x723   :  { %3700 = vmatmul.msk.f32.gmra.mxu3 %vm48_vm0, %v4411_v52 }
 0x730   :  { %v764_v3 = vpop.xlane.xlu2 %763 }
 0x731   :  { %v775_v40 = vmul.f32 %v4378_v39, %v764_v3  ;;  %v28_v3 = vld [vmem:[%s5294_s1 + $0x10] sm:$0xff] }
 0x732   :  { %3701 = vmatmul.msk.f32.gmra.mxu3 %vm48_vm0, %v28_v3 }
 0x733   :  { %v777_v41 = vsub.f32 %v760_v26, %v775_v40  ;;  %v32_v40 = vld [vmem:[%s5296_s3 + $0x10] sm:$0xff] }
 0x735   :  { %v779_v42 = vmul.f32 %v777_v41, %v777_v41 }
 0x737   :  { %v781_v43 = vsel %vm48_vm0, %v779_v42, 0.0 }
 0x738   :  { %782 = vadd.xlane.f32.xlu1 %v781_v43 }
 0x73a   :  { %3702 = vmatmul.msk.f32.gmra.mxu3 %vm48_vm0, %v29_v44 }
 0x796   :  { %v721_v51 = vpop.f32.mrf.mxu3 }
 0x797   :  { %3692 = vmatmul.msk.f32.gmra.mxu0 %vm118_vm1, %v721_v51 }
 0x7ab   :  { %v783_v59 = vpop.xlane.xlu1 %782 }
 0x7ac   :  { %v787_v60 = vmul.f32 %v783_v59, %v4378_v39 }
 0x7ae   :  { %v789_v61 = vadd.f32 1e-05, %v787_v60 }
 0x7b0   :  { %3984 = vrsqrt.f32 %v789_v61  ;;  %vm797_vm4 = vweird.f32 %v789_v61 }
 0x7b6   :  { %v3985_v62 = vpop.eup %3984 }
 0x7b7   :  { %v792_v27 = vmul.f32 %v3985_v62, %v789_v61  ;;  %vm798_vm3 = vweird.f32 %v3985_v62  ;;  %v940_v61 = vpop.f32.mrf.mxu3 }
 0x7b8   :  { %vm799_vm5 = vmor %vm797_vm4, %vm798_vm3 }
 0x7b9   :  { %v793_v19 = vmul.f32 %v3985_v62, %v792_v27 }
 0x7bb   :  { %v794_v63 = vmul.f32 0.5, %v793_v19  ;;  %v3925_v19 = vld [vmem:[%s5298_s5 + $0x5] ss:$0 sm:$0xff] }
 0x7bd   :  { %v795_v0 = vsub.f32 1.5, %v794_v63 }
 0x7bf   :  { %v796_v1 = vmul.f32 %v3985_v62, %v795_v0  ;;  %v943_v63 = vpop.f32.mrf.mxu3  ;;  %v941_v0 = vadd.f32 %v3925_v19, %v940_v61 }
 0x7c1   :  { %v800_v5 = vsel %vm799_vm5, %v3985_v62, %v796_v1  ;;  %v944_v1 = vadd.f32 %v3925_v19, %v943_v63 }
 0x7c2   :  { %v811_v6 = vmul.f32 %v800_v5, %v777_v41  ;;  %v4507_v41 = vadd.f32 %v32_v40, %v28_v3 }
 0x7c4   :  { %v815_v8 = vmul.f32 %v4437_v4, %v811_v6  ;;  %3697 = vmatmul.msk.f32.gmra.mxu2 %vm48_vm0, %v4507_v41 }
 0x7c6   :  { %v4446_v9 = vadd.f32 %v4442_v7, %v815_v8 }
 0x7c8   :  { %v821_v10 = vadd.f32 %v4446_v9, %v4195_v2  ;;  %v4459_v2 = vld [vmem:[%s5298_s5 + $0x4] ss:$0 sm:$0xff] }
 0x7c9   :  { %v4462_v26 = vadd.f32 %v4459_v2, %v896_v25  ;;  %v4465_v35 = vadd.f32 %v4459_v2, %v893_v23 }
 0x7ca   :  { %3693 = vmatmul.msk.f32.vlgmr.msrb.gmra.mxu1 %vm48_vm0, %v821_v10 }
 0x7cb   :  { %3703 = vmatpush.xpose.msk.msra.mxu0 %vm118_vm1, %v4462_v26 }
 0x7cc   :  { %3698 = vmatmul.msk.f32.gmra.mxu2 %vm48_vm0, %v4521_v46 }
 0x7cf   :  { %3704 = vmatpush.xpose.msk.msra.mxu0 %vm118_vm1, %v4465_v35 }
 0x7d3   :  { %1052 = vmatpush.msrb.mxu0 %v944_v1 }
 0x7d5   :  { %1053 = vmatpush.msrb.mxu0 %v941_v0 }
 0x814   :  { %v751_v16 = vpop.f32.mrf.mxu0 }
 0x815   :  { %v755_v18 = vadd.f32 %v751_v16, %v593_v15 }
 0x817   :  { %v759_v20 = vadd.f32 %v4372_v22, %v755_v18 }
 0x819   :  { %v761_v21 = vadd.f32 %v759_v20, %v4230_v12  ;;  %v4474_v12 = vld [vmem:[%s5298_s5 + $0x3] ss:$0 sm:$0xff] }
 0x81b   :  { %v765_v24 = vsel %vm48_vm0, %v761_v21, 0.0 }
 0x81c   :  { %766 = vadd.xlane.f32.xlu0 %v765_v24 }
 0x847   :  { %v852_v17 = vpop.f32.mrf.mxu1  ;;  %v899_v10 = vpop.f32.mrf.mxu2 }
 0x848   :  { %v853_v22 = vadd.f32 %v4474_v12, %v852_v17  ;;  %v4545_v15 = vadd.f32 %v4459_v2, %v899_v10 }
 0x84a   :  { %v4477_v28 = vmul.f32 0.35355338, %v853_v22 }
 0x84c   :  { %1082 = vrot.lane.b32.xlu2 %v4477_v28, %s4142_s26  ;;  %3705 = vmatmul.msk.f32.vlgmr.msra.gmra.mxu0 %vm118_vm1, %v4477_v28 }
 0x84f   :  { %v902_v13 = vpop.f32.mrf.mxu2 }
 0x850   :  { %v4542_v14 = vadd.f32 %v4459_v2, %v902_v13 }
 0x852   :  { %3706 = vmatpush.xpose.msk.msra.mxu1 %vm118_vm1, %v4542_v14 }
 0x854   :  { %1118 = vrot.lane.b32.xlu2 %v4542_v14, %s4142_s26 }
 0x856   :  { %3707 = vmatpush.xpose.msk.msra.mxu1 %vm118_vm1, %v4545_v15 }
 0x85c   :  { %1116 = vrot.lane.b32.xlu2 %v4545_v15, %s4142_s26 }
 0x88f   :  { %v767_v33 = vpop.xlane.xlu0 %766 }
 0x890   :  { %v776_v34 = vmul.f32 %v4378_v39, %v767_v33 }
 0x892   :  { %v778_v36 = vsub.f32 %v761_v21, %v776_v34  ;;  %v946_v21 = vpop.f32.mrf.mxu3  ;;  %v4564_v34 = vpack.i.bf16 %v941_v0, %v944_v1 }
 0x893   :  { %v947_v2 = vadd.f32 %v3925_v19, %v946_v21  ;;  %v1230_v21 = vld [vmem:[%s5297_s4 + $0xc8] sm:$0xff] }
 0x894   :  { %v780_v37 = vmul.f32 %v778_v36, %v778_v36 }
 0x896   :  { %v784_v38 = vsel %vm48_vm0, %v780_v37, 0.0 }
 0x897   :  { %785 = vadd.xlane.f32.xlu1 %v784_v38 }
 0x89a   :  { %v949_v24 = vpop.f32.mrf.mxu3 }
 0x89b   :  { %v950_v25 = vadd.f32 %v3925_v19, %v949_v24 }
 0x89d   :  { %1075 = vmatpush.msrb.mxu1 %v950_v25 }
 0x89f   :  { %1076 = vmatpush.msrb.mxu1 %v947_v2 }
 0x8a6   :  { %v1083_v22 = vpop.permute.xlu2 %1082 }
 0x8ae   :  { %v1119_v30 = vpop.permute.xlu2 %1118 }
 0x8b6   :  { %v1117_v31 = vpop.permute.xlu2 %1116 }
 0x8c9   :  { %v980_v42 = vpop.f32.mrf.mxu0 }
 0x8ca   :  { %v1013_v43 = vsel %vm1012_vm6, %v980_v42, -inf }
 0x8cb   :  { %1014 = vmax.xlane.f32.xlu0 %v1013_v43 }
 0x8df   :  { %1086 = vrot.lane.b32.xlu0 %v4462_v26, %s4142_s26 }
 0x90a   :  { %v786_v47 = vpop.xlane.xlu1 %785 }
 0x90b   :  { %v788_v48 = vmul.f32 %v786_v47, %v4378_v39 }
 0x90d   :  { %v790_v49 = vadd.f32 1e-05, %v788_v48 }
 0x90f   :  { %3986 = vrsqrt.f32 %v790_v49  ;;  %vm807_vm8 = vweird.f32 %v790_v49 }
 0x915   :  { %v3987_v51 = vpop.eup %3986 }
 0x916   :  { %v802_v52 = vmul.f32 %v3987_v51, %v790_v49  ;;  %vm808_vm7 = vweird.f32 %v3987_v51 }
 0x917   :  { %vm809_vm9 = vmor %vm807_vm8, %vm808_vm7 }
 0x918   :  { %v803_v53 = vmul.f32 %v3987_v51, %v802_v52 }
 0x91a   :  { %v804_v55 = vmul.f32 0.5, %v803_v53 }
 0x91c   :  { %v805_v56 = vsub.f32 1.5, %v804_v55  ;;  %v4574_v55 = vpack.i.bf16 %v947_v2, %v950_v25 }
 0x91e   :  { %v806_v57 = vmul.f32 %v3987_v51, %v805_v56 }
 0x920   :  { %v810_v58 = vsel %vm809_vm9, %v3987_v51, %v806_v57 }
 0x921   :  { %v812_v59 = vmul.f32 %v810_v58, %v778_v36 }
 0x923   :  { %v816_v60 = vmul.f32 %v4437_v4, %v812_v59 }
 0x925   :  { %v4529_v62 = vadd.f32 %v4442_v7, %v816_v60 }
 0x927   :  { %v822_v27 = vadd.f32 %v4529_v62, %v4225_v11 }
 0x929   :  { %3694 = vmatmul.msk.f32.gmra.mxu1 %vm48_vm0, %v822_v27 }
 0x93e   :  { %v1015_v5 = vpop.xlane.xlu0 %1014 }
 0x93f   :  { %v1019_v4 = vsub.f32 %v980_v42, %v1015_v5 }
 0x941   :  { %v1021_v6 = vmul.f32 1.442695, %v1019_v4 }
 0x943   :  { %3988 = vpow2.f32 %v1021_v6 }
 0x949   :  { %v3989_v7 = vpop.eup %3988 }
 0x94a   :  { %v1025_v8 = vsel %vm1012_vm6, %v3989_v7, 0.0 }
 0x94b   :  { %1026 = vadd.xlane.f32.xlu1 %v1025_v8 }
 0x951   :  { %v1087_v11 = vpop.permute.xlu0 %1086 }
 0x952   :  { %3711 = vmatpush.xpose.msk.msra.mxu0 %vm118_vm1, %v1087_v11 }
 0x964   :  { %1084 = vrot.lane.b32.xlu1 %v4465_v35, %s4142_s26 }
 0x9a6   :  { %v855_v16 = vpop.f32.mrf.mxu1 }
 0x9a7   :  { %v856_v18 = vadd.f32 %v4474_v12, %v855_v16 }
 0x9a9   :  { %v953_v20 = vmul.f32 0.35355338, %v856_v18 }
 0x9ab   :  { %1114 = vrot.lane.b32.xlu2 %v953_v20, %s4142_s26  ;;  %3708 = vmatmul.msk.f32.vlgmr.msra.gmra.mxu1 %vm118_vm1, %v953_v20 }
 0x9ac   :  { %3714 = vmatpush.xpose.msk.msra.mxu1 %vm118_vm1, %v1119_v30 }
 0x9b0   :  { %3715 = vmatpush.xpose.msk.msra.mxu1 %vm118_vm1, %v1117_v31 }
 0x9be   :  { %v1027_v23 = vpop.xlane.xlu1 %1026 }
 0x9bf   :  { %3990 = vrcp.f32 %v1027_v23 }
 0x9c5   :  { %v3991_v17 = vpop.eup %3990 }
 0x9c6   :  { %v1033_v29 = vmul.f32 %v3991_v17, %v3989_v7 }
 0x9c8   :  { %3709 = vmatmul.msk.f32.vlgmr.msrb.gmra.mxu0 %vm1012_vm6, %v1033_v29 }
 0x9d6   :  { %v1085_v12 = vpop.permute.xlu1 %1084 }
 0x9d7   :  { %3712 = vmatpush.xpose.msk.msra.mxu0 %vm118_vm1, %v1085_v12 }
 0x9da   :  { %3713 = vmatmul.msk.f32.vlgmr.msra.gmra.mxu0 %vm118_vm1, %v1083_v22 }
 0x9db   :  { %1252 = vmatpush.msrb.mxu0 %v1230_v21 }
 0xa05   :  { %v1115_v49 = vpop.permute.xlu2 %1114 }
 0xa28   :  { %v1009_v32 = vpop.f32.mrf.mxu1 }
 0xa29   :  { %v1016_v33 = vsel %vm1012_vm6, %v1009_v32, -inf }
 0xa2a   :  { %1017 = vmax.xlane.f32.xlu0 %v1016_v33 }
 0xa3e   :  { %3849 = vrot.lane.b32.xlu0 %v4564_v34, %s4142_s26 }
 0xa45   :  { %v1055_v36 = vpop.f32.mrf.mxu0 }
 0xa57   :  { %v1111_v37 = vpop.f32.mrf.mxu0 }
 0xa58   :  { %v1146_v38 = vsel %vm1012_vm6, %v1111_v37, -inf }
 0xa59   :  { %1147 = vmax.xlane.f32.xlu2 %v1146_v38 }
 0xa9d   :  { %v1018_v3 = vpop.xlane.xlu0 %1017 }
 0xa9e   :  { %v1020_v40 = vsub.f32 %v1009_v32, %v1018_v3 }
 0xaa0   :  { %v1023_v42 = vmul.f32 1.442695, %v1020_v40 }
 0xaa2   :  { %3992 = vpow2.f32 %v1023_v42 }
 0xaa8   :  { %v3993_v43 = vpop.eup %3992 }
 0xaa9   :  { %v1028_v44 = vsel %vm1012_vm6, %v3993_v43, 0.0 }
 0xaaa   :  { %1029 = vadd.xlane.f32.xlu1 %v1028_v44 }
 0xab0   :  { %v3850_v45 = vpop.permute.xlu0 %3849 }
 0xab1   :  { %v3852_v47 = vunpack.i.h.bf16 %v3850_v45  ;;  %v3851_v48 = vunpack.i.l.bf16 %v3850_v45 }
 0xab3   :  { %1193 = vmatpush.msrb.mxu2 %v3851_v48 }
 0xab5   :  { %1194 = vmatpush.msrb.mxu2 %v3852_v47 }
 0xac3   :  { %1293 = vrot.lane.b32.xlu1 %v4462_v26, %s4143_s27 }
 0xacb   :  { %1289 = vrot.lane.b32.xlu1 %v4477_v28, %s4143_s27 }
 0xacc   :  { %v1148_v51 = vpop.xlane.xlu2 %1147 }
 0xacd   :  { %v1152_v52 = vsub.f32 %v1111_v37, %v1148_v51 }
 0xacf   :  { %v1154_v53 = vmul.f32 1.442695, %v1152_v52 }
 0xad1   :  { %3994 = vpow2.f32 %v1154_v53 }
 0xad3   :  { %3854 = vrot.lane.b32.xlu1 %v4574_v55, %s4142_s26 }
 0xad7   :  { %v3995_v56 = vpop.eup %3994 }
 0xad8   :  { %v1158_v57 = vsel %vm1012_vm6, %v3995_v56, 0.0 }
 0xad9   :  { %1159 = vadd.xlane.f32.xlu0 %v1158_v57 }
 0xadb   :  { %1323 = vrot.lane.b32.xlu1 %v4545_v15, %s4143_s27 }
 0xae3   :  { %1321 = vrot.lane.b32.xlu1 %v953_v20, %s4143_s27 }
 0xaeb   :  { %1469 = vrot.lane.b32.xlu1 %v4462_v26, %s4145_s7  ;;  %v1081_v26 = vld [vmem:[%s5297_s4 + $0xc0] sm:$0xff] }
 0xaed   :  { %1291 = vrot.lane.b32.xlu0 %v4465_v35, %s4143_s27 }
 0xaf3   :  { %1465 = vrot.lane.b32.xlu1 %v4477_v28, %s4145_s7 }
 0xafb   :  { %3859 = vrot.lane.b32.xlu1 %v4564_v34, %s4143_s27 }
 0xb03   :  { %1499 = vrot.lane.b32.xlu1 %v4545_v15, %s4145_s7 }
 0xb0b   :  { %1497 = vrot.lane.b32.xlu1 %v953_v20, %s4145_s7 }
 0xb1d   :  { %v1030_v58 = vpop.xlane.xlu1 %1029 }
 0xb1e   :  { %3996 = vrcp.f32 %v1030_v58 }
 0xb24   :  { %v3997_v59 = vpop.eup %3996 }
 0xb25   :  { %v1034_v60 = vmul.f32 %v3997_v59, %v3993_v43 }
 0xb27   :  { %3710 = vmatmul.msk.f32.vlgmr.msrb.gmra.mxu1 %vm1012_vm6, %v1034_v60 }
 0xb28   :  { %1281 = vmatpush.msrb.mxu1 %v1081_v26 }
 0xb2f   :  { %3716 = vmatmul.msk.f32.vlgmr.msra.gmra.mxu1 %vm118_vm1, %v1115_v49 }
 0xb35   :  { %v1294_v28 = vpop.permute.xlu1 %1293 }
 0xb36   :  { %3723 = vmatpush.xpose.msk.msra.mxu2 %vm118_vm1, %v1294_v28 }
 0xb37   :  { %3721 = vmatmul.msk.f32.vlgmr.msrb.gmra.mxu1 %vm118_vm1, %v1055_v36 }
 0xb3d   :  { %v1290_v61 = vpop.permute.xlu1 %1289 }
 0xb45   :  { %v3855_v27 = vpop.permute.xlu1 %3854 }
 0xb46   :  { %v3857_v19 = vunpack.i.h.bf16 %v3855_v27  ;;  %v3856_v63 = vunpack.i.l.bf16 %v3855_v27 }
 0xb48   :  { %1224 = vmatpush.msra.mxu3 %v3856_v63  ;;  %v1433_v63 = vld [vmem:[%s5297_s4 + $0xd0] sm:$0xff] }
 0xb49   :  { %1455 = vmatpush.msra.mxu0 %v1433_v63 }
 0xb4a   :  { %1225 = vmatpush.msra.mxu3 %v3857_v19 }
 0xb4c   :  { %v1160_v0 = vpop.xlane.xlu0 %1159 }
 0xb4d   :  { %3998 = vrcp.f32 %v1160_v0  ;;  %v1324_v1 = vpop.permute.xlu1 %1323 }
 0xb53   :  { %v3999_v5 = vpop.eup %3998 }
 0xb54   :  { %v1166_v4 = vmul.f32 %v3999_v5, %v3995_v56 }
 0xb55   :  { %v1322_v6 = vpop.permute.xlu1 %1321 }
 0xb56   :  { %3717 = vmatmul.msk.f32.vlgmr.msrb.gmra.mxu2 %vm1012_vm6, %v1166_v4 }
 0xb5d   :  { %v1470_v7 = vpop.permute.xlu1 %1469 }
 0xb5e   :  { %3733 = vmatpush.xpose.msk.msra.mxu1 %vm118_vm1, %v1470_v7 }
 0xb5f   :  { %v1292_v8 = vpop.permute.xlu0 %1291 }
 0xb60   :  { %3724 = vmatpush.xpose.msk.msra.mxu2 %vm118_vm1, %v1292_v8 }
 0xb63   :  { %3725 = vmatmul.msk.f32.vlgmr.msra.gmra.mxu2 %vm118_vm1, %v1290_v61 }
 0xb65   :  { %v1466_v11 = vpop.permute.xlu1 %1465 }
 0xb6d   :  { %v3860_v10 = vpop.permute.xlu1 %3859 }
 0xb6e   :  { %v3861_v13 = vunpack.i.l.bf16 %v3860_v10  ;;  %v3862_v15 = vunpack.i.h.bf16 %v3860_v10 }
 0xb70   :  { %1398 = vmatpush.msrb.mxu2 %v3861_v13 }
 0xb72   :  { %1399 = vmatpush.msrb.mxu2 %v3862_v15 }
 0xb75   :  { %v1500_v53 = vpop.permute.xlu1 %1499 }
 0xb7d   :  { %v1498_v57 = vpop.permute.xlu1 %1497 }
 0xba4   :  { %v1078_v16 = vpop.f32.mrf.mxu1 }
 0xba5   :  { %3722 = vmatmul.msk.f32.gmra.mxu1 %vm118_vm1, %v1078_v16 }
 0xbac   :  { %v1143_v18 = vpop.f32.mrf.mxu1 }
 0xbad   :  { %v1149_v20 = vsel %vm1012_vm6, %v1143_v18, -inf }
 0xbae   :  { %1150 = vmax.xlane.f32.xlu2 %v1149_v20 }
 0xbb4   :  { %v4625_v3 = vpop.f32.mrf.mxu1 }
 0xbc6   :  { %1325 = vrot.lane.b32.xlu2 %v4542_v14, %s4143_s27 }
 0xbce   :  { %1467 = vrot.lane.b32.xlu2 %v4465_v35, %s4145_s7 }
 0xbd9   :  { %v1196_v23 = vpop.f32.mrf.mxu2 }
 0xbda   :  { %3719 = vmatmul.msk.f32.vlgmr.msrb.gmra.mxu0 %vm118_vm1, %v1196_v23 }
 0xbe6   :  { %v1318_v24 = vpop.f32.mrf.mxu2 }
 0xbe7   :  { %v1353_v2 = vsel %vm1012_vm6, %v1318_v24, -inf }
 0xbf7   :  { %1354 = vmax.xlane.f32.xlu2 %v1353_v2 }
 0xc0f   :  { %3864 = vrot.lane.b32.xlu2 %v4574_v55, %s4143_s27 }
 0xc21   :  { %v1151_v25 = vpop.xlane.xlu2 %1150 }
 0xc22   :  { %v1153_v17 = vsub.f32 %v1143_v18, %v1151_v25  ;;  %v4627_v44 = vpop.f32.mrf.mxu1 }
 0xc24   :  { %v1156_v22 = vmul.f32 1.442695, %v1153_v17 }
 0xc26   :  { %4000 = vpow2.f32 %v1156_v22 }
 0xc29   :  { %v1326_v29 = vpop.permute.xlu2 %1325 }
 0xc2a   :  { %3726 = vmatpush.xpose.msk.msrb.mxu3 %vm118_vm1, %v1326_v29 }
 0xc2c   :  { %v4001_v30 = vpop.eup %4000 }
 0xc2d   :  { %v1161_v35 = vsel %vm1012_vm6, %v4001_v30, 0.0 }
 0xc2e   :  { %1162 = vadd.xlane.f32.xlu0 %v1161_v35  ;;  %3727 = vmatpush.xpose.msk.msrb.mxu3 %vm118_vm1, %v1324_v1 }
 0xc31   :  { %v1468_v12 = vpop.permute.xlu2 %1467 }
 0xc32   :  { %3734 = vmatpush.xpose.msk.msra.mxu1 %vm118_vm1, %v1468_v12 }
 0xc35   :  { %3735 = vmatmul.msk.f32.vlgmr.msra.gmra.mxu1 %vm118_vm1, %v1466_v11 }
 0xc6a   :  { %v1355_v31 = vpop.xlane.xlu2 %1354 }
 0xc6b   :  { %v1359_v32 = vsub.f32 %v1318_v24, %v1355_v31 }
 0xc6d   :  { %v1361_v33 = vmul.f32 1.442695, %v1359_v32  ;;  %v1609_v32 = vld [vmem:[%s5297_s4 + $0xd8] sm:$0xff] }
 0xc6f   :  { %4002 = vpow2.f32 %v1361_v33 }
 0xc72   :  { %v3865_v40 = vpop.permute.xlu2 %3864 }
 0xc73   :  { %v3866_v45 = vunpack.i.l.bf16 %v3865_v40  ;;  %v3867_v47 = vunpack.i.h.bf16 %v3865_v40 }
 0xc75   :  { %v4003_v36 = vpop.eup %4002 }
 0xc76   :  { %v1365_v37 = vsel %vm1012_vm6, %v4003_v36, 0.0 }
 0xc77   :  { %1366 = vadd.xlane.f32.xlu0 %v1365_v37 }
 0xc8b   :  { %1501 = vrot.lane.b32.xlu0 %v4542_v14, %s4145_s7 }
 0xca1   :  { %v1163_v38 = vpop.xlane.xlu0 %1162 }
 0xca2   :  { %4004 = vrcp.f32 %v1163_v38  ;;  %v1254_v38 = vpop.f32.mrf.mxu0 }
 0xca8   :  { %v4005_v42 = vpop.eup %4004 }
 0xca9   :  { %v1167_v43 = vmul.f32 %v4005_v42, %v4001_v30 }
 0xcab   :  { %3718 = vmatmul.msk.f32.vlgmr.msra.gmra.mxu3 %vm1012_vm6, %v1167_v43  ;;  %v1284_v43 = vadd.f32 %v4625_v3, %v1254_v38 }
 0xcac   :  { %1427 = vmatpush.msra.mxu3 %v3866_v45 }
 0xcae   :  { %1428 = vmatpush.msra.mxu3 %v3867_v47  ;;  %v3926_v47 = vld [vmem:[%s5298_s5 + $0x6] ss:$0 sm:$0xff] }
 0xcb2   :  { %v1494_v48 = vpop.f32.mrf.mxu1 }
 0xcb3   :  { %3728 = vmatmul.msk.f32.vlgmr.msrb.gmra.mxu3 %vm118_vm1, %v1322_v6  ;;  %v1529_v14 = vsel %vm1012_vm6, %v1494_v48, -inf }
 0xcb4   :  { %1530 = vmax.xlane.f32.xlu1 %v1529_v14 }
 0xcea   :  { %v1367_v49 = vpop.xlane.xlu0 %1366 }
 0xceb   :  { %4006 = vrcp.f32 %v1367_v49 }
 0xcf1   :  { %v4007_v51 = vpop.eup %4006 }
 0xcf2   :  { %v1373_v52 = vmul.f32 %v4007_v51, %v4003_v36 }
 0xcf4   :  { %3729 = vmatmul.msk.f32.vlgmr.msrb.gmra.mxu2 %vm1012_vm6, %v1373_v52 }
 0xcfd   :  { %v1502_v56 = vpop.permute.xlu0 %1501 }
 0xcfe   :  { %3736 = vmatpush.xpose.msk.msra.mxu2 %vm118_vm1, %v1502_v56 }
 0xd02   :  { %3737 = vmatpush.xpose.msk.msra.mxu2 %vm118_vm1, %v1500_v53 }
 0xd05   :  { %3738 = vmatmul.msk.f32.vlgmr.msra.gmra.mxu2 %vm118_vm1, %v1498_v57 }
 0xd06   :  { %1631 = vmatpush.msrb.mxu2 %v1609_v32  ;;  %v1739_v32 = vld [vmem:[%s5297_s4 + $0x118] sm:$0xff] }
 0xd27   :  { %v1531_v58 = vpop.xlane.xlu1 %1530 }
 0xd28   :  { %v1535_v59 = vsub.f32 %v1494_v48, %v1531_v58 }
 0xd2a   :  { %v1537_v26 = vmul.f32 1.442695, %v1535_v59 }
 0xd2c   :  { %4008 = vpow2.f32 %v1537_v26 }
 0xd2e   :  { %v1227_v60 = vpop.f32.mrf.mxu3 }
 0xd2f   :  { %3720 = vmatmul.msk.f32.gmra.mxu0 %vm118_vm1, %v1227_v60 }
 0xd32   :  { %v4009_v27 = vpop.eup %4008 }
 0xd33   :  { %v1541_v19 = vsel %vm1012_vm6, %v4009_v27, 0.0 }
 0xd36   :  { %v1350_v28 = vpop.f32.mrf.mxu3 }
 0xd37   :  { %v1356_v61 = vsel %vm1012_vm6, %v1350_v28, -inf }
 0xd38   :  { %1357 = vmax.xlane.f32.xlu0 %v1356_v61 }
 0xd40   :  { %1542 = vadd.xlane.f32.xlu0 %v1541_v19 }
 0xd77   :  { %v1401_v0 = vpop.f32.mrf.mxu2 }
 0xd78   :  { %3731 = vmatmul.msk.f32.vlgmr.msra.gmra.mxu0 %vm118_vm1, %v1401_v0 }
 0xd88   :  { %v1526_v1 = vpop.f32.mrf.mxu2 }
 0xd89   :  { %v1532_v5 = vsel %vm1012_vm6, %v1526_v1, -inf }
 0xd8a   :  { %1533 = vmax.xlane.f32.xlu1 %v1532_v5 }
 0xdab   :  { %v1358_v4 = vpop.xlane.xlu0 %1357 }
 0xdac   :  { %v1360_v6 = vsub.f32 %v1350_v28, %v1358_v4  ;;  %v1257_v40 = vpop.f32.mrf.mxu0  ;;  %v1701_v4 = vld [vmem:[%s5297_s4 + $0xf0] sm:$0xff] }
 0xdad   :  { %v1287_v56 = vadd.f32 %v4627_v44, %v1257_v40 }
 0xdae   :  { %v1363_v7 = vmul.f32 1.442695, %v1360_v6  ;;  %v1700_v6 = vld [vmem:[%s5297_s4 + $0xe8] sm:$0xff] }
 0xdb0   :  { %4010 = vpow2.f32 %v1363_v7  ;;  %v1699_v7 = vld [vmem:[%s5297_s4 + $0xe0] sm:$0xff] }
 0xdb3   :  { %v1543_v21 = vpop.xlane.xlu0 %1542 }
 0xdb6   :  { %v4011_v8 = vpop.eup %4010 }
 0xdb7   :  { %v1368_v11 = vsel %vm1012_vm6, %v4011_v8, 0.0 }
 0xdb8   :  { %1369 = vadd.xlane.f32.xlu2 %v1368_v11 }
 0xdd0   :  { %3869 = vrot.lane.b32.xlu2 %v4564_v34, %s4145_s7 }
 0xdd8   :  { %3874 = vrot.lane.b32.xlu2 %v4574_v55, %s4145_s7 }
 0xdf5   :  { %v1457_v42 = vpop.f32.mrf.mxu0 }
 0xdf6   :  { %v1463_v45 = vadd.f32 %v1457_v42, %v1284_v43 }
 0xdfd   :  { %v1534_v10 = vpop.xlane.xlu1 %1533 }
 0xdfe   :  { %v1536_v13 = vsub.f32 %v1526_v1, %v1534_v10 }
 0xe00   :  { %v1539_v15 = vmul.f32 1.442695, %v1536_v13 }
 0xe02   :  { %4012 = vpow2.f32 %v1539_v15 }
 0xe08   :  { %v4013_v16 = vpop.eup %4012 }
 0xe09   :  { %v1544_v18 = vsel %vm1012_vm6, %v4013_v16, 0.0 }
 0xe0a   :  { %1545 = vadd.xlane.f32.xlu0 %v1544_v18 }
 0xe2b   :  { %v1370_v20 = vpop.xlane.xlu2 %1369 }
 0xe2c   :  { %4014 = vrcp.f32 %v1370_v20 }
 0xe2d   :  { %4016 = vrcp.f32 %v1543_v21 }
 0xe32   :  { %v4015_v23 = vpop.eup %4014 }
 0xe33   :  { %v1374_v24 = vmul.f32 %v4015_v23, %v4011_v8  ;;  %v3870_v2 = vpop.permute.xlu2 %3869  ;;  %v4017_v55 = vpop.eup %4016  ;;  %v3927_v23 = vld [vmem:[%s5298_s5 + $0xb] ss:$0 sm:$0xff] }
 0xe34   :  { %v3871_v25 = vunpack.i.l.bf16 %v3870_v2  ;;  %v3872_v34 = vunpack.i.h.bf16 %v3870_v2  ;;  %v1549_v17 = vmul.f32 %v4017_v55, %v4009_v27 }
 0xe35   :  { %3730 = vmatmul.msk.f32.vlgmr.msra.gmra.mxu3 %vm1012_vm6, %v1374_v24 }
 0xe36   :  { %1574 = vmatpush.msrb.mxu3 %v3871_v25  ;;  %v3928_v25 = vld [vmem:[%s5298_s5 + $0xc] ss:$0 sm:$0xff] }
 0xe38   :  { %1575 = vmatpush.msrb.mxu3 %v3872_v34 }
 0xe3b   :  { %v3875_v22 = vpop.permute.xlu2 %3874 }
 0xe3c   :  { %v3876_v29 = vunpack.i.l.bf16 %v3875_v22  ;;  %v3877_v30 = vunpack.i.h.bf16 %v3875_v22  ;;  %v1742_v22 = vld [vmem:[%s5297_s4 + $0x130] sm:$0xff] }
 0xe3d   :  { %3739 = vmatmul.msk.f32.vlgmr.msrb.gmra.mxu3 %vm1012_vm6, %v1549_v17  ;;  %v1743_v17 = vld [vmem:[%s5297_s4 + $0x138] sm:$0xff] }
 0xe3e   :  { %1603 = vmatpush.msrb.mxu1 %v3876_v29  ;;  %1761 = vmatpush.msrb.mxu0 %v1743_v17  ;;  %v1741_v29 = vld [vmem:[%s5297_s4 + $0x128] sm:$0xff] }
 0xe40   :  { %1604 = vmatpush.msrb.mxu1 %v3877_v30  ;;  %1762 = vmatpush.msrb.mxu0 %v1742_v22 }
 0xe42   :  { %1763 = vmatpush.msrb.mxu0 %v1741_v29 }
 0xe7d   :  { %v1546_v35 = vpop.xlane.xlu0 %1545 }
 0xe7e   :  { %4018 = vrcp.f32 %v1546_v35 }
 0xe84   :  { %v4019_v12 = vpop.eup %4018 }
 0xe85   :  { %v1550_v31 = vmul.f32 %v4019_v12, %v4013_v16  ;;  %v1740_v12 = vld [vmem:[%s5297_s4 + $0x120] sm:$0xff] }
 0xe86   :  { %1764 = vmatpush.msrb.mxu0 %v1740_v12  ;;  %v3931_v12 = vld [vmem:[%s5298_s5 + $0xd] ss:$0 sm:$0xff] }
 0xe87   :  { %3740 = vmatmul.msk.f32.vlgmr.msrb.gmra.mxu1 %vm1012_vm6, %v1550_v31 }
 0xe88   :  { %1765 = vmatpush.msrb.mxu0 %v1739_v32 }
 0xeb8   :  { %v1430_v33 = vpop.f32.mrf.mxu3 }
 0xeb9   :  { %3732 = vmatmul.msk.f32.gmra.mxu0 %vm118_vm1, %v1430_v33 }
 0xec0   :  { %v1577_v36 = vpop.f32.mrf.mxu3 }
 0xec1   :  { %3741 = vmatmul.msk.f32.vlgmr.msrb.gmra.mxu2 %vm118_vm1, %v1577_v36 }
 0xf04   :  { %v1606_v37 = vpop.f32.mrf.mxu1 }
 0xf05   :  { %3742 = vmatmul.msk.f32.gmra.mxu2 %vm118_vm1, %v1606_v37 }
 0xf36   :  { %v1460_v53 = vpop.f32.mrf.mxu0 }
 0xf37   :  { %v1464_v57 = vadd.f32 %v1460_v53, %v1287_v56 }
 0xf44   :  { %v1633_v48 = vpop.f32.mrf.mxu2 }
 0xf45   :  { %v1639_v14 = vadd.f32 %v1633_v48, %v1463_v45 }
 0xf47   :  { %v1643_v49 = vadd.f32 %v3926_v47, %v1639_v14  ;;  %v1738_v14 = vld [vmem:[%s5297_s4 + $0x110] sm:$0xff] }
 0xf48   :  { %1766 = vmatpush.msrb.mxu0 %v1738_v14 }
 0xf49   :  { %v1645_v51 = vadd.f32 %v1643_v49, %v4446_v9  ;;  %v1737_v49 = vld [vmem:[%s5297_s4 + $0x108] sm:$0xff] }
 0xf4a   :  { %1767 = vmatpush.msrb.mxu0 %v1737_v49 }
 0xf4b   :  { %v1647_v52 = vsel %vm48_vm0, %v1645_v51, 0.0 }
 0xf4c   :  { %1648 = vadd.xlane.f32.xlu1 %v1647_v52  ;;  %v3929_v52 = vld [vmem:[%s5298_s5 + $0x7] ss:$0 sm:$0xff] }
 0xf88   :  { %v1636_v58 = vpop.f32.mrf.mxu2 }
 0xf89   :  { %v1640_v59 = vadd.f32 %v1636_v58, %v1464_v57 }
 0xf8b   :  { %v1644_v3 = vadd.f32 %v3926_v47, %v1640_v59 }
 0xf8d   :  { %v1646_v60 = vadd.f32 %v1644_v3, %v4529_v62  ;;  %v1702_v62 = vld [vmem:[%s5297_s4 + $0xf8] sm:$0xff] }
 0xf8e   :  { %1723 = vmatpush.msra.mxu3 %v1702_v62 }
 0xf8f   :  { %v1650_v26 = vsel %vm48_vm0, %v1646_v60, 0.0 }
 0xf90   :  { %1651 = vadd.xlane.f32.xlu2 %v1650_v26  ;;  %1724 = vmatpush.msra.mxu3 %v1701_v4 }
 0xf92   :  { %1725 = vmatpush.msra.mxu3 %v1700_v6 }
 0xf94   :  { %1726 = vmatpush.msra.mxu3 %v1699_v7 }
 0xfbf   :  { %v1649_v28 = vpop.xlane.xlu1 %1648 }
 0xfc0   :  { %v1653_v61 = vmul.f32 %v1649_v28, %v4378_v39 }
 0xfc2   :  { %v1655_v27 = vsub.f32 %v1645_v51, %v1653_v61  ;;  %v1736_v51 = vld [vmem:[%s5297_s4 + $0x100] sm:$0xff] }
 0xfc3   :  { %1768 = vmatpush.msrb.mxu0 %v1736_v51 }
 0xfc4   :  { %v1657_v9 = vmul.f32 %v1655_v27, %v1655_v27 }
 0xfc6   :  { %v1659_v19 = vsel %vm48_vm0, %v1657_v9, 0.0 }
 0xfc7   :  { %1660 = vadd.xlane.f32.xlu0 %v1659_v19 }
0x1003   :  { %v1652_v63 = vpop.xlane.xlu2 %1651 }
0x1004   :  { %v1654_v44 = vmul.f32 %v1652_v63, %v4378_v39 }
0x1006   :  { %v1656_v0 = vsub.f32 %v1646_v60, %v1654_v44  ;;  %v3930_v60 = vld [vmem:[%s5298_s5 + $0x8] ss:$0 sm:$0xff] }
0x1008   :  { %v1658_v1 = vmul.f32 %v1656_v0, %v1656_v0 }
0x100a   :  { %v1662_v5 = vsel %vm48_vm0, %v1658_v1, 0.0 }
0x100b   :  { %1663 = vadd.xlane.f32.xlu1 %v1662_v5 }
0x103a   :  { %v1661_v8 = vpop.xlane.xlu0 %1660 }
0x103b   :  { %v1665_v11 = vmul.f32 %v1661_v8, %v4378_v39 }
0x103d   :  { %v1667_v10 = vadd.f32 1e-05, %v1665_v11 }
0x103f   :  { %4020 = vrsqrt.f32 %v1667_v10  ;;  %vm1675_vm11 = vweird.f32 %v1667_v10 }
0x1045   :  { %v4021_v13 = vpop.eup %4020 }
0x1046   :  { %v1670_v15 = vmul.f32 %v4021_v13, %v1667_v10  ;;  %vm1676_vm10 = vweird.f32 %v4021_v13 }
0x1047   :  { %vm1677_vm12 = vmor %vm1675_vm11, %vm1676_vm10 }
0x1048   :  { %v1671_v16 = vmul.f32 %v4021_v13, %v1670_v15  ;;  %v1835_v15 = vld [vmem:[%s5297_s4 + $0x158] sm:$0xff] }
0x1049   :  { %1856 = vmatpush.msra.mxu1 %v1835_v15 }
0x104a   :  { %v1672_v18 = vmul.f32 0.5, %v1671_v16  ;;  %v1869_v16 = vld [vmem:[%s5297_s4 + $0x170] sm:$0xff] }
0x104c   :  { %v1673_v20 = vsub.f32 1.5, %v1672_v18  ;;  %v1834_v18 = vld [vmem:[%s5297_s4 + $0x150] sm:$0xff] }
0x104d   :  { %1857 = vmatpush.msra.mxu1 %v1834_v18 }
0x104e   :  { %v1674_v21 = vmul.f32 %v4021_v13, %v1673_v20  ;;  %v1868_v20 = vld [vmem:[%s5297_s4 + $0x168] sm:$0xff] }
0x1050   :  { %v1678_v24 = vsel %vm1677_vm12, %v4021_v13, %v1674_v21  ;;  %v1870_v13 = vld [vmem:[%s5297_s4 + $0x178] sm:$0xff]  ;;  %v1833_v21 = vld [vmem:[%s5297_s4 + $0x148] sm:$0xff] }
0x1051   :  { %v1689_v2 = vmul.f32 %v1678_v24, %v1655_v27  ;;  %1891 = vmatpush.msra.mxu2 %v1870_v13  ;;  %1858 = vmatpush.msra.mxu1 %v1833_v21  ;;  %v1832_v24 = vld [vmem:[%s5297_s4 + $0x140] sm:$0xff] }
0x1053   :  { %v1693_v34 = vmul.f32 %v3927_v23, %v1689_v2  ;;  %1892 = vmatpush.msra.mxu2 %v1869_v16  ;;  %1859 = vmatpush.msra.mxu1 %v1832_v24 }
0x1055   :  { %v1697_v55 = vadd.f32 %v3928_v25, %v1693_v34  ;;  %1893 = vmatpush.msra.mxu2 %v1868_v20 }
0x1057   :  { %3743 = vmatmul.msk.f32.vlgmr.msra.gmra.mxu3 %vm48_vm0, %v1697_v55 }
0x107e   :  { %v1664_v30 = vpop.xlane.xlu1 %1663 }
0x107f   :  { %v1666_v35 = vmul.f32 %v1664_v30, %v4378_v39 }
0x1081   :  { %v1668_v31 = vadd.f32 1e-05, %v1666_v35 }
0x1083   :  { %4022 = vrsqrt.f32 %v1668_v31  ;;  %vm1685_vm14 = vweird.f32 %v1668_v31 }
0x1089   :  { %v4023_v33 = vpop.eup %4022 }
0x108a   :  { %v1680_v36 = vmul.f32 %v4023_v33, %v1668_v31  ;;  %vm1686_vm13 = vweird.f32 %v4023_v33 }
0x108b   :  { %vm1687_vm15 = vmor %vm1685_vm14, %vm1686_vm13 }
0x108c   :  { %v1681_v37 = vmul.f32 %v4023_v33, %v1680_v36 }
0x108e   :  { %v1682_v38 = vmul.f32 0.5, %v1681_v37 }
0x1090   :  { %v1683_v40 = vsub.f32 1.5, %v1682_v38  ;;  %v4770_v38 = vld [vmem:[%s5295_s2] sm:$0xff] }
0x1092   :  { %v1684_v42 = vmul.f32 %v4023_v33, %v1683_v40 }
0x1094   :  { %v1688_v43 = vsel %vm1687_vm15, %v4023_v33, %v1684_v42  ;;  %v3932_v33 = vld [vmem:[%s5298_s5 + $0xe] ss:$0 sm:$0xff] }
0x1095   :  { %v1690_v45 = vmul.f32 %v1688_v43, %v1656_v0 }
0x1097   :  { %v1694_v47 = vmul.f32 %v3927_v23, %v1690_v45  ;;  %v1867_v23 = vld [vmem:[%s5297_s4 + $0x160] sm:$0xff] }
0x1098   :  { %1894 = vmatpush.msra.mxu2 %v1867_v23 }
0x1099   :  { %v1698_v48 = vadd.f32 %v3928_v25, %v1694_v47 }
0x109b   :  { %3744 = vmatmul.msk.f32.gmra.mxu3 %vm48_vm0, %v1698_v48 }
0x10da   :  { %v1728_v53 = vpop.f32.mrf.mxu3 }
0x10db   :  { %v1729_v56 = vadd.f32 %v3929_v52, %v1728_v53 }
0x10dd   :  { %v1734_v57 = vmax.f32 %v1729_v56, 0.0 }
0x10df   :  { %3745 = vmatmul.msk.f32.vlgmr.msrb.gmra.mxu0 %vm1746_vm2, %v1734_v57 }
0x111e   :  { %v1731_v58 = vpop.f32.mrf.mxu3 }
0x111f   :  { %v1732_v59 = vadd.f32 %v3929_v52, %v1731_v58 }
0x1121   :  { %v1735_v3 = vmax.f32 %v1732_v59, 0.0  ;;  %v4783_v59 = vld [vmem:[%s5295_s2 + $0x8] sm:$0xff] }
0x1123   :  { %3746 = vmatmul.msk.f32.gmra.mxu0 %vm1746_vm2, %v1735_v3 }
0x115c   :  { %v1770_v26 = vpop.f32.mrf.mxu0 }
0x115d   :  { %v1771_v28 = vadd.f32 %v3930_v60, %v1770_v26 }
0x115f   :  { %v1776_v61 = vadd.f32 %v1771_v28, %v1697_v55 }
0x1161   :  { %v1778_v27 = vsel %vm48_vm0, %v1776_v61, 0.0 }
0x1162   :  { %1779 = vadd.xlane.f32.xlu0 %v1778_v27 }
0x11a0   :  { %v1773_v9 = vpop.f32.mrf.mxu0 }
0x11a1   :  { %v1774_v19 = vadd.f32 %v3930_v60, %v1773_v9  ;;  %v3933_v60 = vld [vmem:[%s5298_s5 + $0xf] ss:$0 sm:$0xff] }
0x11a3   :  { %v1777_v63 = vadd.f32 %v1774_v19, %v1698_v48 }
0x11a5   :  { %v1781_v44 = vsel %vm48_vm0, %v1777_v63, 0.0 }
0x11a6   :  { %1782 = vadd.xlane.f32.xlu0 %v1781_v44 }
0x11d5   :  { %v1780_v0 = vpop.xlane.xlu0 %1779 }
0x11d6   :  { %v1784_v1 = vmul.f32 %v1780_v0, %v4378_v39 }
0x11d8   :  { %v1786_v5 = vsub.f32 %v1776_v61, %v1784_v1  ;;  %v3934_v61 = vld [vmem:[%s5298_s5 + $0x10] ss:$0 sm:$0xff] }
0x11da   :  { %v1788_v62 = vmul.f32 %v1786_v5, %v1786_v5 }
0x11dc   :  { %v1790_v4 = vsel %vm48_vm0, %v1788_v62, 0.0 }
0x11dd   :  { %1791 = vadd.xlane.f32.xlu1 %v1790_v4 }
0x1219   :  { %v1783_v6 = vpop.xlane.xlu0 %1782 }
0x121a   :  { %v1785_v7 = vmul.f32 %v1783_v6, %v4378_v39 }
0x121c   :  { %v1787_v8 = vsub.f32 %v1777_v63, %v1785_v7 }
0x121e   :  { %v1789_v11 = vmul.f32 %v1787_v8, %v1787_v8 }
0x1220   :  { %v1793_v10 = vsel %vm48_vm0, %v1789_v11, 0.0 }
0x1221   :  { %1794 = vadd.xlane.f32.xlu1 %v1793_v10 }
0x1250   :  { %v1792_v2 = vpop.xlane.xlu1 %1791 }
0x1251   :  { %v1796_v25 = vmul.f32 %v1792_v2, %v4378_v39 }
0x1253   :  { %v1798_v34 = vadd.f32 1e-05, %v1796_v25 }
0x1255   :  { %4024 = vrsqrt.f32 %v1798_v34  ;;  %vm1806_vm4 = vweird.f32 %v1798_v34 }
0x125b   :  { %v4025_v55 = vpop.eup %4024 }
0x125c   :  { %v1801_v17 = vmul.f32 %v4025_v55, %v1798_v34  ;;  %vm1807_vm3 = vweird.f32 %v4025_v55 }
0x125d   :  { %vm1808_vm5 = vmor %vm1806_vm4, %vm1807_vm3 }
0x125e   :  { %v1802_v22 = vmul.f32 %v4025_v55, %v1801_v17 }
0x1260   :  { %v1803_v29 = vmul.f32 0.5, %v1802_v22 }
0x1262   :  { %v1804_v30 = vsub.f32 1.5, %v1803_v29 }
0x1264   :  { %v1805_v35 = vmul.f32 %v4025_v55, %v1804_v30 }
0x1266   :  { %v1809_v31 = vsel %vm1808_vm5, %v4025_v55, %v1805_v35 }
0x1267   :  { %v1820_v32 = vmul.f32 %v1809_v31, %v1786_v5 }
0x1269   :  { %v1824_v36 = vmul.f32 %v3931_v12, %v1820_v32 }
0x126b   :  { %v4763_v37 = vadd.f32 %v3932_v33, %v1824_v36 }
0x126d   :  { %3749 = vmatmul.msk.f32.vlgmr.msra.gmra.mxu2 %vm48_vm0, %v4763_v37  ;;  %v1830_v40 = vadd.f32 %v4770_v38, %v4763_v37 }
0x126f   :  { %3747 = vmatmul.msk.f32.vlgmr.msra.gmra.mxu1 %vm48_vm0, %v1830_v40  ;;  %v2028_v40 = vld [vmem:[%s5297_s4 + $0x180] sm:$0xff] }
0x1294   :  { %v1795_v42 = vpop.xlane.xlu1 %1794 }
0x1295   :  { %v1797_v43 = vmul.f32 %v1795_v42, %v4378_v39 }
0x1297   :  { %v1799_v45 = vadd.f32 1e-05, %v1797_v43 }
0x1299   :  { %4026 = vrsqrt.f32 %v1799_v45  ;;  %vm1816_vm8 = vweird.f32 %v1799_v45 }
0x129f   :  { %v4027_v47 = vpop.eup %4026 }
0x12a0   :  { %v1811_v48 = vmul.f32 %v4027_v47, %v1799_v45  ;;  %vm1817_vm7 = vweird.f32 %v4027_v47 }
0x12a1   :  { %vm1818_vm9 = vmor %vm1816_vm8, %vm1817_vm7 }
0x12a2   :  { %v1812_v14 = vmul.f32 %v4027_v47, %v1811_v48 }
0x12a4   :  { %v1813_v49 = vmul.f32 0.5, %v1812_v14 }
0x12a6   :  { %v1814_v51 = vsub.f32 1.5, %v1813_v49 }
0x12a8   :  { %v1815_v52 = vmul.f32 %v4027_v47, %v1814_v51 }
0x12aa   :  { %v1819_v53 = vsel %vm1818_vm9, %v4027_v47, %v1815_v52 }
0x12ab   :  { %v1821_v56 = vmul.f32 %v1819_v53, %v1787_v8 }
0x12ad   :  { %v1825_v57 = vmul.f32 %v3931_v12, %v1821_v56 }
0x12af   :  { %v4776_v58 = vadd.f32 %v3932_v33, %v1825_v57 }
0x12b1   :  { %3750 = vmatmul.msk.f32.gmra.mxu2 %vm48_vm0, %v4776_v58  ;;  %v1831_v3 = vadd.f32 %v4783_v59, %v4776_v58 }
0x12b3   :  { %3748 = vmatmul.msk.f32.gmra.mxu1 %vm48_vm0, %v1831_v3 }
0x12ec   :  { %v1861_v26 = vpop.f32.mrf.mxu1 }
0x12ed   :  { %v1862_v28 = vadd.f32 %v3933_v60, %v1861_v26 }
0x12ef   :  { %1905 = vrot.lane.b32.xlu0 %v1862_v28, %s4141_s25  ;;  %v4804_v44 = vmul.f32 0.35355338, %v1862_v28 }
0x12f0   :  { %v1896_v27 = vpop.f32.mrf.mxu2 }
0x12f1   :  { %v4795_v9 = vadd.f32 %v3934_v61, %v1896_v27 }
0x12f3   :  { %2000 = vmatpush.msrb.mxu1 %v4795_v9 }
0x1330   :  { %v1864_v19 = vpop.f32.mrf.mxu1 }
0x1331   :  { %v4798_v63 = vadd.f32 %v3933_v60, %v1864_v19 }
0x1333   :  { %1933 = vrot.lane.b32.xlu1 %v4798_v63, %s4141_s25  ;;  %v4809_v0 = vmul.f32 0.35355338, %v4798_v63 }
0x1334   :  { %v1899_v1 = vpop.f32.mrf.mxu2 }
0x1335   :  { %v4813_v5 = vadd.f32 %v3934_v61, %v1899_v1 }
0x1337   :  { %v4828_v13 = vpack.i.bf16 %v4813_v5, %v4795_v9 }
0x133b   :  { %2059 = vrot.lane.b32.xlu1 %v4798_v63, %s4140_s24 }
0x1343   :  { %2029 = vrot.lane.b32.xlu1 %v4804_v44, %s4142_s26 }
0x134b   :  { %2057 = vrot.lane.b32.xlu1 %v4809_v0, %s4142_s26 }
0x1361   :  { %v1906_v62 = vpop.permute.xlu0 %1905 }
0x1362   :  { %3751 = vmatpush.xpose.msk.msrb.mxu3 %vm118_vm1, %v1906_v62 }
0x1365   :  { %3752 = vmatmul.msk.f32.vlgmr.msrb.gmra.mxu3 %vm118_vm1, %v4804_v44 }
0x1366   :  { %2023 = vmatpush.msra.mxu3 %v4813_v5 }
0x13a5   :  { %v1934_v4 = vpop.permute.xlu1 %1933 }
0x13a6   :  { %3753 = vmatpush.xpose.msk.msra.mxu0 %vm118_vm1, %v1934_v4 }
0x13a9   :  { %3754 = vmatmul.msk.f32.vlgmr.msra.gmra.mxu0 %vm118_vm1, %v4809_v0 }
0x13ad   :  { %v2060_v6 = vpop.permute.xlu1 %2059 }
0x13ae   :  { %3759 = vmatpush.xpose.msk.msra.mxu1 %vm118_vm1, %v2060_v6 }
0x13b5   :  { %v2030_v23 = vpop.permute.xlu1 %2029 }
0x13bd   :  { %v2058_v36 = vpop.permute.xlu1 %2057 }
0x13e8   :  { %v1929_v7 = vpop.f32.mrf.mxu3 }
0x13e9   :  { %v1960_v8 = vsel %vm118_vm1, %v1929_v7, -inf }
0x13ea   :  { %1961 = vmax.xlane.f32.xlu2 %v1960_v8  ;;  %v2161_v8 = vld [vmem:[%s5297_s4 + $0x188] sm:$0xff] }
0x1402   :  { %2031 = vrot.lane.b32.xlu2 %v1862_v28, %s4140_s24  ;;  %s3645_s24 = sshll.u32 %s5299_s6, 4  ;;  %s3646_s24 = int_to_ptr.hbm [resolvable:$true] %s3645_s24 }
0x1426   :  { %v1957_v11 = vpop.f32.mrf.mxu0 }
0x1427   :  { %v1963_v10 = vsel %vm118_vm1, %v1957_v11, -inf }
0x142b   :  { %1964 = vmax.xlane.f32.xlu2 %v1963_v10 }
0x1443   :  { %3879 = vrot.lane.b32.xlu2 %v4828_v13, %s4142_s26 }
0x144b   :  { %2248 = vrot.lane.b32.xlu2 %v4809_v0, %s4143_s27 }
0x145d   :  { %v1962_v15 = vpop.xlane.xlu2 %1961 }
0x145e   :  { %v1966_v16 = vsub.f32 %v1929_v7, %v1962_v15 }
0x1460   :  { %v1968_v18 = vmul.f32 1.442695, %v1966_v16 }
0x1462   :  { %4028 = vpow2.f32 %v1968_v18 }
0x1465   :  { %v2032_v20 = vpop.permute.xlu2 %2031 }
0x1466   :  { %3757 = vmatpush.xpose.msk.msrb.mxu0 %vm118_vm1, %v2032_v20 }
0x1468   :  { %v4029_v21 = vpop.eup %4028 }
0x1469   :  { %3758 = vmatmul.msk.f32.vlgmr.msrb.gmra.mxu0 %vm118_vm1, %v2030_v23  ;;  %v1972_v24 = vsel %vm118_vm1, %v4029_v21, 0.0 }
0x146a   :  { %1973 = vadd.xlane.f32.xlu0 %v1972_v24  ;;  %2183 = vmatpush.msra.mxu0 %v2161_v8 }
0x149e   :  { %v1965_v2 = vpop.xlane.xlu2 %1964 }
0x149f   :  { %v1967_v25 = vsub.f32 %v1957_v11, %v1965_v2 }
0x14a1   :  { %v1970_v34 = vmul.f32 1.442695, %v1967_v25 }
0x14a3   :  { %4030 = vpow2.f32 %v1970_v34 }
0x14a6   :  { %v3880_v55 = vpop.permute.xlu2 %3879 }
0x14a7   :  { %v3882_v17 = vunpack.i.h.bf16 %v3880_v55  ;;  %v3881_v22 = vunpack.i.l.bf16 %v3880_v55 }
0x14a9   :  { %v4031_v29 = vpop.eup %4030  ;;  %2129 = vmatpush.msrb.mxu2 %v3881_v22  ;;  %2156 = vmatpush.msrb.mxu3 %v3882_v17 }
0x14aa   :  { %v1975_v30 = vsel %vm118_vm1, %v4031_v29, 0.0 }
0x14ab   :  { %1976 = vadd.xlane.f32.xlu1 %v1975_v30 }
0x14ae   :  { %v2249_v18 = vpop.permute.xlu2 %2248 }
0x14c4   :  { %2222 = vrot.lane.b32.xlu1 %v1862_v28, %s4144_s30 }
0x14cc   :  { %2384 = vrot.lane.b32.xlu1 %v1862_v28, %s4146_s8 }
0x14dd   :  { %v1974_v35 = vpop.xlane.xlu0 %1973 }
0x14de   :  { %4032 = vrcp.f32 %v1974_v35 }
0x14e4   :  { %v4033_v12 = vpop.eup %4032 }
0x14e5   :  { %v1980_v31 = vmul.f32 %v4033_v12, %v4029_v21 }
0x14e6   :  { %v2054_v32 = vpop.f32.mrf.mxu0 }
0x14e7   :  { %3755 = vmatmul.msk.f32.vlgmr.msrb.gmra.mxu1 %vm118_vm1, %v1980_v31  ;;  %v2085_v33 = vsel %vm118_vm1, %v2054_v32, -inf }
0x14e8   :  { %2086 = vmax.xlane.f32.xlu0 %v2085_v33  ;;  %2212 = vmatpush.msrb.mxu1 %v2028_v40 }
0x14ef   :  { %3760 = vmatmul.msk.f32.vlgmr.msra.gmra.mxu1 %vm118_vm1, %v2058_v36 }
0x14fc   :  { %2250 = vrot.lane.b32.xlu0 %v4798_v63, %s4144_s30 }
0x151e   :  { %v1977_v42 = vpop.xlane.xlu1 %1976 }
0x151f   :  { %4034 = vrcp.f32 %v1977_v42 }
0x1525   :  { %v4035_v43 = vpop.eup %4034 }
0x1526   :  { %v1981_v45 = vmul.f32 %v4035_v43, %v4031_v29 }
0x1528   :  { %3756 = vmatmul.msk.f32.vlgmr.msra.gmra.mxu3 %vm118_vm1, %v1981_v45 }
0x1536   :  { %v2223_v47 = vpop.permute.xlu1 %2222 }
0x1537   :  { %3767 = vmatpush.xpose.msk.msra.mxu2 %vm118_vm1, %v2223_v47 }
0x153e   :  { %v2385_v48 = vpop.permute.xlu1 %2384 }
0x153f   :  { %3775 = vmatpush.xpose.msk.msra.mxu1 %vm118_vm1, %v2385_v48 }
0x155b   :  { %v2087_v14 = vpop.xlane.xlu0 %2086 }
0x155c   :  { %v2091_v49 = vsub.f32 %v2054_v32, %v2087_v14 }
0x155e   :  { %v2093_v51 = vmul.f32 1.442695, %v2091_v49 }
0x1560   :  { %4036 = vpow2.f32 %v2093_v51 }
0x1564   :  { %v2002_v52 = vpop.f32.mrf.mxu1 }
0x1565   :  { %3765 = vmatmul.msk.f32.vlgmr.msrb.gmra.mxu1 %vm118_vm1, %v2002_v52 }
0x1566   :  { %v4037_v53 = vpop.eup %4036 }
0x1567   :  { %v2097_v56 = vsel %vm118_vm1, %v4037_v53, 0.0 }
0x1568   :  { %2098 = vadd.xlane.f32.xlu0 %v2097_v56  ;;  %v2350_v56 = vld [vmem:[%s5297_s4 + $0x190] sm:$0xff] }
0x1569   :  { %2372 = vmatpush.msrb.mxu0 %v2350_v56 }
0x156c   :  { %v2082_v57 = vpop.f32.mrf.mxu1 }
0x156d   :  { %v2088_v60 = vsel %vm118_vm1, %v2082_v57, -inf }
0x156e   :  { %v2251_v3 = vpop.permute.xlu0 %2250 }
0x156f   :  { %3769 = vmatpush.xpose.msk.msra.mxu3 %vm118_vm1, %v2251_v3 }
0x1570   :  { %2089 = vmax.xlane.f32.xlu0 %v2088_v60 }
0x1584   :  { %2220 = vrot.lane.b32.xlu0 %v4804_v44, %s4143_s27 }
0x15ab   :  { %v2025_v26 = vpop.f32.mrf.mxu3 }
0x15ac   :  { %3766 = vmatmul.msk.f32.gmra.mxu1 %vm118_vm1, %v2025_v26 }
0x15db   :  { %v2099_v28 = vpop.xlane.xlu0 %2098 }
0x15dc   :  { %4038 = vrcp.f32 %v2099_v28 }
0x15e2   :  { %v4039_v61 = vpop.eup %4038  ;;  %v4871_v23 = vpop.f32.mrf.mxu1 }
0x15e3   :  { %v2105_v27 = vmul.f32 %v4039_v61, %v4037_v53  ;;  %v2090_v19 = vpop.xlane.xlu0 %2089 }
0x15e4   :  { %v2092_v1 = vsub.f32 %v2082_v57, %v2090_v19  ;;  %v2512_v19 = vld [vmem:[%s5297_s4 + $0x198] sm:$0xff] }
0x15e5   :  { %3761 = vmatmul.msk.f32.vlgmr.msrb.gmra.mxu2 %vm118_vm1, %v2105_v27 }
0x15e6   :  { %v2095_v62 = vmul.f32 1.442695, %v2092_v1 }
0x15e8   :  { %4040 = vpow2.f32 %v2095_v62 }
0x15ee   :  { %v4041_v4 = vpop.eup %4040 }
0x15ef   :  { %v2100_v6 = vsel %vm118_vm1, %v4041_v4, 0.0 }
0x15f0   :  { %2101 = vadd.xlane.f32.xlu0 %v2100_v6 }
0x15f6   :  { %v2221_v7 = vpop.permute.xlu0 %2220 }
0x15f7   :  { %3768 = vmatmul.msk.f32.vlgmr.msra.gmra.mxu2 %vm118_vm1, %v2221_v7 }
0x1604   :  { %2382 = vrot.lane.b32.xlu0 %v4804_v44, %s4145_s7 }
0x1629   :  { %v4873_v24 = vpop.f32.mrf.mxu1 }
0x1663   :  { %v2102_v11 = vpop.xlane.xlu0 %2101 }
0x1664   :  { %4042 = vrcp.f32 %v2102_v11 }
0x1668   :  { %v2131_v10 = vpop.f32.mrf.mxu2 }
0x1669   :  { %3763 = vmatmul.msk.f32.vlgmr.msra.gmra.mxu0 %vm118_vm1, %v2131_v10 }
0x166a   :  { %v4043_v15 = vpop.eup %4042 }
0x166b   :  { %v2106_v16 = vmul.f32 %v4043_v15, %v4041_v4 }
0x166d   :  { %3762 = vmatmul.msk.f32.vlgmr.msrb.gmra.mxu3 %vm118_vm1, %v2106_v16 }
0x1675   :  { %3770 = vmatmul.msk.f32.vlgmr.msra.gmra.mxu3 %vm118_vm1, %v2249_v18 }
0x1676   :  { %v2383_v20 = vpop.permute.xlu0 %2382 }
0x1677   :  { %3776 = vmatmul.msk.f32.vlgmr.msra.gmra.mxu1 %vm118_vm1, %v2383_v20 }
0x167a   :  { %v2245_v44 = vpop.f32.mrf.mxu2 }
0x167b   :  { %v2276_v21 = vsel %vm118_vm1, %v2245_v44, -inf }
0x167c   :  { %2277 = vmax.xlane.f32.xlu2 %v2276_v21 }
0x16e6   :  { %v2185_v7 = vpop.f32.mrf.mxu0 }
0x16e7   :  { %v2215_v16 = vadd.f32 %v4871_v23, %v2185_v7 }
0x16ef   :  { %v2278_v2 = vpop.xlane.xlu2 %2277 }
0x16f0   :  { %v2282_v25 = vsub.f32 %v2245_v44, %v2278_v2  ;;  %v2158_v34 = vpop.f32.mrf.mxu3  ;;  %v4912_v44 = vld [vmem:[%s5298_s5 + $0x11] ss:$0 sm:$0xff] }
0x16f1   :  { %3764 = vmatmul.msk.f32.gmra.mxu0 %vm118_vm1, %v2158_v34 }
0x16f2   :  { %v2284_v55 = vmul.f32 1.442695, %v2282_v25 }
0x16f4   :  { %4044 = vpow2.f32 %v2284_v55  ;;  %v2407_v17 = vpop.f32.mrf.mxu1 }
0x16f5   :  { %v2438_v22 = vsel %vm118_vm1, %v2407_v17, -inf }
0x16f6   :  { %2439 = vmax.xlane.f32.xlu0 %v2438_v22 }
0x16f8   :  { %v2273_v29 = vpop.f32.mrf.mxu3 }
0x16f9   :  { %v2279_v30 = vsel %vm118_vm1, %v2273_v29, -inf }
0x16fa   :  { %v4045_v35 = vpop.eup %4044  ;;  %2280 = vmax.xlane.f32.xlu1 %v2279_v30 }
0x16fb   :  { %v2288_v12 = vsel %vm118_vm1, %v4045_v35, 0.0 }
0x16fc   :  { %2289 = vadd.xlane.f32.xlu2 %v2288_v12 }
0x1714   :  { %3884 = vrot.lane.b32.xlu2 %v4828_v13, %s4143_s27 }
0x171c   :  { %2460 = vrot.lane.b32.xlu2 %v4795_v9, %s4145_s7 }
0x1724   :  { %2486 = vrot.lane.b32.xlu2 %v4813_v5, %s4145_s7 }
0x1769   :  { %v2440_v31 = vpop.xlane.xlu0 %2439 }
0x176a   :  { %v2444_v32 = vsub.f32 %v2407_v17, %v2440_v31 }
0x176c   :  { %v2446_v33 = vmul.f32 1.442695, %v2444_v32 }
0x176d   :  { %v2281_v36 = vpop.xlane.xlu1 %2280 }
0x176e   :  { %4046 = vpow2.f32 %v2446_v33  ;;  %v2283_v40 = vsub.f32 %v2273_v29, %v2281_v36  ;;  %v4906_v8 = vpop.f32.mrf.mxu0  ;;  %v2641_v36 = vld [vmem:[%s5297_s4 + $0x1d0] sm:$0xff] }
0x176f   :  { %v2290_v42 = vpop.xlane.xlu2 %2289 }
0x1770   :  { %v2286_v43 = vmul.f32 1.442695, %v2283_v40  ;;  %4048 = vrcp.f32 %v2290_v42  ;;  %v2640_v40 = vld [vmem:[%s5297_s4 + $0x1c8] sm:$0xff]  ;;  %v2639_v42 = vld [vmem:[%s5297_s4 + $0x1c0] sm:$0xff] }
0x1772   :  { %4050 = vpow2.f32 %v2286_v43  ;;  %v2607_v43 = vld [vmem:[%s5297_s4 + $0x1b8] sm:$0xff] }
0x1774   :  { %v4047_v45 = vpop.eup %4046 }
0x1775   :  { %v2450_v47 = vsel %vm118_vm1, %v4047_v45, 0.0 }
0x1776   :  { %v4049_v13 = vpop.eup %4048  ;;  %2451 = vadd.xlane.f32.xlu0 %v2450_v47  ;;  %v2605_v47 = vld [vmem:[%s5297_s4 + $0x1a8] sm:$0xff] }
0x1777   :  { %v3885_v48 = vpop.permute.xlu2 %3884  ;;  %v2296_v5 = vmul.f32 %v4049_v13, %v4045_v35 }
0x1778   :  { %v4051_v9 = vpop.eup %4050  ;;  %v3887_v14 = vunpack.i.h.bf16 %v3885_v48  ;;  %v3886_v49 = vunpack.i.l.bf16 %v3885_v48 }
0x1779   :  { %v2291_v51 = vsel %vm118_vm1, %v4051_v9, 0.0 }
0x177a   :  { %2292 = vadd.xlane.f32.xlu1 %v2291_v51  ;;  %2319 = vmatpush.msrb.mxu2 %v3886_v49 }
0x177b   :  { %2345 = vmatpush.msrb.mxu3 %v3887_v14  ;;  %3771 = vmatmul.msk.f32.vlgmr.msrb.gmra.mxu2 %vm118_vm1, %v2296_v5 }
0x177f   :  { %v2461_v52 = vpop.permute.xlu2 %2460 }
0x1780   :  { %2481 = vmatpush.msra.mxu3 %v2461_v52 }
0x1787   :  { %v2487_v53 = vpop.permute.xlu2 %2486 }
0x1788   :  { %2507 = vmatpush.msrb.mxu1 %v2487_v53 }
0x178a   :  { %2410 = vrot.lane.b32.xlu0 %v4809_v0, %s4145_s7 }
0x1793   :  { %2412 = vrot.lane.b32.xlu1 %v4798_v63, %s4146_s8 }
0x17e9   :  { %v2452_v3 = vpop.xlane.xlu0 %2451 }
0x17ed   :  { %v2293_v57 = vpop.xlane.xlu1 %2292 }
0x17ee   :  { %4052 = vrcp.f32 %v2293_v57 }
0x17ef   :  { %4054 = vrcp.f32 %v2452_v3 }
0x17f4   :  { %v4053_v60 = vpop.eup %4052 }
0x17f5   :  { %v2297_v26 = vmul.f32 %v4053_v60, %v4051_v9  ;;  %v4055_v28 = vpop.eup %4054 }
0x17f6   :  { %v2458_v61 = vmul.f32 %v4055_v28, %v4047_v45  ;;  %v2606_v45 = vld [vmem:[%s5297_s4 + $0x1b0] sm:$0xff] }
0x17f7   :  { %3772 = vmatmul.msk.f32.vlgmr.msrb.gmra.mxu3 %vm118_vm1, %v2297_v26 }
0x17f8   :  { %2628 = vmatpush.msrb.mxu3 %v2607_v43 }
0x17fa   :  { %2629 = vmatpush.msrb.mxu3 %v2606_v45 }
0x17fc   :  { %v2411_v0 = vpop.permute.xlu0 %2410  ;;  %2630 = vmatpush.msrb.mxu3 %v2605_v47 }
0x17fe   :  { %v2321_v27 = vpop.f32.mrf.mxu2 }
0x17ff   :  { %3773 = vmatmul.msk.f32.vlgmr.msrb.gmra.mxu0 %vm118_vm1, %v2321_v27  ;;  %3779 = vmatmul.msk.f32.vlgmr.msra.gmra.mxu3 %vm118_vm1, %v2458_v61  ;;  %v4975_v27 = vld [vmem:[%s5298_s5 + $0x13] ss:$0 sm:$0xff] }
0x1805   :  { %v2413_v63 = vpop.permute.xlu1 %2412 }
0x1806   :  { %3777 = vmatpush.xpose.msk.msra.mxu2 %vm118_vm1, %v2413_v63 }
0x1809   :  { %3778 = vmatmul.msk.f32.vlgmr.msra.gmra.mxu2 %vm118_vm1, %v2411_v0 }
0x180a   :  { %2534 = vmatpush.msrb.mxu2 %v2512_v19 }
0x187a   :  { %v2347_v1 = vpop.f32.mrf.mxu3 }
0x187b   :  { %3774 = vmatmul.msk.f32.gmra.mxu0 %vm118_vm1, %v2347_v1  ;;  %v2676_v1 = vld [vmem:[%s5297_s4 + $0x1f0] sm:$0xff] }
0x187c   :  { %v2374_v10 = vpop.f32.mrf.mxu0 }
0x187d   :  { %v2380_v20 = vadd.f32 %v2374_v10, %v2215_v16  ;;  %v5001_v16 = vld [vmem:[%s5298_s5 + $0x12] ss:$0 sm:$0xff] }
0x1882   :  { %v2483_v62 = vpop.f32.mrf.mxu3 }
0x1883   :  { %3781 = vmatmul.msk.f32.vlgmr.msrb.gmra.mxu2 %vm118_vm1, %v2483_v62  ;;  %v2218_v62 = vadd.f32 %v4873_v24, %v4906_v8  ;;  %v2674_v24 = vld [vmem:[%s5297_s4 + $0x1e0] sm:$0xff] }
0x1884   :  { %v4110_v8 = vld [vmem:[%s5294_s1] sm:$0xff] }
0x188c   :  { %v2435_v4 = vpop.f32.mrf.mxu2 }
0x188d   :  { %v2441_v6 = vsel %vm118_vm1, %v2435_v4, -inf }
0x188e   :  { %2442 = vmax.xlane.f32.xlu0 %v2441_v6 }
0x18f8   :  { %v2377_v28 = vpop.f32.mrf.mxu0 }
0x1901   :  { %v2443_v11 = vpop.xlane.xlu0 %2442 }
0x1902   :  { %v2445_v15 = vsub.f32 %v2435_v4, %v2443_v11  ;;  %v2381_v4 = vadd.f32 %v2377_v28, %v2218_v62 }
0x1904   :  { %v2448_v18 = vmul.f32 1.442695, %v2445_v15 }
0x1906   :  { %4056 = vpow2.f32 %v2448_v18  ;;  %v2536_v21 = vpop.f32.mrf.mxu2 }
0x1907   :  { %v2542_v2 = vadd.f32 %v2536_v21, %v2380_v20 }
0x1909   :  { %v2546_v25 = vadd.f32 %v4912_v44, %v2542_v2  ;;  %v4112_v2 = vld [vmem:[%s5294_s1 + $0x10] sm:$0xff] }
0x190b   :  { %v2548_v34 = vadd.f32 %v2546_v25, %v4763_v37  ;;  %v2642_v37 = vld [vmem:[%s5297_s4 + $0x1d8] sm:$0xff] }
0x190c   :  { %v4057_v55 = vpop.eup %4056  ;;  %2657 = vmatpush.msra.mxu0 %v2642_v37  ;;  %v4113_v25 = vld [vmem:[%s5294_s1 + $0x18] sm:$0xff] }
0x190d   :  { %v2453_v17 = vsel %vm118_vm1, %v4057_v55, 0.0  ;;  %v2550_v22 = vsel %vm48_vm0, %v2548_v34, 0.0 }
0x190e   :  { %2454 = vadd.xlane.f32.xlu1 %v2453_v17  ;;  %2551 = vadd.xlane.f32.xlu2 %v2550_v22 }
0x190f   :  { %2658 = vmatpush.msra.mxu0 %v2641_v36 }
0x1911   :  { %2659 = vmatpush.msra.mxu0 %v2640_v40 }
0x1913   :  { %2660 = vmatpush.msra.mxu0 %v2639_v42 }
0x1914   :  { %3785 = vmatmul.msk.f32.vlgmr.msra.gmra.mxu0 %vm48_vm0, %v4403_v50  ;;  %v2604_v50 = vld [vmem:[%s5297_s4 + $0x1a0] sm:$0xff] }
0x1915   :  { %2631 = vmatpush.msrb.mxu3 %v2604_v50 }
0x191c   :  { %3786 = vmatmul.msk.f32.gmra.mxu0 %vm48_vm0, %v4417_v54 }
0x1924   :  { %3787 = vmatmul.msk.f32.gmra.mxu0 %vm48_vm0, %v4507_v41  ;;  %v4958_v41 = vld [vmem:[%s5298_s5 + $0x18] ss:$0 sm:$0xff] }
0x192c   :  { %3788 = vmatmul.msk.f32.gmra.mxu0 %vm48_vm0, %v4521_v46  ;;  %v4963_v46 = vld [vmem:[%s5298_s5 + $0x19] ss:$0 sm:$0xff] }
0x1981   :  { %v2455_v23 = vpop.xlane.xlu1 %2454  ;;  %v2552_v29 = vpop.xlane.xlu2 %2551 }
0x1982   :  { %4058 = vrcp.f32 %v2455_v23  ;;  %v2556_v30 = vmul.f32 %v2552_v29, %v4378_v39 }
0x1984   :  { %v2558_v35 = vsub.f32 %v2548_v34, %v2556_v30 }
0x1986   :  { %v2560_v12 = vmul.f32 %v2558_v35, %v2558_v35 }
0x1988   :  { %v4059_v31 = vpop.eup %4058  ;;  %v2562_v32 = vsel %vm48_vm0, %v2560_v12, 0.0  ;;  %v5040_v12 = vld [vmem:[%s5298_s5 + $0x14] ss:$0 sm:$0xff] }
0x1989   :  { %v2459_v33 = vmul.f32 %v4059_v31, %v4057_v55  ;;  %2563 = vadd.xlane.f32.xlu0 %v2562_v32 }
0x198b   :  { %3780 = vmatmul.msk.f32.vlgmr.msrb.gmra.mxu1 %vm118_vm1, %v2459_v33 }
0x1991   :  { %v2662_v61 = vpop.f32.mrf.mxu0 }
0x1992   :  { %v4981_v19 = vadd.f32 %v4975_v27, %v2662_v61 }
0x1999   :  { %v2665_v63 = vpop.f32.mrf.mxu0 }
0x199a   :  { %v4978_v0 = vadd.f32 %v4975_v27, %v2665_v63 }
0x199c   :  { %3793 = vmatpush.xpose.msk.msra.mxu2 %vm118_vm1, %v4978_v0 }
0x19a0   :  { %3794 = vmatpush.xpose.msk.msra.mxu2 %vm118_vm1, %v4981_v19 }
0x19fc   :  { %v2564_v13 = vpop.xlane.xlu0 %2563 }
0x19fd   :  { %v2568_v48 = vmul.f32 %v2564_v13, %v4378_v39 }
0x19ff   :  { %v2570_v9 = vadd.f32 1e-05, %v2568_v48 }
0x1a01   :  { %4060 = vrsqrt.f32 %v2570_v9  ;;  %vm2578_vm11 = vweird.f32 %v2570_v9 }
0x1a07   :  { %v4061_v54 = vpop.eup %4060 }
0x1a08   :  { %v2573_v14 = vmul.f32 %v4061_v54, %v2570_v9  ;;  %v2509_v49 = vpop.f32.mrf.mxu1  ;;  %vm2579_vm10 = vweird.f32 %v4061_v54 }
0x1a09   :  { %3782 = vmatmul.msk.f32.gmra.mxu2 %vm118_vm1, %v2509_v49  ;;  %vm2580_vm12 = vmor %vm2578_vm11, %vm2579_vm10 }
0x1a0a   :  { %v2574_v5 = vmul.f32 %v4061_v54, %v2573_v14 }
0x1a0c   :  { %v2575_v51 = vmul.f32 0.5, %v2574_v5 }
0x1a0e   :  { %v2576_v52 = vsub.f32 1.5, %v2575_v51 }
0x1a10   :  { %v2577_v53 = vmul.f32 %v4061_v54, %v2576_v52 }
0x1a12   :  { %v2581_v56 = vsel %vm2580_vm12, %v4061_v54, %v2577_v53 }
0x1a13   :  { %v2592_v57 = vmul.f32 %v2581_v56, %v2558_v35  ;;  %v2668_v56 = vpop.f32.mrf.mxu0 }
0x1a15   :  { %v2596_v3 = vmul.f32 %v4958_v41, %v2592_v57 }
0x1a17   :  { %v4967_v60 = vadd.f32 %v4963_v46, %v2596_v3 }
0x1a19   :  { %v2602_v26 = vadd.f32 %v4770_v38, %v4967_v60  ;;  %v2677_v38 = vld [vmem:[%s5297_s4 + $0x1f8] sm:$0xff] }
0x1a1a   :  { %2692 = vmatpush.msra.mxu1 %v2677_v38 }
0x1a1b   :  { %3783 = vmatmul.msk.f32.vlgmr.msrb.gmra.mxu3 %vm48_vm0, %v2602_v26  ;;  %v2671_v26 = vpop.f32.mrf.mxu0 }
0x1a1c   :  { %2693 = vmatpush.msra.mxu1 %v2676_v1  ;;  %v5055_v28 = vadd.f32 %v4975_v27, %v2671_v26 }
0x1a1e   :  { %3796 = vmatpush.xpose.msk.msra.mxu3 %vm118_vm1, %v5055_v28 }
0x1a8c   :  { %v2539_v6 = vpop.f32.mrf.mxu2 }
0x1a8d   :  { %v2543_v7 = vadd.f32 %v2539_v6, %v2381_v4 }
0x1a8f   :  { %v2547_v11 = vadd.f32 %v4912_v44, %v2543_v7  ;;  %v4111_v44 = vld [vmem:[%s5294_s1 + $0x8] sm:$0xff]  ;;  %s4150_s1 = smov 8  }
0x1a91   :  { %v2549_v10 = vadd.f32 %v2547_v11, %v4776_v58  ;;  %v2675_v58 = vld [vmem:[%s5297_s4 + $0x1e8] sm:$0xff] }
0x1a92   :  { %2694 = vmatpush.msra.mxu1 %v2675_v58 }
0x1a93   :  { %v2553_v15 = vsel %vm48_vm0, %v2549_v10, 0.0 }
0x1a94   :  { %2554 = vadd.xlane.f32.xlu1 %v2553_v15  ;;  %2695 = vmatpush.msra.mxu1 %v2674_v24 }
0x1a95   :  { %3789 = vmatmul.msk.f32.vlgmr.msra.gmra.mxu1 %vm48_vm0, %v4110_v8 }
0x1a9d   :  { %3790 = vmatmul.msk.f32.gmra.mxu1 %vm48_vm0, %v4111_v44 }
0x1a9e   :  { %v2633_v18 = vpop.f32.mrf.mxu3 }
0x1a9f   :  { %v2634_v20 = vadd.f32 %v5001_v16, %v2633_v18 }
0x1aa1   :  { %v5004_v21 = vmul.f32 0.35355338, %v2634_v20 }
0x1aa3   :  { %3795 = vmatmul.msk.f32.vlgmr.msra.gmra.mxu2 %vm118_vm1, %v5004_v21 }
0x1aa5   :  { %3791 = vmatmul.msk.f32.gmra.mxu1 %vm48_vm0, %v4112_v2 }
0x1aad   :  { %3792 = vmatmul.msk.f32.gmra.mxu1 %vm48_vm0, %v4113_v25 }
0x1b07   :  { %v2555_v34 = vpop.xlane.xlu1 %2554 }
0x1b08   :  { %v2557_v55 = vmul.f32 %v2555_v34, %v4378_v39 }
0x1b0a   :  { %v2559_v17 = vsub.f32 %v2549_v10, %v2557_v55 }
0x1b0c   :  { %v2561_v22 = vmul.f32 %v2559_v17, %v2559_v17 }
0x1b0e   :  { %v2565_v23 = vsel %vm48_vm0, %v2561_v22, 0.0 }
0x1b0f   :  { %2566 = vadd.xlane.f32.xlu0 %v2565_v23 }
0x1b12   :  { %v2697_v35 = vpop.f32.mrf.mxu1 }
0x1b13   :  { %v2698_v33 = vadd.f32 %v5040_v12, %v2697_v35 }
0x1b1a   :  { %v2700_v31 = vpop.f32.mrf.mxu1 }
0x1b1b   :  { %v2701_v32 = vadd.f32 %v5040_v12, %v2700_v31 }
0x1b1d   :  { %2808 = vmatpush.msrb.mxu2 %v2701_v32  ;;  %v5080_v15 = vpack.i.bf16 %v2698_v33, %v2701_v32 }
0x1b1f   :  { %2809 = vmatpush.msrb.mxu2 %v2698_v33 }
0x1b23   :  { %2842 = vrot.lane.b32.xlu0 %v4978_v0, %s4142_s26 }
0x1b26   :  { %v2737_v29 = vpop.f32.mrf.mxu2 }
0x1b27   :  { %v2769_v30 = vsel %vm1012_vm6, %v2737_v29, -inf }
0x1b28   :  { %2770 = vmax.xlane.f32.xlu1 %v2769_v30 }
0x1b41   :  { %2840 = vrot.lane.b32.xlu1 %v4981_v19, %s4142_s26 }
0x1b82   :  { %v2567_v37 = vpop.xlane.xlu0 %2566 }
0x1b83   :  { %v2569_v36 = vmul.f32 %v2567_v37, %v4378_v39 }
0x1b85   :  { %v2571_v40 = vadd.f32 1e-05, %v2569_v36 }
0x1b87   :  { %4062 = vrsqrt.f32 %v2571_v40  ;;  %vm2588_vm14 = vweird.f32 %v2571_v40 }
0x1b8d   :  { %v4063_v42 = vpop.eup %4062 }
0x1b8e   :  { %v2583_v43 = vmul.f32 %v4063_v42, %v2571_v40  ;;  %vm2589_vm13 = vweird.f32 %v4063_v42 }
0x1b8f   :  { %vm2590_vm15 = vmor %vm2588_vm14, %vm2589_vm13 }
0x1b90   :  { %v2584_v45 = vmul.f32 %v4063_v42, %v2583_v43 }
0x1b92   :  { %v2585_v47 = vmul.f32 0.5, %v2584_v45  ;;  %v2837_v45 = vld [vmem:[%s5297_s4 + $0x200] sm:$0xff] }
0x1b94   :  { %v2586_v50 = vsub.f32 1.5, %v2585_v47 }
0x1b95   :  { %v2843_v13 = vpop.permute.xlu0 %2842 }
0x1b96   :  { %v2587_v48 = vmul.f32 %v4063_v42, %v2586_v50  ;;  %3801 = vmatpush.xpose.msk.msra.mxu2 %vm118_vm1, %v2843_v13 }
0x1b98   :  { %v2591_v9 = vsel %vm2590_vm15, %v4063_v42, %v2587_v48 }
0x1b99   :  { %v2593_v54 = vmul.f32 %v2591_v9, %v2559_v17 }
0x1b9b   :  { %v2771_v14 = vpop.xlane.xlu1 %2770  ;;  %v2597_v49 = vmul.f32 %v4958_v41, %v2593_v54  ;;  %v5058_v41 = vadd.f32 %v4975_v27, %v2668_v56 }
0x1b9c   :  { %v2775_v5 = vsub.f32 %v2737_v29, %v2771_v14 }
0x1b9d   :  { %v5048_v51 = vadd.f32 %v4963_v46, %v2597_v49  ;;  %3797 = vmatpush.xpose.msk.msra.mxu3 %vm118_vm1, %v5058_v41  ;;  %v2986_v49 = vld [vmem:[%s5297_s4 + $0x208] sm:$0xff] }
0x1b9e   :  { %v2777_v52 = vmul.f32 1.442695, %v2775_v5 }
0x1b9f   :  { %v2603_v53 = vadd.f32 %v4783_v59, %v5048_v51 }
0x1ba0   :  { %4064 = vpow2.f32 %v2777_v52 }
0x1ba1   :  { %3784 = vmatmul.msk.f32.gmra.mxu3 %vm48_vm0, %v2603_v53 }
0x1ba6   :  { %v4065_v57 = vpop.eup %4064 }
0x1ba7   :  { %v2781_v3 = vsel %vm1012_vm6, %v4065_v57, 0.0 }
0x1ba8   :  { %2782 = vadd.xlane.f32.xlu2 %v2781_v3 }
0x1bb3   :  { %v2841_v59 = vpop.permute.xlu1 %2840 }
0x1bb4   :  { %3802 = vmatpush.xpose.msk.msra.mxu2 %vm118_vm1, %v2841_v59 }
0x1bc0   :  { %2838 = vrot.lane.b32.xlu2 %v5004_v21, %s4142_s26 }
0x1c1b   :  { %v2783_v46 = vpop.xlane.xlu2 %2782 }
0x1c1c   :  { %4066 = vrcp.f32 %v2783_v46 }
0x1c22   :  { %v4067_v61 = vpop.eup %4066 }
0x1c23   :  { %v2789_v63 = vmul.f32 %v4067_v61, %v4065_v57  ;;  %v2839_v62 = vpop.permute.xlu2 %2838 }
0x1c24   :  { %v2636_v38 = vpop.f32.mrf.mxu3 }
0x1c25   :  { %v2637_v27 = vadd.f32 %v5001_v16, %v2636_v38  ;;  %3799 = vmatmul.msk.f32.vlgmr.msrb.gmra.mxu2 %vm1012_vm6, %v2789_v63  ;;  %v2703_v16 = vpop.f32.mrf.mxu1 }
0x1c26   :  { %v5099_v20 = vadd.f32 %v5040_v12, %v2703_v16  ;;  %3008 = vmatpush.msrb.mxu2 %v2986_v49 }
0x1c27   :  { %v5069_v1 = vmul.f32 0.35355338, %v2637_v27 }
0x1c29   :  { %3798 = vmatmul.msk.f32.vlgmr.msra.gmra.mxu3 %vm118_vm1, %v5069_v1 }
0x1c2d   :  { %3803 = vmatmul.msk.f32.vlgmr.msra.gmra.mxu2 %vm118_vm1, %v2839_v62  ;;  %v2706_v18 = vpop.f32.mrf.mxu1 }
0x1c2e   :  { %v5102_v58 = vadd.f32 %v5040_v12, %v2706_v18 }
0x1c30   :  { %2831 = vmatpush.msrb.mxu3 %v5102_v58  ;;  %v5133_v26 = vpack.i.bf16 %v5099_v20, %v5102_v58 }
0x1c32   :  { %2832 = vmatpush.msrb.mxu3 %v5099_v20 }
0x1ca8   :  { %v5074_v4 = vpop.f32.mrf.mxu2 }
0x1cac   :  { %v2766_v6 = vpop.f32.mrf.mxu3 }
0x1cad   :  { %v2772_v7 = vsel %vm1012_vm6, %v2766_v6, -inf }
0x1cae   :  { %2773 = vmax.xlane.f32.xlu0 %v2772_v7 }
0x1cb0   :  { %v2867_v11 = vpop.f32.mrf.mxu2 }
0x1cb1   :  { %v2902_v10 = vsel %vm1012_vm6, %v2867_v11, -inf }
0x1cb2   :  { %2903 = vmax.xlane.f32.xlu1 %v2902_v10 }
0x1cc2   :  { %2874 = vrot.lane.b32.xlu0 %v5055_v28, %s4142_s26 }
0x1cca   :  { %3889 = vrot.lane.b32.xlu0 %v5080_v15, %s4142_s26 }
0x1ccb   :  { %2872 = vrot.lane.b32.xlu1 %v5058_v41, %s4142_s26 }
0x1cd2   :  { %3049 = vrot.lane.b32.xlu0 %v4978_v0, %s4143_s27 }
0x1cd3   :  { %3047 = vrot.lane.b32.xlu1 %v4981_v19, %s4143_s27 }
0x1cda   :  { %3045 = vrot.lane.b32.xlu0 %v5004_v21, %s4143_s27 }
0x1cdb   :  { %3225 = vrot.lane.b32.xlu1 %v4978_v0, %s4145_s7 }
0x1ce2   :  { %3081 = vrot.lane.b32.xlu0 %v5055_v28, %s4143_s27 }
0x1cea   :  { %3899 = vrot.lane.b32.xlu0 %v5080_v15, %s4143_s27 }
0x1d21   :  { %v2774_v24 = vpop.xlane.xlu0 %2773 }
0x1d22   :  { %v2776_v0 = vsub.f32 %v2766_v6, %v2774_v24 }
0x1d24   :  { %v2779_v8 = vmul.f32 1.442695, %v2776_v0 }
0x1d25   :  { %v2904_v44 = vpop.xlane.xlu1 %2903 }
0x1d26   :  { %4068 = vpow2.f32 %v2779_v8  ;;  %v2908_v2 = vsub.f32 %v2867_v11, %v2904_v44 }
0x1d28   :  { %v2910_v25 = vmul.f32 1.442695, %v2908_v2 }
0x1d2a   :  { %4070 = vpow2.f32 %v2910_v25  ;;  %v3189_v25 = vld [vmem:[%s5297_s4 + $0x210] sm:$0xff] }
0x1d2b   :  { %3211 = vmatpush.msra.mxu2 %v3189_v25 }
0x1d2c   :  { %v4069_v34 = vpop.eup %4068 }
0x1d2d   :  { %v2784_v55 = vsel %vm1012_vm6, %v4069_v34, 0.0 }
0x1d2e   :  { %2785 = vadd.xlane.f32.xlu2 %v2784_v55 }
0x1d30   :  { %v4071_v17 = vpop.eup %4070 }
0x1d31   :  { %v2914_v23 = vsel %vm1012_vm6, %v4071_v17, 0.0 }
0x1d34   :  { %v2875_v22 = vpop.permute.xlu0 %2874 }
0x1d35   :  { %3804 = vmatpush.xpose.msk.msra.mxu3 %vm118_vm1, %v2875_v22 }
0x1d36   :  { %2915 = vadd.xlane.f32.xlu2 %v2914_v23 }
0x1d3c   :  { %v3890_v29 = vpop.permute.xlu0 %3889 }
0x1d3d   :  { %v3891_v30 = vunpack.i.l.bf16 %v3890_v29  ;;  %v2873_v35 = vpop.permute.xlu1 %2872  ;;  %v3892_v12 = vunpack.i.h.bf16 %v3890_v29 }
0x1d3e   :  { %3805 = vmatpush.xpose.msk.msra.mxu3 %vm118_vm1, %v2873_v35 }
0x1d3f   :  { %2949 = vmatpush.msrb.mxu0 %v3891_v30 }
0x1d41   :  { %2950 = vmatpush.msrb.mxu0 %v3892_v12 }
0x1d44   :  { %v3050_v31 = vpop.permute.xlu0 %3049 }
0x1d45   :  { %3813 = vmatpush.xpose.msk.msra.mxu0 %vm118_vm1, %v3050_v31  ;;  %v3048_v32 = vpop.permute.xlu1 %3047 }
0x1d49   :  { %3814 = vmatpush.xpose.msk.msra.mxu0 %vm118_vm1, %v3048_v32 }
0x1d4c   :  { %v3046_v33 = vpop.permute.xlu0 %3045 }
0x1d4d   :  { %v3226_v54 = vpop.permute.xlu1 %3225 }
0x1d4e   :  { %2870 = vrot.lane.b32.xlu2 %v5069_v1, %s4142_s26 }
0x1d54   :  { %v3082_v36 = vpop.permute.xlu0 %3081 }
0x1d5c   :  { %v3900_v47 = vpop.permute.xlu0 %3899 }
0x1d5d   :  { %v3901_v9 = vunpack.i.l.bf16 %v3900_v47  ;;  %v3902_v14 = vunpack.i.h.bf16 %v3900_v47 }
0x1da1   :  { %v2786_v37 = vpop.xlane.xlu2 %2785 }
0x1da2   :  { %4072 = vrcp.f32 %v2786_v37 }
0x1da8   :  { %v4073_v40 = vpop.eup %4072 }
0x1da9   :  { %v2790_v42 = vmul.f32 %v4073_v40, %v4069_v34  ;;  %v2916_v43 = vpop.xlane.xlu2 %2915 }
0x1daa   :  { %4074 = vrcp.f32 %v2916_v43 }
0x1dab   :  { %3800 = vmatmul.msk.f32.vlgmr.msrb.gmra.mxu3 %vm1012_vm6, %v2790_v42 }
0x1dac   :  { %3037 = vmatpush.msrb.mxu3 %v2837_v45 }
0x1db0   :  { %v4075_v50 = vpop.eup %4074 }
0x1db1   :  { %v2922_v13 = vmul.f32 %v4075_v50, %v4071_v17  ;;  %v2871_v48 = vpop.permute.xlu2 %2870 }
0x1db3   :  { %3806 = vmatmul.msk.f32.vlgmr.msra.gmra.mxu3 %vm118_vm1, %v2871_v48  ;;  %3807 = vmatmul.msk.f32.vlgmr.msrb.gmra.mxu0 %vm1012_vm6, %v2922_v13 }
0x1db4   :  { %3154 = vmatpush.msrb.mxu0 %v3901_v9  ;;  %3823 = vmatpush.xpose.msk.msra.mxu3 %vm118_vm1, %v3226_v54 }
0x1db6   :  { %3155 = vmatpush.msrb.mxu0 %v3902_v14 }
0x1dbb   :  { %3811 = vmatmul.msk.f32.vlgmr.msrb.gmra.mxu3 %vm118_vm1, %v5074_v4  ;;  %3815 = vmatmul.msk.f32.vlgmr.msra.gmra.mxu0 %vm118_vm1, %v3046_v33 }
0x1e2e   :  { %v2834_v5 = vpop.f32.mrf.mxu3 }
0x1e2f   :  { %3812 = vmatmul.msk.f32.gmra.mxu3 %vm118_vm1, %v2834_v5 }
0x1e30   :  { %v2952_v52 = vpop.f32.mrf.mxu0 }
0x1e31   :  { %3809 = vmatmul.msk.f32.vlgmr.msrb.gmra.mxu2 %vm118_vm1, %v2952_v52 }
0x1e36   :  { %v2899_v53 = vpop.f32.mrf.mxu3 }
0x1e37   :  { %v2905_v56 = vsel %vm1012_vm6, %v2899_v53, -inf }
0x1e38   :  { %2906 = vmax.xlane.f32.xlu2 %v2905_v56  ;;  %v3074_v57 = vpop.f32.mrf.mxu0 }
0x1e39   :  { %v3109_v3 = vsel %vm1012_vm6, %v3074_v57, -inf }
0x1e3a   :  { %3110 = vmax.xlane.f32.xlu1 %v3109_v3 }
0x1e3e   :  { %v5166_v34 = vpop.f32.mrf.mxu3 }
0x1e50   :  { %3894 = vrot.lane.b32.xlu2 %v5133_v26, %s4142_s26 }
0x1e53   :  { %3077 = vrot.lane.b32.xlu1 %v5069_v1, %s4143_s27 }
0x1e58   :  { %3079 = vrot.lane.b32.xlu2 %v5058_v41, %s4143_s27 }
0x1e60   :  { %3223 = vrot.lane.b32.xlu2 %v4981_v19, %s4145_s7 }
0x1e68   :  { %3257 = vrot.lane.b32.xlu2 %v5055_v28, %s4145_s7 }
0x1eab   :  { %v2907_v59 = vpop.xlane.xlu2 %2906 }
0x1eac   :  { %v2909_v46 = vsub.f32 %v2899_v53, %v2907_v59 }
0x1ead   :  { %v3111_v61 = vpop.xlane.xlu1 %3110 }
0x1eae   :  { %v2912_v63 = vmul.f32 1.442695, %v2909_v46  ;;  %v3115_v38 = vsub.f32 %v3074_v57, %v3111_v61 }
0x1eb0   :  { %4076 = vpow2.f32 %v2912_v63  ;;  %v3117_v27 = vmul.f32 1.442695, %v3115_v38 }
0x1eb2   :  { %4078 = vpow2.f32 %v3117_v27  ;;  %v5169_v17 = vpop.f32.mrf.mxu3 }
0x1eb3   :  { %v3895_v62 = vpop.permute.xlu2 %3894 }
0x1eb4   :  { %v3896_v4 = vunpack.i.l.bf16 %v3895_v62  ;;  %v3897_v7 = vunpack.i.h.bf16 %v3895_v62 }
0x1eb6   :  { %v4077_v6 = vpop.eup %4076  ;;  %2980 = vmatpush.msrb.mxu1 %v3896_v4 }
0x1eb7   :  { %v2917_v11 = vsel %vm1012_vm6, %v4077_v6, 0.0 }
0x1eb8   :  { %v4079_v10 = vpop.eup %4078  ;;  %2918 = vadd.xlane.f32.xlu0 %v2917_v11  ;;  %2981 = vmatpush.msrb.mxu1 %v3897_v7  ;;  %v3365_v7 = vld [vmem:[%s5297_s4 + $0x218] sm:$0xff] }
0x1eb9   :  { %v3121_v19 = vsel %vm1012_vm6, %v4079_v10, 0.0 }
0x1eba   :  { %3816 = vmatpush.xpose.msk.msra.mxu1 %vm118_vm1, %v3082_v36  ;;  %3122 = vadd.xlane.f32.xlu1 %v3121_v19 }
0x1ebb   :  { %v3080_v28 = vpop.permute.xlu2 %3079 }
0x1ebe   :  { %3817 = vmatpush.xpose.msk.msra.mxu1 %vm118_vm1, %v3080_v28  ;;  %v3010_v28 = vpop.f32.mrf.mxu2 }
0x1ec3   :  { %v3224_v16 = vpop.permute.xlu2 %3223 }
0x1ec4   :  { %3824 = vmatpush.xpose.msk.msra.mxu3 %vm118_vm1, %v3224_v16 }
0x1ec5   :  { %v3078_v20 = vpop.permute.xlu1 %3077 }
0x1ecb   :  { %v3258_v18 = vpop.permute.xlu2 %3257 }
0x1ecc   :  { %3221 = vrot.lane.b32.xlu0 %v5004_v21, %s4145_s7  ;;  %3826 = vmatpush.xpose.msk.msra.mxu0 %vm118_vm1, %v3258_v18 }
0x1ed3   :  { %3255 = vrot.lane.b32.xlu1 %v5058_v41, %s4145_s7 }
0x1ed4   :  { %3253 = vrot.lane.b32.xlu0 %v5069_v1, %s4145_s7 }
0x1f2b   :  { %v2919_v58 = vpop.xlane.xlu0 %2918 }
0x1f2c   :  { %4080 = vrcp.f32 %v2919_v58 }
0x1f2d   :  { %v3123_v24 = vpop.xlane.xlu1 %3122 }
0x1f2e   :  { %4082 = vrcp.f32 %v3123_v24  ;;  %v3941_v24 = vld [vmem:[%s5298_s5 + $0x15] ss:$0 sm:$0xff] }
0x1f32   :  { %v4081_v0 = vpop.eup %4080 }
0x1f33   :  { %v2923_v8 = vmul.f32 %v4081_v0, %v4077_v6 }
0x1f34   :  { %v4083_v44 = vpop.eup %4082 }
0x1f35   :  { %v3129_v2 = vmul.f32 %v4083_v44, %v4079_v10  ;;  %3808 = vmatmul.msk.f32.vlgmr.msrb.gmra.mxu1 %vm1012_vm6, %v2923_v8 }
0x1f37   :  { %3819 = vmatmul.msk.f32.vlgmr.msrb.gmra.mxu0 %vm1012_vm6, %v3129_v2 }
0x1f3d   :  { %3818 = vmatmul.msk.f32.vlgmr.msra.gmra.mxu1 %vm118_vm1, %v3078_v20  ;;  %v3040_v20 = vadd.f32 %v5166_v34, %v3010_v28 }
0x1f3e   :  { %v3222_v21 = vpop.permute.xlu0 %3221 }
0x1f3f   :  { %3825 = vmatmul.msk.f32.vlgmr.msra.gmra.mxu3 %vm118_vm1, %v3222_v21 }
0x1f45   :  { %v3256_v41 = vpop.permute.xlu1 %3255 }
0x1f46   :  { %3827 = vmatpush.xpose.msk.msra.mxu0 %vm118_vm1, %v3256_v41  ;;  %v3254_v1 = vpop.permute.xlu0 %3253 }
0x1f49   :  { %3828 = vmatmul.msk.f32.vlgmr.msra.gmra.mxu0 %vm118_vm1, %v3254_v1 }
0x1f4a   :  { %3387 = vmatpush.msrb.mxu0 %v3365_v7 }
0x1fb2   :  { %v2983_v55 = vpop.f32.mrf.mxu1 }
0x1fb3   :  { %3810 = vmatmul.msk.f32.gmra.mxu2 %vm118_vm1, %v2983_v55 }
0x1fb4   :  { %v3157_v22 = vpop.f32.mrf.mxu0 }
0x1fba   :  { %v3106_v23 = vpop.f32.mrf.mxu1 }
0x1fbb   :  { %3821 = vmatmul.msk.f32.vlgmr.msra.gmra.mxu2 %vm118_vm1, %v3157_v22  ;;  %v3112_v29 = vsel %vm1012_vm6, %v3106_v23, -inf }
0x1fbc   :  { %3113 = vmax.xlane.f32.xlu2 %v3112_v29 }
0x1fc2   :  { %v3250_v30 = vpop.f32.mrf.mxu3 }
0x1fc3   :  { %v3285_v35 = vsel %vm1012_vm6, %v3250_v30, -inf }
0x1fc4   :  { %3286 = vmax.xlane.f32.xlu1 %v3285_v35 }
0x1fc6   :  { %v3282_v12 = vpop.f32.mrf.mxu0 }
0x1fc7   :  { %v3288_v31 = vsel %vm1012_vm6, %v3282_v12, -inf }
0x1fc8   :  { %3289 = vmax.xlane.f32.xlu0 %v3288_v31 }
0x1fdd   :  { %3904 = vrot.lane.b32.xlu1 %v5133_v26, %s4143_s27 }
0x202f   :  { %v3114_v32 = vpop.xlane.xlu2 %3113 }
0x2030   :  { %v3116_v33 = vsub.f32 %v3106_v23, %v3114_v32 }
0x2032   :  { %v3119_v37 = vmul.f32 1.442695, %v3116_v33 }
0x2034   :  { %4084 = vpow2.f32 %v3119_v37 }
0x2036   :  { %v3013_v16 = vpop.f32.mrf.mxu2 }
0x2037   :  { %v3287_v36 = vpop.xlane.xlu1 %3286  ;;  %v3043_v21 = vadd.f32 %v5169_v17, %v3013_v16 }
0x2038   :  { %v3291_v40 = vsub.f32 %v3250_v30, %v3287_v36 }
0x203a   :  { %v4085_v42 = vpop.eup %4084  ;;  %v3293_v43 = vmul.f32 1.442695, %v3291_v40  ;;  %v3457_v40 = vld [vmem:[%s5297_s4 + $0x230] sm:$0xff] }
0x203b   :  { %v3290_v45 = vpop.xlane.xlu0 %3289  ;;  %v3124_v47 = vsel %vm1012_vm6, %v4085_v42, 0.0 }
0x203c   :  { %4086 = vpow2.f32 %v3293_v43  ;;  %v3292_v50 = vsub.f32 %v3282_v12, %v3290_v45  ;;  %3125 = vadd.xlane.f32.xlu2 %v3124_v47  ;;  %v3455_v43 = vld [vmem:[%s5297_s4 + $0x220] sm:$0xff] }
0x203e   :  { %v3295_v13 = vmul.f32 1.442695, %v3292_v50  ;;  %v3213_v18 = vpop.f32.mrf.mxu2 }
0x203f   :  { %v3219_v58 = vadd.f32 %v3213_v18, %v3040_v20  ;;  %v3494_v20 = vld [vmem:[%s5297_s4 + $0x250] sm:$0xff] }
0x2040   :  { %4088 = vpow2.f32 %v3295_v13  ;;  %v3499_v13 = vld [vmem:[%s5297_s4 + $0x278] sm:$0xff] }
0x2041   :  { %3516 = vmatpush.msrb.mxu2 %v3499_v13 }
0x2042   :  { %v4087_v48 = vpop.eup %4086 }
0x2043   :  { %v3297_v9 = vsel %vm1012_vm6, %v4087_v48, 0.0 }
0x2044   :  { %3298 = vadd.xlane.f32.xlu0 %v3297_v9  ;;  %v3497_v9 = vld [vmem:[%s5297_s4 + $0x268] sm:$0xff] }
0x2046   :  { %v4089_v54 = vpop.eup %4088 }
0x2047   :  { %v3300_v14 = vsel %vm1012_vm6, %v4089_v54, 0.0 }
0x2048   :  { %3301 = vadd.xlane.f32.xlu2 %v3300_v14 }
0x204f   :  { %v3905_v49 = vpop.permute.xlu1 %3904 }
0x2050   :  { %v3906_v5 = vunpack.i.l.bf16 %v3905_v49  ;;  %v3907_v52 = vunpack.i.h.bf16 %v3905_v49  ;;  %v3496_v49 = vld [vmem:[%s5297_s4 + $0x260] sm:$0xff] }
0x2052   :  { %3183 = vmatpush.msrb.mxu1 %v3906_v5 }
0x2054   :  { %3184 = vmatpush.msrb.mxu1 %v3907_v52 }
0x2058   :  { %3909 = vrot.lane.b32.xlu0 %v5080_v15, %s4145_s7 }
0x2060   :  { %3914 = vrot.lane.b32.xlu2 %v5133_v26, %s4145_s7 }
0x20af   :  { %v3126_v53 = vpop.xlane.xlu2 %3125 }
0x20b0   :  { %4090 = vrcp.f32 %v3126_v53  ;;  %v3495_v53 = vld [vmem:[%s5297_s4 + $0x258] sm:$0xff] }
0x20b6   :  { %v4091_v56 = vpop.eup %4090 }
0x20b7   :  { %v3130_v57 = vmul.f32 %v4091_v56, %v4085_v42  ;;  %v3299_v59 = vpop.xlane.xlu0 %3298  ;;  %v3456_v42 = vld [vmem:[%s5297_s4 + $0x228] sm:$0xff] }
0x20b9   :  { %3820 = vmatmul.msk.f32.vlgmr.msrb.gmra.mxu1 %vm1012_vm6, %v3130_v57 }
0x20bb   :  { %v3302_v3 = vpop.xlane.xlu2 %3301 }
0x20bc   :  { %4092 = vrcp.f32 %v3302_v3 }
0x20bd   :  { %4094 = vrcp.f32 %v3299_v59 }
0x20c2   :  { %v4093_v61 = vpop.eup %4092 }
0x20c3   :  { %v3915_v46 = vpop.permute.xlu2 %3914  ;;  %v3306_v27 = vmul.f32 %v4093_v61, %v4089_v54  ;;  %v4095_v26 = vpop.eup %4094 }
0x20c4   :  { %v3916_v63 = vunpack.i.l.bf16 %v3915_v46  ;;  %v3917_v38 = vunpack.i.h.bf16 %v3915_v46  ;;  %v3305_v6 = vmul.f32 %v4095_v26, %v4087_v48  ;;  %v3498_v48 = vld [vmem:[%s5297_s4 + $0x270] sm:$0xff]  ;;  %v3943_v26 = vld [vmem:[%s5298_s5 + $0x1b] ss:$0 sm:$0xff] }
0x20c5   :  { %3517 = vmatpush.msrb.mxu2 %v3498_v48 }
0x20c6   :  { %3359 = vmatpush.msrb.mxu3 %v3916_v63 }
0x20c7   :  { %3518 = vmatpush.msrb.mxu2 %v3497_v9 }
0x20c8   :  { %3360 = vmatpush.msrb.mxu3 %v3917_v38  ;;  %v3942_v38 = vld [vmem:[%s5298_s5 + $0x1a] ss:$0 sm:$0xff] }
0x20c9   :  { %3830 = vmatmul.msk.f32.vlgmr.msrb.gmra.mxu3 %vm1012_vm6, %v3306_v27  ;;  %3519 = vmatpush.msrb.mxu2 %v3496_v49 }
0x20ca   :  { %v3910_v15 = vpop.permute.xlu0 %3909 }
0x20cb   :  { %v3911_v62 = vunpack.i.l.bf16 %v3910_v15  ;;  %v3912_v4 = vunpack.i.h.bf16 %v3910_v15  ;;  %3520 = vmatpush.msrb.mxu2 %v3495_v53 }
0x20cd   :  { %3330 = vmatpush.msra.mxu1 %v3911_v62  ;;  %3521 = vmatpush.msrb.mxu2 %v3494_v20 }
0x20cf   :  { %3331 = vmatpush.msra.mxu1 %v3912_v4 }
0x20d0   :  { %3829 = vmatmul.msk.f32.vlgmr.msra.gmra.mxu1 %vm1012_vm6, %v3305_v6 }
0x2136   :  { %v3186_v11 = vpop.f32.mrf.mxu1 }
0x2137   :  { %3822 = vmatmul.msk.f32.gmra.mxu2 %vm118_vm1, %v3186_v11 }
0x214c   :  { %v3362_v19 = vpop.f32.mrf.mxu3 }
0x214d   :  { %v3333_v10 = vpop.f32.mrf.mxu1 }
0x214e   :  { %3831 = vmatmul.msk.f32.vlgmr.msrb.gmra.mxu0 %vm118_vm1, %v3333_v10 }
0x2156   :  { %3832 = vmatmul.msk.f32.gmra.mxu0 %vm118_vm1, %v3362_v19 }
0x21ba   :  { %v3216_v2 = vpop.f32.mrf.mxu2 }
0x21bb   :  { %v3220_v1 = vadd.f32 %v3216_v2, %v3043_v21 }
0x21cb   :  { %v3389_v0 = vpop.f32.mrf.mxu0 }
0x21cc   :  { %v3395_v8 = vadd.f32 %v3389_v0, %v3219_v58  ;;  %v3493_v58 = vld [vmem:[%s5297_s4 + $0x248] sm:$0xff]  ;;  %v3944_v0 = vld [vmem:[%s5298_s5 + $0x16] ss:$0 sm:$0xff] }
0x21cd   :  { %3522 = vmatpush.msrb.mxu2 %v3493_v58 }
0x21ce   :  { %v3399_v44 = vadd.f32 %v3941_v24, %v3395_v8 }
0x21d0   :  { %v3401_v41 = vadd.f32 %v3399_v44, %v4967_v60 }
0x21d2   :  { %v3403_v25 = vsel %vm48_vm0, %v3401_v41, 0.0 }
0x21d3   :  { %3404 = vadd.xlane.f32.xlu1 %v3403_v25  ;;  %v3392_v55 = vpop.f32.mrf.mxu0  ;;  %v3945_v25 = vld [vmem:[%s5298_s5 + $0x17] ss:$0 sm:$0xff] }
0x21d4   :  { %v3396_v22 = vadd.f32 %v3392_v55, %v3220_v1 }
0x21d6   :  { %v3400_v34 = vadd.f32 %v3941_v24, %v3396_v22  ;;  %v3492_v24 = vld [vmem:[%s5297_s4 + $0x240] sm:$0xff] }
0x21d7   :  { %3523 = vmatpush.msrb.mxu2 %v3492_v24 }
0x21d8   :  { %v3402_v23 = vadd.f32 %v3400_v34, %v5048_v51  ;;  %v3458_v51 = vld [vmem:[%s5297_s4 + $0x238] sm:$0xff] }
0x21d9   :  { %3479 = vmatpush.msrb.mxu1 %v3458_v51 }
0x21da   :  { %v3406_v29 = vsel %vm48_vm0, %v3402_v23, 0.0 }
0x21db   :  { %3407 = vadd.xlane.f32.xlu0 %v3406_v29  ;;  %3480 = vmatpush.msrb.mxu1 %v3457_v40 }
0x21dd   :  { %3481 = vmatpush.msrb.mxu1 %v3456_v42 }
0x21df   :  { %3482 = vmatpush.msrb.mxu1 %v3455_v43 }
0x2246   :  { %v3405_v30 = vpop.xlane.xlu1 %3404 }
0x2247   :  { %v3409_v35 = vmul.f32 %v3405_v30, %v4378_v39 }
0x2249   :  { %v3411_v12 = vsub.f32 %v3401_v41, %v3409_v35 }
0x224b   :  { %v3413_v31 = vmul.f32 %v3411_v12, %v3411_v12 }
0x224d   :  { %v3415_v17 = vsel %vm48_vm0, %v3413_v31, 0.0 }
0x224e   :  { %3416 = vadd.xlane.f32.xlu2 %v3415_v17  ;;  %v3408_v60 = vpop.xlane.xlu0 %3407 }
0x224f   :  { %v3410_v32 = vmul.f32 %v3408_v60, %v4378_v39 }
0x2251   :  { %v3412_v33 = vsub.f32 %v3402_v23, %v3410_v32 }
0x2253   :  { %v3414_v37 = vmul.f32 %v3412_v33, %v3412_v33 }
0x2255   :  { %v3418_v36 = vsel %vm48_vm0, %v3414_v37, 0.0 }
0x2256   :  { %3419 = vadd.xlane.f32.xlu1 %v3418_v36 }
0x22c1   :  { %v3417_v45 = vpop.xlane.xlu2 %3416 }
0x22c2   :  { %v3421_v47 = vmul.f32 %v3417_v45, %v4378_v39 }
0x22c4   :  { %v3423_v50 = vadd.f32 1e-05, %v3421_v47 }
0x22c6   :  { %4096 = vrsqrt.f32 %v3423_v50  ;;  %vm3431_vm6 = vweird.f32 %v3423_v50 }
0x22c9   :  { %v3420_v54 = vpop.xlane.xlu1 %3419 }
0x22ca   :  { %v3422_v14 = vmul.f32 %v3420_v54, %v4378_v39 }
0x22cc   :  { %v4097_v5 = vpop.eup %4096  ;;  %v3424_v52 = vadd.f32 1e-05, %v3422_v14 }
0x22cd   :  { %v3426_v56 = vmul.f32 %v4097_v5, %v3423_v50  ;;  %vm3432_vm1 = vweird.f32 %v4097_v5 }
0x22ce   :  { %4098 = vrsqrt.f32 %v3424_v52  ;;  %vm3433_vm3 = vmor %vm3431_vm6, %vm3432_vm1  ;;  %vm3441_vm5 = vweird.f32 %v3424_v52 }
0x22cf   :  { %v3427_v57 = vmul.f32 %v4097_v5, %v3426_v56 }
0x22d1   :  { %v3428_v3 = vmul.f32 0.5, %v3427_v57  ;;  %v3946_v57 = vld [vmem:[%s5298_s5 + $0x1c] ss:$0 sm:$0xff] }
0x22d3   :  { %v3429_v59 = vsub.f32 1.5, %v3428_v3 }
0x22d4   :  { %v4099_v46 = vpop.eup %4098 }
0x22d5   :  { %v3430_v61 = vmul.f32 %v4097_v5, %v3429_v59  ;;  %v3436_v63 = vmul.f32 %v4099_v46, %v3424_v52  ;;  %vm3442_vm4 = vweird.f32 %v4099_v46 }
0x22d6   :  { %vm3443_vm7 = vmor %vm3441_vm5, %vm3442_vm4 }
0x22d7   :  { %v3434_v27 = vsel %vm3433_vm3, %v4097_v5, %v3430_v61  ;;  %v3437_v15 = vmul.f32 %v4099_v46, %v3436_v63  ;;  %v3947_v61 = vld [vmem:[%s5298_s5 + $0x1d] ss:$0 sm:$0xff] }
0x22d8   :  { %v3445_v62 = vmul.f32 %v3434_v27, %v3411_v12 }
0x22d9   :  { %v3438_v4 = vmul.f32 0.5, %v3437_v15 }
0x22da   :  { %v3449_v6 = vmul.f32 %v3942_v38, %v3445_v62 }
0x22db   :  { %v3439_v7 = vsub.f32 1.5, %v3438_v4 }
0x22dc   :  { %v3453_v11 = vadd.f32 %v3943_v26, %v3449_v6 }
0x22dd   :  { %v3440_v10 = vmul.f32 %v4099_v46, %v3439_v7 }
0x22de   :  { %3833 = vmatmul.msk.f32.vlgmr.msrb.gmra.mxu1 %vm48_vm0, %v3453_v11 }
0x22df   :  { %v3444_v19 = vsel %vm3443_vm7, %v4099_v46, %v3440_v10 }
0x22e0   :  { %v3446_v28 = vmul.f32 %v3444_v19, %v3412_v33 }
0x22e2   :  { %v3450_v16 = vmul.f32 %v3942_v38, %v3446_v28 }
0x22e4   :  { %v3454_v18 = vadd.f32 %v3943_v26, %v3450_v16 }
0x22e6   :  { %3834 = vmatmul.msk.f32.gmra.mxu1 %vm48_vm0, %v3454_v18 }
0x235b   :  { %v3484_v8 = vpop.f32.mrf.mxu1 }
0x235c   :  { %v3485_v44 = vadd.f32 %v3944_v0, %v3484_v8 }
0x235e   :  { %v3490_v2 = vmax.f32 %v3485_v44, 0.0 }
0x2360   :  { %3835 = vmatmul.msk.f32.vlgmr.msrb.gmra.mxu2 %vm1746_vm2, %v3490_v2 }
0x2363   :  { %v3487_v21 = vpop.f32.mrf.mxu1 }
0x2364   :  { %v3488_v41 = vadd.f32 %v3944_v0, %v3487_v21 }
0x2366   :  { %v3491_v1 = vmax.f32 %v3488_v41, 0.0 }
0x2368   :  { %3836 = vmatmul.msk.f32.gmra.mxu2 %vm1746_vm2, %v3491_v1 }
0x23e3   :  { %v3525_v55 = vpop.f32.mrf.mxu2 }
0x23e4   :  { %v3526_v22 = vadd.f32 %v3945_v25, %v3525_v55 }
0x23e6   :  { %v3531_v34 = vadd.f32 %v3526_v22, %v3453_v11 }
0x23e8   :  { %v3533_v23 = vsel %vm48_vm0, %v3531_v34, 0.0 }
0x23e9   :  { %3534 = vadd.xlane.f32.xlu0 %v3533_v23 }
0x23eb   :  { %v3528_v29 = vpop.f32.mrf.mxu2 }
0x23ec   :  { %v3529_v30 = vadd.f32 %v3945_v25, %v3528_v29 }
0x23ee   :  { %v3532_v35 = vadd.f32 %v3529_v30, %v3454_v18 }
0x23f0   :  { %v3536_v12 = vsel %vm48_vm0, %v3532_v35, 0.0 }
0x23f1   :  { %3537 = vadd.xlane.f32.xlu1 %v3536_v12 }
0x245c   :  { %v3535_v31 = vpop.xlane.xlu0 %3534 }
0x245d   :  { %v3539_v17 = vmul.f32 %v3535_v31, %v4378_v39 }
0x245f   :  { %v3541_v60 = vsub.f32 %v3531_v34, %v3539_v17  ;;  %v3948_v17 = vld [vmem:[%s5298_s5 + $0x1e] ss:$0 sm:$0xff] }
0x2461   :  { %v3543_v32 = vmul.f32 %v3541_v60, %v3541_v60 }
0x2463   :  { %v3545_v33 = vsel %vm48_vm0, %v3543_v32, 0.0 }
0x2464   :  { %v3538_v37 = vpop.xlane.xlu1 %3537  ;;  %3546 = vadd.xlane.f32.xlu2 %v3545_v33  ;;  %v3949_v33 = vld [vmem:[%s5298_s5 + $0x1f] ss:$0 sm:$0xff]  ;;  %s4149_s5 = smov 128  }
0x2465   :  { %v3540_v36 = vmul.f32 %v3538_v37, %v4378_v39 }
0x2467   :  { %v3542_v51 = vsub.f32 %v3532_v35, %v3540_v36 }
0x2469   :  { %v3544_v40 = vmul.f32 %v3542_v51, %v3542_v51 }
0x246b   :  { %v3548_v42 = vsel %vm48_vm0, %v3544_v40, 0.0 }
0x246c   :  { %3549 = vadd.xlane.f32.xlu0 %v3548_v42 }
0x24d7   :  { %v3547_v43 = vpop.xlane.xlu2 %3546 }
0x24d8   :  { %v3551_v45 = vmul.f32 %v3547_v43, %v4378_v39 }
0x24da   :  { %v3553_v47 = vadd.f32 1e-05, %v3551_v45 }
0x24dc   :  { %4100 = vrsqrt.f32 %v3553_v47  ;;  %vm3561_vm8 = vweird.f32 %v3553_v47 }
0x24df   :  { %v3550_v50 = vpop.xlane.xlu0 %3549 }
0x24e0   :  { %v3552_v13 = vmul.f32 %v3550_v50, %v4378_v39 }
0x24e2   :  { %v4101_v48 = vpop.eup %4100  ;;  %v3554_v9 = vadd.f32 1e-05, %v3552_v13 }
0x24e3   :  { %v3556_v54 = vmul.f32 %v4101_v48, %v3553_v47  ;;  %vm3562_vm2 = vweird.f32 %v4101_v48 }
0x24e4   :  { %4102 = vrsqrt.f32 %v3554_v9  ;;  %vm3563_vm9 = vmor %vm3561_vm8, %vm3562_vm2  ;;  %vm3571_vm11 = vweird.f32 %v3554_v9 }
0x24e5   :  { %v3557_v14 = vmul.f32 %v4101_v48, %v3556_v54 }
0x24e7   :  { %v3558_v49 = vmul.f32 0.5, %v3557_v14 }
0x24e9   :  { %v3559_v5 = vsub.f32 1.5, %v3558_v49 }
0x24ea   :  { %v4103_v52 = vpop.eup %4102 }
0x24eb   :  { %v3560_v53 = vmul.f32 %v4101_v48, %v3559_v5  ;;  %v3566_v56 = vmul.f32 %v4103_v52, %v3554_v9  ;;  %vm3572_vm10 = vweird.f32 %v4103_v52 }
0x24ec   :  { %vm3573_vm12 = vmor %vm3571_vm11, %vm3572_vm10 }
0x24ed   :  { %v3567_v3 = vmul.f32 %v4103_v52, %v3566_v56  ;;  %v3564_v59 = vsel %vm3563_vm9, %v4101_v48, %v3560_v53 }
0x24ee   :  { %v3575_v46 = vmul.f32 %v3564_v59, %v3541_v60 }
0x24ef   :  { %v3568_v63 = vmul.f32 0.5, %v3567_v3 }
0x24f0   :  { %v3579_v38 = vmul.f32 %v3946_v57, %v3575_v46 }
0x24f1   :  { %v3569_v27 = vsub.f32 1.5, %v3568_v63 }
0x24f2   :  { %v3583_v15 = vadd.f32 %v3947_v61, %v3579_v38 }
0x24f3   :  { %v3570_v26 = vmul.f32 %v4103_v52, %v3569_v27 }
0x24f4   :  { %v3585_v62 = vsel %vm48_vm0, %v3583_v15, 0.0 }
0x24f5   :  { %3586 = vadd.xlane.f32.xlu1 %v3585_v62  ;;  %v3574_v4 = vsel %vm3573_vm12, %v4103_v52, %v3570_v26 }
0x24f6   :  { %v3576_v6 = vmul.f32 %v3574_v4, %v3542_v51 }
0x24f8   :  { %v3580_v7 = vmul.f32 %v3946_v57, %v3576_v6 }
0x24fa   :  { %v3584_v11 = vadd.f32 %v3947_v61, %v3580_v7 }
0x24fc   :  { %v3588_v10 = vsel %vm48_vm0, %v3584_v11, 0.0 }
0x24fd   :  { %3589 = vadd.xlane.f32.xlu2 %v3588_v10 }
0x2568   :  { %v3587_v19 = vpop.xlane.xlu1 %3586 }
0x2569   :  { %v3591_v28 = vmul.f32 %v3587_v19, %v4378_v39 }
0x256b   :  { %v3593_v16 = vsub.f32 %v3583_v15, %v3591_v28 }
0x256d   :  { %v3595_v18 = vmul.f32 %v3593_v16, %v3593_v16 }
0x256f   :  { %v3597_v20 = vsel %vm48_vm0, %v3595_v18, 0.0 }
0x2570   :  { %3598 = vadd.xlane.f32.xlu0 %v3597_v20  ;;  %v3590_v58 = vpop.xlane.xlu2 %3589 }
0x2571   :  { %v3592_v24 = vmul.f32 %v3590_v58, %v4378_v39 }
0x2573   :  { %v3594_v0 = vsub.f32 %v3584_v11, %v3592_v24 }
0x2575   :  { %v3596_v8 = vmul.f32 %v3594_v0, %v3594_v0 }
0x2577   :  { %v3600_v44 = vsel %vm48_vm0, %v3596_v8, 0.0 }
0x2578   :  { %3601 = vadd.xlane.f32.xlu1 %v3600_v44 }
0x25e3   :  { %v3599_v2 = vpop.xlane.xlu0 %3598 }
0x25e4   :  { %v3603_v21 = vmul.f32 %v3599_v2, %v4378_v39 }
0x25e6   :  { %v3605_v41 = vadd.f32 1e-05, %v3603_v21 }
0x25e8   :  { %4104 = vrsqrt.f32 %v3605_v41  ;;  %vm3613_vm14 = vweird.f32 %v3605_v41 }
0x25eb   :  { %v3602_v1 = vpop.xlane.xlu1 %3601 }
0x25ec   :  { %v3604_v25 = vmul.f32 %v3602_v1, %v4378_v39 }
0x25ee   :  { %v4105_v55 = vpop.eup %4104  ;;  %v3606_v22 = vadd.f32 1e-05, %v3604_v25 }
0x25ef   :  { %v3608_v34 = vmul.f32 %v4105_v55, %v3605_v41  ;;  %vm3614_vm13 = vweird.f32 %v4105_v55 }
0x25f0   :  { %4106 = vrsqrt.f32 %v3606_v22  ;;  %vm3615_vm15 = vmor %vm3613_vm14, %vm3614_vm13  ;;  %vm3623_vm6 = vweird.f32 %v3606_v22 }
0x25f1   :  { %v3609_v23 = vmul.f32 %v4105_v55, %v3608_v34 }
0x25f3   :  { %v3610_v29 = vmul.f32 0.5, %v3609_v23 }
0x25f5   :  { %v3611_v30 = vsub.f32 1.5, %v3610_v29 }
0x25f6   :  { %v4107_v35 = vpop.eup %4106 }
0x25f7   :  { %v3612_v12 = vmul.f32 %v4105_v55, %v3611_v30  ;;  %v3618_v31 = vmul.f32 %v4107_v35, %v3606_v22  ;;  %vm3624_vm1 = vweird.f32 %v4107_v35 }
0x25f8   :  { %vm3625_vm3 = vmor %vm3623_vm6, %vm3624_vm1 }
0x25f9   :  { %v3616_v60 = vsel %vm3615_vm15, %v4105_v55, %v3612_v12  ;;  %v3619_v32 = vmul.f32 %v4107_v35, %v3618_v31 }
0x25fa   :  { %v3627_v39 = vmul.f32 %v3616_v60, %v3593_v16 }
0x25fb   :  { %v3620_v37 = vmul.f32 0.5, %v3619_v32 }
0x25fc   :  { %v3631_v36 = vmul.f32 %v3948_v17, %v3627_v39 }
0x25fd   :  { %v3621_v51 = vsub.f32 1.5, %v3620_v37 }
0x25fe   :  { %v3635_v40 = vadd.f32 %v3949_v33, %v3631_v36 }
0x25ff   :  { %v3622_v42 = vmul.f32 %v4107_v35, %v3621_v51 }
0x2600   :  { %3637 = vst.msk [vmem:[#allocation2] sm:$0xff] %vm48_vm0, %v3635_v40 }
0x2601   :  { %v3626_v43 = vsel %vm3625_vm3, %v4107_v35, %v3622_v42 }
0x2602   :  { %v3628_v45 = vmul.f32 %v3626_v43, %v3594_v0 }
0x2604   :  { %v3632_v47 = vmul.f32 %v3948_v17, %v3628_v45 }
0x2606   :  { %v3636_v50 = vadd.f32 %v3949_v33, %v3632_v47 }
0x2608   :  { %3638 = vst.msk [vmem:[#allocation2 + $0x8] sm:$0xff] %vm48_vm0, %v3636_v50 }
0x2609   :  { %3651 = dma.vmem_to_hbm [thread:$0]  %s3644_s0, 256, %s3646_s24, [#allocation3], %s4149_s5, %s4149_s5, %s4150_s1  }
0x260a   :  { %4138 = dma.done.wait [#allocation3], 256  }
0x260b   :  { %4139 = vsyncadd [#allocation3], 4294967040 }
0x260c   :  { %3656 = vsyncpa [#allocation3], 1 }

</bundles_post_ra>
